<compile_context>
chip_gen: v6e
topology: v6e:2x2x1
jax: 0.10.0
libtpu: 0.0.40
codegen_flags: <defaults>
</compile_context>

<pallas_src>
import jax
import jax.numpy as jnp
from jax.experimental import pallas as pl
from jax.experimental.pallas import tpu as pltpu


def _round_up(x, m):
    return (x + m - 1) // m * m


def _autoencoder_kernel(x_ref,
                        w1, b1, w2, b2, w34, b34, w5, b5, w6, b6,
                        o_ref):
    """Five fused Linear layers: bf16 MXU operands, f32 accumulate / elementwise."""
    x = x_ref[...]                                     # (TB, Fp) f32

    def linear(h, w_ref, b_ref):
        # Weights are already bf16 in VMEM; cast activations at the dot only.
        return jnp.dot(h.astype(jnp.bfloat16), w_ref[...],
                       preferred_element_type=jnp.float32) + b_ref[...]

    h = jnp.maximum(linear(x, w1, b1), 0.0)            # Linear(in,128)  + ReLU
    h = jnp.maximum(linear(h, w2, b2), 0.0)            # Linear(128,64)  + ReLU
    h = jnp.maximum(linear(h, w34, b34), 0.0)          # fused Linear(64,32)@Linear(32,64) + ReLU
    h = jnp.maximum(linear(h, w5, b5), 0.0)            # Linear(64,128)  + ReLU
    h = jnp.tanh(linear(h, w6, b6))                    # Linear(128,in)  + Tanh
    o_ref[...] = h.astype(o_ref.dtype)


def prepare_params(params, input_size):
    """One-time param prep: fuse L3/L4, pad feature dims to 128 lanes, cast weights to bf16.

    params: list of 6 (W, b) with W shape (in, out) f32 and b shape (1, out) f32.
    Returns flat tuple (w1,b1,w2,b2,w34,b34,w5,b5,w6,b6): bf16 weights, f32 biases.
    """
    (w1, b1), (w2, b2), (w3, b3), (w4, b4), (w5, b5), (w6, b6) = params
    fp = _round_up(input_size, 128)

    # Algebraic fusion of the activation-free encoder(L3)/decoder(L1) boundary.
    w34 = w3 @ w4                                      # (64, 64)
    b34 = b3 @ w4 + b4                                 # (1, 64)

    # Zero-pad the feature dim for lane-dense loads/stores (math unchanged).
    w1p = jnp.zeros((fp, 128), w1.dtype).at[:input_size, :].set(w1)
    w6p = jnp.zeros((128, fp), w6.dtype).at[:, :input_size].set(w6)
    b6p = jnp.zeros((1, fp), b6.dtype).at[:, :input_size].set(b6)

    bf16 = lambda w: w.astype(jnp.bfloat16)
    return (bf16(w1p), b1, bf16(w2), b2, bf16(w34), b34,
            bf16(w5), b5, bf16(w6p), b6p)


@jax.jit
def autoencoder_forward(x, prepped):
    """x: (batch, input_size) f32.  prepped: output of prepare_params."""
    batch, input_size = x.shape
    fp = prepped[0].shape[0]                           # padded feature dim (multiple of 128)

    # Batch tile: large enough to fill the MXU / reach HBM roofline, bounded so
    # double-buffered tiles + weights stay far below v7x's 32 MiB scoped VMEM.
    tb = min(1024, _round_up(batch, 8))
    padded_batch = _round_up(batch, tb)
    grid = (padded_batch // tb,)

    xp = jnp.pad(x, ((0, padded_batch - batch), (0, fp - input_size)))

    # Weights/biases: full-array blocks, constant index_map -> VMEM-resident across steps.
    weight_specs = [pl.BlockSpec(p.shape, lambda i: (0, 0)) for p in prepped]

    flops = 2 * padded_batch * (fp * 128 + 128 * 64 + 64 * 64 + 64 * 128 + 128 * fp)
    bytes_accessed = int(xp.size * 4 * 2
                         + sum(int(p.size) * p.dtype.itemsize for p in prepped))
    cost = pl.CostEstimate(flops=flops,
                           transcendentals=padded_batch * fp,
                           bytes_accessed=bytes_accessed)

    out = pl.pallas_call(
        _autoencoder_kernel,
        out_shape=jax.ShapeDtypeStruct((padded_batch, fp), x.dtype),
        grid=grid,
        in_specs=[pl.BlockSpec((tb, fp), lambda i: (i, 0))] + weight_specs,
        out_specs=pl.BlockSpec((tb, fp), lambda i: (i, 0)),
        compiler_params=pltpu.CompilerParams(
            dimension_semantics=("parallel",)),
        cost_estimate=cost,
    )(xp, *prepped)

    return out[:batch, :input_size]


def init_params(key, input_size):
    """Deterministic init mimicking PyTorch nn.Linear (uniform +-1/sqrt(fan_in)).

    Returns list of (W, b) with W stored as (in_features, out_features)."""
    dims = [(input_size, 128), (128, 64), (64, 32),
            (32, 64), (64, 128), (128, input_size)]
    params = []
    for (fan_in, fan_out) in dims:
        key, kw, kb = jax.random.split(key, 3)
        bound = 1.0 / jnp.sqrt(jnp.float32(fan_in))
        w = jax.random.uniform(kw, (fan_in, fan_out), jnp.float32, -bound, bound)
        b = jax.random.uniform(kb, (1, fan_out), jnp.float32, -bound, bound)
        params.append((w, b))
    return params


def reference_forward(x, params):
    """Pure-f32, unfused reference with the original module's semantics."""
    h = x
    acts = ["relu", "relu", None, "relu", "relu", "tanh"]
    for (w, b), act in zip(params, acts):
        h = h @ w + b
        if act == "relu":
            h = jnp.maximum(h, 0.0)
        elif act == "tanh":
            h = jnp.tanh(h)
    return h


def emulated_forward(x, prepped, input_size):
    """Pure-JAX emulation of the exact kernel math (bf16 MXU operands + L3/L4 fusion)."""
    fp = prepped[0].shape[0]
    h = jnp.pad(x, ((0, 0), (0, fp - input_size)))
    ws, bs = prepped[0::2], prepped[1::2]
    for idx, (w, b) in enumerate(zip(ws, bs)):
        h = jnp.dot(h.astype(jnp.bfloat16), w, preferred_element_type=jnp.float32) + b
        h = jnp.tanh(h) if idx == len(ws) - 1 else jnp.maximum(h, 0.0)
    return h[:, :input_size]


if __name__ == "__main__":
    key = jax.random.PRNGKey(0)
    key, kx = jax.random.split(key)

    batch = 2048          # exercises a 2-step batch grid (TB=1024)
    input_size = 64       # padded to 128 lanes inside the wrapper

    x = jax.random.normal(kx, (batch, input_size), jnp.float32)
    params = init_params(key, input_size)
    prepped = prepare_params(params, input_size)       # one-time: fuse / pad / bf16

    out = jax.block_until_ready(autoencoder_forward(x, prepped))
    assert out.shape == (batch, input_size)
    assert out.dtype == x.dtype

    # Tight check vs an emulation of the exact kernel math.
    emu = emulated_forward(x, prepped, input_size)
    assert jnp.allclose(out, emu, atol=1e-3, rtol=1e-3), "Pallas mismatch vs bf16 emulation"

    # Loose check vs the f32 PyTorch-semantics reference (tolerance covers bf16 rounding).
    ref = reference_forward(x, params)
    assert jnp.allclose(out, ref, atol=5e-2, rtol=5e-2), "Pallas mismatch vs f32 reference"

    # Ragged batch exercises the batch-padding path.
    x_small = jax.random.normal(jax.random.PRNGKey(1), (10, input_size), jnp.float32)
    out_small = jax.block_until_ready(autoencoder_forward(x_small, prepped))
    emu_small = emulated_forward(x_small, prepped, input_size)
    assert out_small.shape == (10, input_size)
    assert jnp.allclose(out_small, emu_small, atol=1e-3, rtol=1e-3)

    print("KERNEL_OK")
</pallas_src>

<mosaic_0001>
module attributes {stable_mosaic.version = 11 : i64} {
  func.func @_autoencoder_kernel(%arg0: i32, %arg1: memref<1024x128xf32, #tpu.memory_space<vmem>>, %arg2: memref<128x128xbf16, #tpu.memory_space<vmem>>, %arg3: memref<1x128xf32, #tpu.memory_space<vmem>>, %arg4: memref<128x64xbf16, #tpu.memory_space<vmem>>, %arg5: memref<1x64xf32, #tpu.memory_space<vmem>>, %arg6: memref<64x64xbf16, #tpu.memory_space<vmem>>, %arg7: memref<1x64xf32, #tpu.memory_space<vmem>>, %arg8: memref<64x128xbf16, #tpu.memory_space<vmem>>, %arg9: memref<1x128xf32, #tpu.memory_space<vmem>>, %arg10: memref<128x128xbf16, #tpu.memory_space<vmem>>, %arg11: memref<1x128xf32, #tpu.memory_space<vmem>>, %arg12: memref<1024x128xf32, #tpu.memory_space<vmem>>) attributes {dimension_semantics = [#tpu.dimension_semantics<parallel>], iteration_bounds = array<i64: 2>, scalar_prefetch = 0 : i64, scratch_operands = 0 : i64, tpu.core_type = #tpu.core_type<tc>, window_params = [{transform_indices = @transform_0, window_bounds = array<i64: 1024, 128>}, {pipeline_mode = #tpu.pipeline_mode<synchronous>, transform_indices = @transform_1, window_bounds = array<i64: 128, 128>}, {pipeline_mode = #tpu.pipeline_mode<synchronous>, transform_indices = @transform_2, window_bounds = array<i64: 1, 128>}, {pipeline_mode = #tpu.pipeline_mode<synchronous>, transform_indices = @transform_3, window_bounds = array<i64: 128, 64>}, {pipeline_mode = #tpu.pipeline_mode<synchronous>, transform_indices = @transform_4, window_bounds = array<i64: 1, 64>}, {pipeline_mode = #tpu.pipeline_mode<synchronous>, transform_indices = @transform_5, window_bounds = array<i64: 64, 64>}, {pipeline_mode = #tpu.pipeline_mode<synchronous>, transform_indices = @transform_6, window_bounds = array<i64: 1, 64>}, {pipeline_mode = #tpu.pipeline_mode<synchronous>, transform_indices = @transform_7, window_bounds = array<i64: 64, 128>}, {pipeline_mode = #tpu.pipeline_mode<synchronous>, transform_indices = @transform_8, window_bounds = array<i64: 1, 128>}, {pipeline_mode = #tpu.pipeline_mode<synchronous>, transform_indices = @transform_9, window_bounds = array<i64: 128, 128>}, {pipeline_mode = #tpu.pipeline_mode<synchronous>, transform_indices = @transform_10, window_bounds = array<i64: 1, 128>}, {transform_indices = @transform_11, window_bounds = array<i64: 1024, 128>}]} {
    %c0 = arith.constant 0 : index
    %c0_0 = arith.constant 0 : index
    %0 = vector.load %arg1[%c0, %c0_0] : memref<1024x128xf32, #tpu.memory_space<vmem>>, vector<1024x128xf32>
    %1 = arith.truncf %0 : vector<1024x128xf32> to vector<1024x128xbf16>
    %c0_1 = arith.constant 0 : index
    %c0_2 = arith.constant 0 : index
    %2 = vector.load %arg2[%c0_1, %c0_2] : memref<128x128xbf16, #tpu.memory_space<vmem>>, vector<128x128xbf16>
    %cst = arith.constant dense<0.000000e+00> : vector<1024x128xf32>
    %3 = tpu.matmul %1, %2, %cst {dimension_numbers = #tpu.dot_dimension_numbers<[1], [0], [0], [1], [0, 0, 1, 1], [], []>} : vector<1024x128xbf16>, vector<128x128xbf16>, vector<1024x128xf32> -> vector<1024x128xf32>
    %c0_3 = arith.constant 0 : index
    %c0_4 = arith.constant 0 : index
    %4 = vector.load %arg3[%c0_3, %c0_4] : memref<1x128xf32, #tpu.memory_space<vmem>>, vector<1x128xf32>
    %5 = vector.broadcast %4 : vector<1x128xf32> to vector<1024x128xf32>
    %6 = arith.addf %3, %5 : vector<1024x128xf32>
    %cst_5 = arith.constant 0.000000e+00 : f32
    %7 = vector.broadcast %cst_5 : f32 to vector<1024x128xf32>
    %8 = arith.maximumf %6, %7 : vector<1024x128xf32>
    %9 = arith.truncf %8 : vector<1024x128xf32> to vector<1024x128xbf16>
    %c0_6 = arith.constant 0 : index
    %c0_7 = arith.constant 0 : index
    %10 = vector.load %arg4[%c0_6, %c0_7] : memref<128x64xbf16, #tpu.memory_space<vmem>>, vector<128x64xbf16>
    %cst_8 = arith.constant dense<0.000000e+00> : vector<1024x64xf32>
    %11 = tpu.matmul %9, %10, %cst_8 {dimension_numbers = #tpu.dot_dimension_numbers<[1], [0], [0], [1], [0, 0, 1, 1], [], []>} : vector<1024x128xbf16>, vector<128x64xbf16>, vector<1024x64xf32> -> vector<1024x64xf32>
    %c0_9 = arith.constant 0 : index
    %c0_10 = arith.constant 0 : index
    %12 = vector.load %arg5[%c0_9, %c0_10] : memref<1x64xf32, #tpu.memory_space<vmem>>, vector<1x64xf32>
    %13 = vector.broadcast %12 : vector<1x64xf32> to vector<1024x64xf32>
    %14 = arith.addf %11, %13 : vector<1024x64xf32>
    %cst_11 = arith.constant 0.000000e+00 : f32
    %15 = vector.broadcast %cst_11 : f32 to vector<1024x64xf32>
    %16 = arith.maximumf %14, %15 : vector<1024x64xf32>
    %17 = arith.truncf %16 : vector<1024x64xf32> to vector<1024x64xbf16>
    %c0_12 = arith.constant 0 : index
    %c0_13 = arith.constant 0 : index
    %18 = vector.load %arg6[%c0_12, %c0_13] : memref<64x64xbf16, #tpu.memory_space<vmem>>, vector<64x64xbf16>
    %cst_14 = arith.constant dense<0.000000e+00> : vector<1024x64xf32>
    %19 = tpu.matmul %17, %18, %cst_14 {dimension_numbers = #tpu.dot_dimension_numbers<[1], [0], [0], [1], [0, 0, 1, 1], [], []>} : vector<1024x64xbf16>, vector<64x64xbf16>, vector<1024x64xf32> -> vector<1024x64xf32>
    %c0_15 = arith.constant 0 : index
    %c0_16 = arith.constant 0 : index
    %20 = vector.load %arg7[%c0_15, %c0_16] : memref<1x64xf32, #tpu.memory_space<vmem>>, vector<1x64xf32>
    %21 = vector.broadcast %20 : vector<1x64xf32> to vector<1024x64xf32>
    %22 = arith.addf %19, %21 : vector<1024x64xf32>
    %cst_17 = arith.constant 0.000000e+00 : f32
    %23 = vector.broadcast %cst_17 : f32 to vector<1024x64xf32>
    %24 = arith.maximumf %22, %23 : vector<1024x64xf32>
    %25 = arith.truncf %24 : vector<1024x64xf32> to vector<1024x64xbf16>
    %c0_18 = arith.constant 0 : index
    %c0_19 = arith.constant 0 : index
    %26 = vector.load %arg8[%c0_18, %c0_19] : memref<64x128xbf16, #tpu.memory_space<vmem>>, vector<64x128xbf16>
    %cst_20 = arith.constant dense<0.000000e+00> : vector<1024x128xf32>
    %27 = tpu.matmul %25, %26, %cst_20 {dimension_numbers = #tpu.dot_dimension_numbers<[1], [0], [0], [1], [0, 0, 1, 1], [], []>} : vector<1024x64xbf16>, vector<64x128xbf16>, vector<1024x128xf32> -> vector<1024x128xf32>
    %c0_21 = arith.constant 0 : index
    %c0_22 = arith.constant 0 : index
    %28 = vector.load %arg9[%c0_21, %c0_22] : memref<1x128xf32, #tpu.memory_space<vmem>>, vector<1x128xf32>
    %29 = vector.broadcast %28 : vector<1x128xf32> to vector<1024x128xf32>
    %30 = arith.addf %27, %29 : vector<1024x128xf32>
    %cst_23 = arith.constant 0.000000e+00 : f32
    %31 = vector.broadcast %cst_23 : f32 to vector<1024x128xf32>
    %32 = arith.maximumf %30, %31 : vector<1024x128xf32>
    %33 = arith.truncf %32 : vector<1024x128xf32> to vector<1024x128xbf16>
    %c0_24 = arith.constant 0 : index
    %c0_25 = arith.constant 0 : index
    %34 = vector.load %arg10[%c0_24, %c0_25] : memref<128x128xbf16, #tpu.memory_space<vmem>>, vector<128x128xbf16>
    %cst_26 = arith.constant dense<0.000000e+00> : vector<1024x128xf32>
    %35 = tpu.matmul %33, %34, %cst_26 {dimension_numbers = #tpu.dot_dimension_numbers<[1], [0], [0], [1], [0, 0, 1, 1], [], []>} : vector<1024x128xbf16>, vector<128x128xbf16>, vector<1024x128xf32> -> vector<1024x128xf32>
    %c0_27 = arith.constant 0 : index
    %c0_28 = arith.constant 0 : index
    %36 = vector.load %arg11[%c0_27, %c0_28] : memref<1x128xf32, #tpu.memory_space<vmem>>, vector<1x128xf32>
    %37 = vector.broadcast %36 : vector<1x128xf32> to vector<1024x128xf32>
    %38 = arith.addf %35, %37 : vector<1024x128xf32>
    %39 = math.tanh %38 : vector<1024x128xf32>
    %c0_29 = arith.constant 0 : index
    %c0_30 = arith.constant 0 : index
    %40 = vector.load %arg12[%c0_29, %c0_30] : memref<1024x128xf32, #tpu.memory_space<vmem>>, vector<1024x128xf32>
    tpu.vector_store %arg12[%c0_29, %c0_30], %39 {strides = array<i32>} : memref<1024x128xf32, #tpu.memory_space<vmem>>, vector<1024x128xf32>,
    return
  }
  func.func @transform_0(%arg0: i32) -> (i32, i32) {
    %c0_i32 = arith.constant 0 : i32
    %c0_i32_0 = arith.constant 0 : i32
    return %arg0, %c0_i32 : i32, i32
  }
  func.func @transform_1(%arg0: i32) -> (i32, i32) {
    %c0_i32 = arith.constant 0 : i32
    %c0_i32_0 = arith.constant 0 : i32
    %c0_i32_1 = arith.constant 0 : i32
    return %c0_i32, %c0_i32_0 : i32, i32
  }
  func.func @transform_2(%arg0: i32) -> (i32, i32) {
    %c0_i32 = arith.constant 0 : i32
    %c0_i32_0 = arith.constant 0 : i32
    %c0_i32_1 = arith.constant 0 : i32
    return %c0_i32, %c0_i32_0 : i32, i32
  }
  func.func @transform_3(%arg0: i32) -> (i32, i32) {
    %c0_i32 = arith.constant 0 : i32
    %c0_i32_0 = arith.constant 0 : i32
    %c0_i32_1 = arith.constant 0 : i32
    return %c0_i32, %c0_i32_0 : i32, i32
  }
  func.func @transform_4(%arg0: i32) -> (i32, i32) {
    %c0_i32 = arith.constant 0 : i32
    %c0_i32_0 = arith.constant 0 : i32
    %c0_i32_1 = arith.constant 0 : i32
    return %c0_i32, %c0_i32_0 : i32, i32
  }
  func.func @transform_5(%arg0: i32) -> (i32, i32) {
    %c0_i32 = arith.constant 0 : i32
    %c0_i32_0 = arith.constant 0 : i32
    %c0_i32_1 = arith.constant 0 : i32
    return %c0_i32, %c0_i32_0 : i32, i32
  }
  func.func @transform_6(%arg0: i32) -> (i32, i32) {
    %c0_i32 = arith.constant 0 : i32
    %c0_i32_0 = arith.constant 0 : i32
    %c0_i32_1 = arith.constant 0 : i32
    return %c0_i32, %c0_i32_0 : i32, i32
  }
  func.func @transform_7(%arg0: i32) -> (i32, i32) {
    %c0_i32 = arith.constant 0 : i32
    %c0_i32_0 = arith.constant 0 : i32
    %c0_i32_1 = arith.constant 0 : i32
    return %c0_i32, %c0_i32_0 : i32, i32
  }
  func.func @transform_8(%arg0: i32) -> (i32, i32) {
    %c0_i32 = arith.constant 0 : i32
    %c0_i32_0 = arith.constant 0 : i32
    %c0_i32_1 = arith.constant 0 : i32
    return %c0_i32, %c0_i32_0 : i32, i32
  }
  func.func @transform_9(%arg0: i32) -> (i32, i32) {
    %c0_i32 = arith.constant 0 : i32
    %c0_i32_0 = arith.constant 0 : i32
    %c0_i32_1 = arith.constant 0 : i32
    return %c0_i32, %c0_i32_0 : i32, i32
  }
  func.func @transform_10(%arg0: i32) -> (i32, i32) {
    %c0_i32 = arith.constant 0 : i32
    %c0_i32_0 = arith.constant 0 : i32
    %c0_i32_1 = arith.constant 0 : i32
    return %c0_i32, %c0_i32_0 : i32, i32
  }
  func.func @transform_11(%arg0: i32) -> (i32, i32) {
    %c0_i32 = arith.constant 0 : i32
    %c0_i32_0 = arith.constant 0 : i32
    return %arg0, %c0_i32 : i32, i32
  }
}

</mosaic_0001>

<bundles_post_ra>
// kernel: autoencoder_forward.1
= control target key start
LH: loop header
LB: loop body
LE: loop exit
PB: predicated region body
PF: predicated region fallthrough
CT: control target
= control target key end

     0   :  { %s6681_s17 = smov 0   ;;  %s8071_s0 = inlined_call_operand.vmem [shape: f32[2048,128], index: 0, kind: input, shape index: {}]   ;;  %s8072_s1 = inlined_call_operand.vmem [shape: bf16[128,128], index: 1, kind: input, shape index: {}]   ;;  %s8073_s2 = inlined_call_operand.vmem [shape: f32[1,128], index: 2, kind: input, shape index: {}]   ;;  %s8074_s3 = inlined_call_operand.vmem [shape: bf16[128,64], index: 3, kind: input, shape index: {}]   ;;  %s8075_s4 = inlined_call_operand.vmem [shape: f32[1,64], index: 4, kind: input, shape index: {}]   ;;  %s8076_s5 = inlined_call_operand.vmem [shape: bf16[64,64], index: 5, kind: input, shape index: {}]   ;;  %s8077_s6 = inlined_call_operand.vmem [shape: f32[1,64], index: 6, kind: input, shape index: {}]   ;;  %s8078_s7 = inlined_call_operand.vmem [shape: bf16[64,128], index: 7, kind: input, shape index: {}]   ;;  %s8079_s8 = inlined_call_operand.vmem [shape: f32[1,128], index: 8, kind: input, shape index: {}]   ;;  %s8080_s9 = inlined_call_operand.vmem [shape: bf16[128,128], index: 9, kind: input, shape index: {}]   ;;  %s8081_s10 = inlined_call_operand.vmem [shape: f32[1,128], index: 10, kind: input, shape index: {}]   ;;  %s8082_s11 = inlined_call_operand.vmem [shape: f32[2048,128], index: 11, kind: output, shape index: {}]  }
   0x1 LB: > { %s5064_s18 = sadd.s32 4294967295, %s6619_s17   ;;  %p5068_p0 = scmp.ge.s32.totalorder %s6619_s17, 1  ;;  %s6619_s17 = sphi %s6681_s17, %s21_s17  }
   0x2   : > { %p338_p1 = scmp.lt.s32.totalorder %s6619_s17, 3 }
   0x4   : > { %p339_p2 = pnand %p5068_p0, %p338_p1 }
   0x5   : > { %s5069_s21 = sshll.u32 (!%p339_p2), %s5064_s18, 7 }
   0x6   : > { %342 = sbr.rel (%p339_p2) target bundleno = 1333 (0x535), region = 64  ;;  %p379_p3 = scmp.lt.s32.totalorder (!%p339_p2), %s5069_s21, 255 }
   0xb   : > { %v6320_v0 = vld [vmem:[%s8072_s1 + $0x38] sm:$0xff]   ;;  %v6321_v1 = vld [vmem:[%s8072_s1 + $0x30] sm:$0xff]   ;;  %s8084_s21 = smov (!%p379_p3, %s5069_s21), 255  ;;  %v6322_v2 = vld [vmem:[%s8072_s1 + $0x28] sm:$0xff]   ;;  %vm2238_vm0 = vcmask 523264  }
   0xc   : > { %5592 = vmatprep.subr.bf16.mxu0 %v6320_v0  ;;  %6296 = vmatprep.subr.bf16.mxu1 %v6320_v0  ;;  %s5070_s26 = sshll.u32 %s8084_s21, 3  ;;  %v6323_v3 = vld [vmem:[%s8072_s1 + $0x20] sm:$0xff]   ;;  %v6324_v7 = vld [vmem:[%s8072_s1 + $0x18] sm:$0xff]   ;;  %v6325_v8 = vld [vmem:[%s8072_s1 + $0x10] sm:$0xff]  }
   0xd   : > { %5593 = vmatpush3.bf16.msra.mxu0 %v6320_v0  ;;  %6304 = vmatpush3.bf16.msra.mxu1 %v6320_v0  ;;  %s6706_s29 = scalar_lea.vmem %s8071_s0, %s5070_s26  ;;  %v6326_v9 = vld [vmem:[%s8072_s1 + $0x8] sm:$0xff]   ;;  %v6327_v13 = vld [vmem:[%s8072_s1] sm:$0xff]   ;;  %v6328_v20 = vld [vmem:[%s8074_s3 + $0x38] sm:$0xff]  }
   0xe   : > { %5594 = vmatprep.subr.bf16.mxu0 %v6321_v1  ;;  %6297 = vmatprep.subr.bf16.mxu1 %v6321_v1  ;;  %v391_v4 = vld [vmem:[%s6706_s29] sm:$0xff]  ;;  %v392_v5 = vld [vmem:[%s6706_s29 + $0x8] sm:$0xff]  ;;  %v393_v14 = vld [vmem:[%s6706_s29 + $0x10] sm:$0xff] }
   0xf   : > { %v519_v6 = vpack.c.bf16 %v392_v5, %v391_v4  ;;  %v455_v10 = vld [vmem:[%s6706_s29 + $0x200] sm:$0xff]  ;;  %v456_v11 = vld [vmem:[%s6706_s29 + $0x208] sm:$0xff]  ;;  %v394_v15 = vld [vmem:[%s6706_s29 + $0x18] sm:$0xff] }
  0x10   : > { %v551_v12 = vpack.c.bf16 %v456_v11, %v455_v10  ;;  %v395_v16 = vld [vmem:[%s6706_s29 + $0x20] sm:$0xff]  ;;  %v396_v17 = vld [vmem:[%s6706_s29 + $0x28] sm:$0xff]  ;;  %v457_v18 = vld [vmem:[%s6706_s29 + $0x210] sm:$0xff]  ;;  %v520_v23 = vpack.c.bf16 %v394_v15, %v393_v14 }
  0x11   : > { %5595 = vmatpush3.bf16.msra.mxu0 %v6321_v1  ;;  %6305 = vmatpush3.bf16.msra.mxu1 %v6321_v1  ;;  %v458_v19 = vld [vmem:[%s6706_s29 + $0x218] sm:$0xff]  ;;  %v459_v21 = vld [vmem:[%s6706_s29 + $0x220] sm:$0xff]  ;;  %v460_v22 = vld [vmem:[%s6706_s29 + $0x228] sm:$0xff]  ;;  %v521_v24 = vpack.c.bf16 %v396_v17, %v395_v16 }
  0x12   : > { %5596 = vmatprep.subr.bf16.mxu0 %v6322_v2  ;;  %6298 = vmatprep.subr.bf16.mxu1 %v6322_v2  ;;  %v552_v25 = vpack.c.bf16 %v458_v19, %v457_v18  ;;  %v553_v26 = vpack.c.bf16 %v460_v22, %v459_v21  ;;  %v6329_v27 = vld [vmem:[%s8074_s3 + $0x30] sm:$0xff]   ;;  %v398_v29 = vld [vmem:[%s6706_s29 + $0x38] sm:$0xff]  ;;  %v399_v30 = vld [vmem:[%s6706_s29 + $0x40] sm:$0xff] }
  0x13   : > { %5608 = vmatprep.mubr.bf16.mxu0 %v519_v6  ;;  %5672 = vmatprep.mubr.bf16.mxu1 %v551_v12  ;;  %v397_v28 = vld [vmem:[%s6706_s29 + $0x30] sm:$0xff]  ;;  %v400_v31 = vld [vmem:[%s6706_s29 + $0x48] sm:$0xff]  ;;  %v462_v33 = vld [vmem:[%s6706_s29 + $0x238] sm:$0xff] }
  0x14   : > { %v461_v32 = vld [vmem:[%s6706_s29 + $0x230] sm:$0xff]  ;;  %v463_v34 = vld [vmem:[%s6706_s29 + $0x240] sm:$0xff]  ;;  %v464_v35 = vld [vmem:[%s6706_s29 + $0x248] sm:$0xff]  ;;  %v522_v37 = vpack.c.bf16 %v398_v29, %v397_v28  ;;  %v523_v38 = vpack.c.bf16 %v400_v31, %v399_v30 }
  0x15   : > { %5597 = vmatpush3.bf16.msra.mxu0 %v6322_v2  ;;  %6306 = vmatpush3.bf16.msra.mxu1 %v6322_v2  ;;  %v6330_v36 = vld [vmem:[%s8074_s3 + $0x28] sm:$0xff]   ;;  %v554_v39 = vpack.c.bf16 %v462_v33, %v461_v32  ;;  %v555_v40 = vpack.c.bf16 %v464_v35, %v463_v34  ;;  %v401_v41 = vld [vmem:[%s6706_s29 + $0x50] sm:$0xff]  ;;  %v6331_v42 = vld [vmem:[%s8074_s3 + $0x20] sm:$0xff]  }
  0x16   : > { %5598 = vmatprep.subr.bf16.mxu0 %v6323_v3  ;;  %6299 = vmatprep.subr.bf16.mxu1 %v6323_v3  ;;  %v402_v43 = vld [vmem:[%s6706_s29 + $0x58] sm:$0xff]  ;;  %v403_v44 = vld [vmem:[%s6706_s29 + $0x60] sm:$0xff]  ;;  %v404_v45 = vld [vmem:[%s6706_s29 + $0x68] sm:$0xff] }
  0x17   : > { %v465_v46 = vld [vmem:[%s6706_s29 + $0x250] sm:$0xff]  ;;  %v466_v47 = vld [vmem:[%s6706_s29 + $0x258] sm:$0xff]  ;;  %v467_v48 = vld [vmem:[%s6706_s29 + $0x260] sm:$0xff]  ;;  %v524_v50 = vpack.c.bf16 %v402_v43, %v401_v41  ;;  %v525_v52 = vpack.c.bf16 %v404_v45, %v403_v44 }
  0x18   : > { %v468_v49 = vld [vmem:[%s6706_s29 + $0x268] sm:$0xff]  ;;  %v6332_v51 = vld [vmem:[%s8074_s3 + $0x18] sm:$0xff]   ;;  %v556_v53 = vpack.c.bf16 %v466_v47, %v465_v46  ;;  %v6333_v55 = vld [vmem:[%s8074_s3 + $0x10] sm:$0xff]  }
  0x19   : > { %5599 = vmatpush3.bf16.msra.mxu0 %v6323_v3  ;;  %6307 = vmatpush3.bf16.msra.mxu1 %v6323_v3  ;;  %v557_v54 = vpack.c.bf16 %v468_v49, %v467_v48  ;;  %v405_v56 = vld [vmem:[%s6706_s29 + $0x70] sm:$0xff]  ;;  %v406_v57 = vld [vmem:[%s6706_s29 + $0x78] sm:$0xff]  ;;  %v407_v58 = vld [vmem:[%s6706_s29 + $0x80] sm:$0xff] }
  0x1a   : > { %5600 = vmatprep.subr.bf16.mxu0 %v6324_v7  ;;  %6300 = vmatprep.subr.bf16.mxu1 %v6324_v7  ;;  %v408_v59 = vld [vmem:[%s6706_s29 + $0x88] sm:$0xff]  ;;  %v469_v60 = vld [vmem:[%s6706_s29 + $0x270] sm:$0xff]  ;;  %v470_v61 = vld [vmem:[%s6706_s29 + $0x278] sm:$0xff]  ;;  %v526_v1 = vpack.c.bf16 %v406_v57, %v405_v56 }
  0x1b   : > { %v471_v62 = vld [vmem:[%s6706_s29 + $0x280] sm:$0xff]  ;;  %v472_v63 = vld [vmem:[%s6706_s29 + $0x288] sm:$0xff]  ;;  %v527_v2 = vpack.c.bf16 %v408_v59, %v407_v58  ;;  %v558_v3 = vpack.c.bf16 %v470_v61, %v469_v60  ;;  %v409_v5 = vld [vmem:[%s6706_s29 + $0x90] sm:$0xff] }
  0x1c   : > { %v6334_v0 = vld [vmem:[%s8074_s3 + $0x8] sm:$0xff]   ;;  %v559_v4 = vpack.c.bf16 %v472_v63, %v471_v62  ;;  %v410_v6 = vld [vmem:[%s6706_s29 + $0x98] sm:$0xff]  ;;  %v473_v10 = vld [vmem:[%s6706_s29 + $0x290] sm:$0xff] }
  0x1d   : > { %5601 = vmatpush3.bf16.msra.mxu0 %v6324_v7  ;;  %6308 = vmatpush3.bf16.msra.mxu1 %v6324_v7  ;;  %v6335_v7 = vld [vmem:[%s8074_s3] sm:$0xff]   ;;  %v474_v11 = vld [vmem:[%s6706_s29 + $0x298] sm:$0xff]  ;;  %v528_v14 = vpack.c.bf16 %v410_v6, %v409_v5  ;;  %v413_v18 = vld [vmem:[%s6706_s29 + $0xb0] sm:$0xff] }
  0x1e   : > { %5602 = vmatprep.subr.bf16.mxu0 %v6325_v8  ;;  %6301 = vmatprep.subr.bf16.mxu1 %v6325_v8  ;;  %v475_v12 = vld [vmem:[%s6706_s29 + $0x2a0] sm:$0xff]  ;;  %v560_v16 = vpack.c.bf16 %v474_v11, %v473_v10  ;;  %v414_v19 = vld [vmem:[%s6706_s29 + $0xb8] sm:$0xff]  ;;  %v416_v21 = vld [vmem:[%s6706_s29 + $0xc8] sm:$0xff] }
  0x1f   : > { %v477_v22 = vld [vmem:[%s6706_s29 + $0x2b0] sm:$0xff]  ;;  %v418_v31 = vld [vmem:[%s6706_s29 + $0xd8] sm:$0xff]  ;;  %v419_v32 = vld [vmem:[%s6706_s29 + $0xe0] sm:$0xff] }
  0x20   : > { %v417_v30 = vld [vmem:[%s6706_s29 + $0xd0] sm:$0xff]  ;;  %v420_v33 = vld [vmem:[%s6706_s29 + $0xe8] sm:$0xff]  ;;  %v482_v35 = vld [vmem:[%s6706_s29 + $0x2d8] sm:$0xff] }
  0x21   : > { %5603 = vmatpush3.bf16.msra.mxu0 %v6325_v8  ;;  %6309 = vmatpush3.bf16.msra.mxu1 %v6325_v8  ;;  %v411_v8 = vld [vmem:[%s6706_s29 + $0xa0] sm:$0xff]  ;;  %v481_v34 = vld [vmem:[%s6706_s29 + $0x2d0] sm:$0xff]  ;;  %v422_v43 = vld [vmem:[%s6706_s29 + $0xf8] sm:$0xff] }
  0x22   : > { %5604 = vmatprep.subr.bf16.mxu0 %v6326_v9  ;;  %6302 = vmatprep.subr.bf16.mxu1 %v6326_v9  ;;  %v423_v44 = vld [vmem:[%s6706_s29 + $0x100] sm:$0xff]  ;;  %v424_v45 = vld [vmem:[%s6706_s29 + $0x108] sm:$0xff]  ;;  %v485_v46 = vld [vmem:[%s6706_s29 + $0x2f0] sm:$0xff] }
  0x23   : > { %v486_v47 = vld [vmem:[%s6706_s29 + $0x2f8] sm:$0xff]  ;;  %v487_v48 = vld [vmem:[%s6706_s29 + $0x300] sm:$0xff]  ;;  %v488_v49 = vld [vmem:[%s6706_s29 + $0x308] sm:$0xff] }
  0x24   : > { %v427_v56 = vld [vmem:[%s6706_s29 + $0x120] sm:$0xff]  ;;  %v428_v57 = vld [vmem:[%s6706_s29 + $0x128] sm:$0xff]  ;;  %v489_v58 = vld [vmem:[%s6706_s29 + $0x310] sm:$0xff] }
  0x25   : > { %5605 = vmatpush3.bf16.msra.mxu0 %v6326_v9  ;;  %6310 = vmatpush3.bf16.msra.mxu1 %v6326_v9  ;;  %v412_v9 = vld [vmem:[%s6706_s29 + $0xa8] sm:$0xff]  ;;  %v490_v59 = vld [vmem:[%s6706_s29 + $0x318] sm:$0xff]  ;;  %v491_v60 = vld [vmem:[%s6706_s29 + $0x320] sm:$0xff]  ;;  %v537_v63 = vpack.c.bf16 %v428_v57, %v427_v56 }
  0x26   : > { %5606 = vmatprep.subr.bf16.mxu0 %v6327_v13  ;;  %6303 = vmatprep.subr.bf16.mxu1 %v6327_v13  ;;  %v529_v15 = vpack.c.bf16 %v412_v9, %v411_v8  ;;  %v492_v61 = vld [vmem:[%s6706_s29 + $0x328] sm:$0xff]  ;;  %v493_v6 = vld [vmem:[%s6706_s29 + $0x330] sm:$0xff]  ;;  %v495_v8 = vld [vmem:[%s6706_s29 + $0x340] sm:$0xff] }
  0x27   : > { %v432_v5 = vld [vmem:[%s6706_s29 + $0x148] sm:$0xff]  ;;  %v511_v56 = vld [vmem:[%s6706_s29 + $0x3c0] sm:$0xff] }
  0x28   : > { %v496_v9 = vld [vmem:[%s6706_s29 + $0x348] sm:$0xff] }
  0x29   : > { %5607 = vmatpush3.bf16.msra.mxu0 %v6327_v13  ;;  %6311 = vmatpush3.bf16.msra.mxu1 %v6327_v13  ;;  %v476_v13 = vld [vmem:[%s6706_s29 + $0x2a8] sm:$0xff] }
  0x2a   : > { %5736 = vmatprep.subr.bf16.mxu1 %v6328_v20  ;;  %v561_v17 = vpack.c.bf16 %v476_v13, %v475_v12  ;;  %v571_v13 = vpack.c.bf16 %v496_v9, %v495_v8  ;;  %v512_v57 = vld [vmem:[%s6706_s29 + $0x3c8] sm:$0xff] }
  0x2c   : > { %5609 = vmatmul.mubr.bf16.vlgmr.msra.gmra.mxu0 %v520_v23  ;;  %5673 = vmatmul.mubr.bf16.vlgmr.msra.gmra.mxu1 %v552_v25  ;;  %v478_v23 = vld [vmem:[%s6706_s29 + $0x2b8] sm:$0xff]  ;;  %v480_v25 = vld [vmem:[%s6706_s29 + $0x2c8] sm:$0xff] }
  0x2d   : > { %5612 = vmatprep.mubr.bf16.mxu0 %v521_v24  ;;  %5737 = vmatpush3.bf16.msra.mxu1 %v6328_v20  ;;  %v415_v20 = vld [vmem:[%s6706_s29 + $0xc0] sm:$0xff]  ;;  %v562_v28 = vpack.c.bf16 %v478_v23, %v477_v22 }
  0x2e   : > { %5676 = vmatprep.mubr.bf16.mxu1 %v553_v26  ;;  %5738 = vmatprep.subr.bf16.mxu1 %v6329_v27  ;;  %v479_v24 = vld [vmem:[%s6706_s29 + $0x2c0] sm:$0xff]  ;;  %v530_v26 = vpack.c.bf16 %v414_v19, %v413_v18  ;;  %v497_v18 = vld [vmem:[%s6706_s29 + $0x350] sm:$0xff]  ;;  %v498_v19 = vld [vmem:[%s6706_s29 + $0x358] sm:$0xff] }
  0x2f   : > { %v563_v29 = vpack.c.bf16 %v480_v25, %v479_v24  ;;  %v572_v24 = vpack.c.bf16 %v498_v19, %v497_v18 }
  0x31   : > { %5739 = vmatpush3.bf16.msra.mxu1 %v6329_v27  ;;  %v531_v27 = vpack.c.bf16 %v416_v21, %v415_v20  ;;  %v499_v20 = vld [vmem:[%s6706_s29 + $0x360] sm:$0xff]  ;;  %v500_v21 = vld [vmem:[%s6706_s29 + $0x368] sm:$0xff] }
  0x32   : > { %5740 = vmatprep.subr.bf16.mxu1 %v6330_v36  ;;  %v573_v25 = vpack.c.bf16 %v500_v21, %v499_v20  ;;  %v6886_v21 = vld [vmem:[%s8073_s2] ss:$0 sm:$0xff] }
  0x34   : > { %5613 = vmatmul.mubr.bf16.gmra.mxu0 %v522_v37  ;;  %5677 = vmatmul.mubr.bf16.gmra.mxu1 %v554_v39  ;;  %v484_v37 = vld [vmem:[%s6706_s29 + $0x2e8] sm:$0xff]  ;;  %v533_v39 = vpack.c.bf16 %v420_v33, %v419_v32  ;;  %v503_v32 = vld [vmem:[%s6706_s29 + $0x380] sm:$0xff] }
  0x35   : > { %5616 = vmatprep.mubr.bf16.mxu0 %v523_v38  ;;  %5680 = vmatprep.mubr.bf16.mxu1 %v555_v40  ;;  %v532_v38 = vpack.c.bf16 %v418_v31, %v417_v30  ;;  %v564_v40 = vpack.c.bf16 %v482_v35, %v481_v34  ;;  %v501_v30 = vld [vmem:[%s6706_s29 + $0x370] sm:$0xff]  ;;  %v502_v31 = vld [vmem:[%s6706_s29 + $0x378] sm:$0xff]  ;;  %v504_v33 = vld [vmem:[%s6706_s29 + $0x388] sm:$0xff] }
  0x36   : > { %5741 = vmatpush3.bf16.msra.mxu1 %v6330_v36  ;;  %v483_v36 = vld [vmem:[%s6706_s29 + $0x2e0] sm:$0xff] }
  0x37   : > { %5742 = vmatprep.subr.bf16.mxu1 %v6331_v42  ;;  %v565_v41 = vpack.c.bf16 %v484_v37, %v483_v36  ;;  %v574_v36 = vpack.c.bf16 %v502_v31, %v501_v30  ;;  %v575_v37 = vpack.c.bf16 %v504_v33, %v503_v32 }
  0x3a   : > { %5743 = vmatpush3.bf16.msra.mxu1 %v6331_v42  ;;  %v421_v42 = vld [vmem:[%s6706_s29 + $0xf0] sm:$0xff] }
  0x3b   : > { %5744 = vmatprep.subr.bf16.mxu1 %v6332_v51 }
  0x3c   : > { %5617 = vmatmul.mubr.bf16.gmra.mxu0 %v524_v50  ;;  %5681 = vmatmul.mubr.bf16.gmra.mxu1 %v556_v53  ;;  %v534_v50 = vpack.c.bf16 %v422_v43, %v421_v42  ;;  %v567_v53 = vpack.c.bf16 %v488_v49, %v487_v48  ;;  %v505_v42 = vld [vmem:[%s6706_s29 + $0x390] sm:$0xff]  ;;  %v506_v43 = vld [vmem:[%s6706_s29 + $0x398] sm:$0xff] }
  0x3d   : > { %5620 = vmatprep.mubr.bf16.mxu0 %v525_v52  ;;  %5684 = vmatprep.mubr.bf16.mxu1 %v557_v54  ;;  %v566_v52 = vpack.c.bf16 %v486_v47, %v485_v46  ;;  %v425_v54 = vld [vmem:[%s6706_s29 + $0x110] sm:$0xff]  ;;  %v576_v48 = vpack.c.bf16 %v506_v43, %v505_v42 }
  0x3e   : > { %5745 = vmatpush3.bf16.msra.mxu1 %v6332_v51  ;;  %v535_v51 = vpack.c.bf16 %v424_v45, %v423_v44  ;;  %v507_v44 = vld [vmem:[%s6706_s29 + $0x3a0] sm:$0xff]  ;;  %v508_v45 = vld [vmem:[%s6706_s29 + $0x3a8] sm:$0xff] }
  0x3f   : > { %5746 = vmatprep.subr.bf16.mxu1 %v6333_v55  ;;  %v577_v49 = vpack.c.bf16 %v508_v45, %v507_v44 }
  0x42   : > { %5747 = vmatpush3.bf16.msra.mxu1 %v6333_v55  ;;  %v426_v55 = vld [vmem:[%s6706_s29 + $0x118] sm:$0xff] }
  0x43   : > { %5748 = vmatprep.subr.bf16.mxu1 %v6334_v0  ;;  %v536_v62 = vpack.c.bf16 %v426_v55, %v425_v54  ;;  %v509_v54 = vld [vmem:[%s6706_s29 + $0x3b0] sm:$0xff]  ;;  %v510_v55 = vld [vmem:[%s6706_s29 + $0x3b8] sm:$0xff] }
  0x44   : > { %5621 = vmatmul.mubr.bf16.gmra.mxu0 %v526_v1  ;;  %5685 = vmatmul.mubr.bf16.gmra.mxu1 %v558_v3  ;;  %v569_v1 = vpack.c.bf16 %v492_v61, %v491_v60  ;;  %v430_v3 = vld [vmem:[%s6706_s29 + $0x138] sm:$0xff]  ;;  %v578_v60 = vpack.c.bf16 %v510_v55, %v509_v54  ;;  %v579_v61 = vpack.c.bf16 %v512_v57, %v511_v56 }
  0x45   : > { %5624 = vmatprep.mubr.bf16.mxu0 %v527_v2  ;;  %5688 = vmatprep.mubr.bf16.mxu1 %v559_v4  ;;  %v429_v2 = vld [vmem:[%s6706_s29 + $0x130] sm:$0xff]  ;;  %v431_v4 = vld [vmem:[%s6706_s29 + $0x140] sm:$0xff] }
  0x46   : > { %5749 = vmatpush3.bf16.msra.mxu1 %v6334_v0  ;;  %v568_v0 = vpack.c.bf16 %v490_v59, %v489_v58  ;;  %v538_v10 = vpack.c.bf16 %v430_v3, %v429_v2  ;;  %v539_v11 = vpack.c.bf16 %v432_v5, %v431_v4  ;;  %v513_v2 = vld [vmem:[%s6706_s29 + $0x3d0] sm:$0xff]  ;;  %v514_v3 = vld [vmem:[%s6706_s29 + $0x3d8] sm:$0xff]  ;;  %v515_v4 = vld [vmem:[%s6706_s29 + $0x3e0] sm:$0xff] }
  0x47   : > { %5750 = vmatprep.subr.bf16.mxu1 %v6335_v7  ;;  %v516_v5 = vld [vmem:[%s6706_s29 + $0x3e8] sm:$0xff]  ;;  %v580_v8 = vpack.c.bf16 %v514_v3, %v513_v2 }
  0x48   : > { %v581_v9 = vpack.c.bf16 %v516_v5, %v515_v4  ;;  %v6338_v3 = vld [vmem:[%s8076_s5 + $0x8] sm:$0xff]  }
  0x4a   : > { %5751 = vmatpush3.bf16.msra.mxu1 %v6335_v7  ;;  %v494_v7 = vld [vmem:[%s6706_s29 + $0x338] sm:$0xff] }
  0x4b   : > { %v570_v12 = vpack.c.bf16 %v494_v7, %v493_v6 }
  0x4c   : > { %5625 = vmatmul.mubr.bf16.gmra.mxu0 %v528_v14  ;;  %5689 = vmatmul.mubr.bf16.gmra.mxu1 %v560_v16  ;;  %v433_v14 = vld [vmem:[%s6706_s29 + $0x150] sm:$0xff]  ;;  %v435_v16 = vld [vmem:[%s6706_s29 + $0x160] sm:$0xff] }
  0x4d   : > { %5628 = vmatprep.mubr.bf16.mxu0 %v529_v15  ;;  %5692 = vmatprep.mubr.bf16.mxu1 %v561_v17  ;;  %v434_v15 = vld [vmem:[%s6706_s29 + $0x158] sm:$0xff]  ;;  %v436_v17 = vld [vmem:[%s6706_s29 + $0x168] sm:$0xff] }
  0x4e   : > { %v540_v22 = vpack.c.bf16 %v434_v15, %v433_v14  ;;  %v541_v23 = vpack.c.bf16 %v436_v17, %v435_v16  ;;  %v6336_v16 = vld [vmem:[%s8076_s5 + $0x18] sm:$0xff]   ;;  %v6337_v17 = vld [vmem:[%s8076_s5 + $0x10] sm:$0xff]  }
  0x4f   : > { %5880 = vmatprep.subr.bf16.mxu0 %v6336_v16 }
  0x50   : > { %5881 = vmatpush3.bf16.msra.mxu0 %v6336_v16 }
  0x51   : > { %5882 = vmatprep.subr.bf16.mxu0 %v6337_v17 }
  0x54   : > { %5629 = vmatmul.mubr.bf16.gmra.mxu0 %v530_v26  ;;  %5693 = vmatmul.mubr.bf16.gmra.mxu1 %v562_v28  ;;  %v437_v26 = vld [vmem:[%s6706_s29 + $0x170] sm:$0xff]  ;;  %v439_v28 = vld [vmem:[%s6706_s29 + $0x180] sm:$0xff] }
  0x55   : > { %5632 = vmatprep.mubr.bf16.mxu0 %v531_v27  ;;  %5696 = vmatprep.mubr.bf16.mxu1 %v563_v29  ;;  %v438_v27 = vld [vmem:[%s6706_s29 + $0x178] sm:$0xff]  ;;  %v440_v29 = vld [vmem:[%s6706_s29 + $0x188] sm:$0xff] }
  0x56   : > { %v542_v34 = vpack.c.bf16 %v438_v27, %v437_v26  ;;  %v543_v35 = vpack.c.bf16 %v440_v29, %v439_v28  ;;  %5883 = vmatpush3.bf16.msra.mxu0 %v6337_v17 }
  0x57   : > { %5884 = vmatprep.subr.bf16.mxu0 %v6338_v3 }
  0x5a   : > { %5885 = vmatpush3.bf16.msra.mxu0 %v6338_v3 }
  0x5c   : > { %5633 = vmatmul.mubr.bf16.gmra.mxu0 %v532_v38  ;;  %5697 = vmatmul.mubr.bf16.gmra.mxu1 %v564_v40  ;;  %v441_v38 = vld [vmem:[%s6706_s29 + $0x190] sm:$0xff]  ;;  %v443_v40 = vld [vmem:[%s6706_s29 + $0x1a0] sm:$0xff] }
  0x5d   : > { %5636 = vmatprep.mubr.bf16.mxu0 %v533_v39  ;;  %5700 = vmatprep.mubr.bf16.mxu1 %v565_v41  ;;  %v442_v39 = vld [vmem:[%s6706_s29 + $0x198] sm:$0xff]  ;;  %v444_v41 = vld [vmem:[%s6706_s29 + $0x1a8] sm:$0xff] }
  0x5e   : > { %v544_v46 = vpack.c.bf16 %v442_v39, %v441_v38  ;;  %v545_v47 = vpack.c.bf16 %v444_v41, %v443_v40 }
  0x64   : > { %5637 = vmatmul.mubr.bf16.gmra.mxu0 %v534_v50  ;;  %5701 = vmatmul.mubr.bf16.gmra.mxu1 %v566_v52  ;;  %v445_v50 = vld [vmem:[%s6706_s29 + $0x1b0] sm:$0xff]  ;;  %v447_v52 = vld [vmem:[%s6706_s29 + $0x1c0] sm:$0xff] }
  0x65   : > { %5640 = vmatprep.mubr.bf16.mxu0 %v535_v51  ;;  %5704 = vmatprep.mubr.bf16.mxu1 %v567_v53  ;;  %v446_v51 = vld [vmem:[%s6706_s29 + $0x1b8] sm:$0xff]  ;;  %v448_v53 = vld [vmem:[%s6706_s29 + $0x1c8] sm:$0xff] }
  0x66   : > { %v546_v58 = vpack.c.bf16 %v446_v51, %v445_v50  ;;  %v547_v59 = vpack.c.bf16 %v448_v53, %v447_v52 }
  0x6c   : > { %5641 = vmatmul.mubr.bf16.gmra.mxu0 %v536_v62  ;;  %5705 = vmatmul.mubr.bf16.gmra.mxu1 %v568_v0  ;;  %v449_v62 = vld [vmem:[%s6706_s29 + $0x1d0] sm:$0xff]  ;;  %v451_v0 = vld [vmem:[%s6706_s29 + $0x1e0] sm:$0xff] }
  0x6d   : > { %5644 = vmatprep.mubr.bf16.mxu0 %v537_v63  ;;  %5708 = vmatprep.mubr.bf16.mxu1 %v569_v1  ;;  %v450_v63 = vld [vmem:[%s6706_s29 + $0x1d8] sm:$0xff]  ;;  %v452_v1 = vld [vmem:[%s6706_s29 + $0x1e8] sm:$0xff] }
  0x6e   : > { %v548_v6 = vpack.c.bf16 %v450_v63, %v449_v62  ;;  %v549_v7 = vpack.c.bf16 %v452_v1, %v451_v0 }
  0x74   : > { %5645 = vmatmul.mubr.bf16.gmra.mxu0 %v538_v10  ;;  %5709 = vmatmul.mubr.bf16.gmra.mxu1 %v570_v12  ;;  %v453_v10 = vld [vmem:[%s6706_s29 + $0x1f0] sm:$0xff] }
  0x75   : > { %5648 = vmatprep.mubr.bf16.mxu0 %v539_v11  ;;  %5712 = vmatprep.mubr.bf16.mxu1 %v571_v13  ;;  %v454_v11 = vld [vmem:[%s6706_s29 + $0x1f8] sm:$0xff]  ;;  %v517_v12 = vld [vmem:[%s6706_s29 + $0x3f0] sm:$0xff] }
  0x76   : > { %v518_v13 = vld [vmem:[%s6706_s29 + $0x3f8] sm:$0xff]  ;;  %v550_v14 = vpack.c.bf16 %v454_v11, %v453_v10  ;;  %s7792_s29 = scalar_lea.vmem %s8082_s11, %s5070_s26 }
  0x77   : > { %v582_v15 = vpack.c.bf16 %v518_v13, %v517_v12 }
  0x7c   : > { %5649 = vmatmul.mubr.bf16.gmra.mxu0 %v540_v22  ;;  %5713 = vmatmul.mubr.bf16.gmra.mxu1 %v572_v24 }
  0x7d   : > { %5652 = vmatprep.mubr.bf16.mxu0 %v541_v23  ;;  %5716 = vmatprep.mubr.bf16.mxu1 %v573_v25 }
  0x84   : > { %5653 = vmatmul.mubr.bf16.gmra.mxu0 %v542_v34  ;;  %5717 = vmatmul.mubr.bf16.gmra.mxu1 %v574_v36 }
  0x85   : > { %5656 = vmatprep.mubr.bf16.mxu0 %v543_v35  ;;  %5720 = vmatprep.mubr.bf16.mxu1 %v575_v37 }
  0x8c   : > { %5657 = vmatmul.mubr.bf16.gmra.mxu0 %v544_v46  ;;  %5721 = vmatmul.mubr.bf16.gmra.mxu1 %v576_v48 }
  0x8d   : > { %5660 = vmatprep.mubr.bf16.mxu0 %v545_v47  ;;  %5724 = vmatprep.mubr.bf16.mxu1 %v577_v49 }
  0x94   : > { %5661 = vmatmul.mubr.bf16.gmra.mxu0 %v546_v58  ;;  %5725 = vmatmul.mubr.bf16.gmra.mxu1 %v578_v60 }
  0x95   : > { %5664 = vmatprep.mubr.bf16.mxu0 %v547_v59  ;;  %5728 = vmatprep.mubr.bf16.mxu1 %v579_v61 }
  0x9c   : > { %5665 = vmatmul.mubr.bf16.gmra.mxu0 %v548_v6  ;;  %5729 = vmatmul.mubr.bf16.gmra.mxu1 %v580_v8 }
  0x9d   : > { %5668 = vmatprep.mubr.bf16.mxu0 %v549_v7  ;;  %5732 = vmatprep.mubr.bf16.mxu1 %v581_v9 }
  0xa4   : > { %5669 = vmatmul.mubr.bf16.gmra.mxu0 %v550_v14  ;;  %5733 = vmatmul.mubr.bf16.gmra.mxu1 %v582_v15 }
  0xec   : > { %v5610_v18 = vpop.f32.mrf.mxu0  ;;  %v6881_v19 = vpop.f32.mrf.mxu1 }
  0xed   : > { %v697_v27 = vadd.f32 %v5610_v18, %v6886_v21 }
  0xee   : > { %v688_v20 = vpop.f32.mrf.mxu0  ;;  %v6888_v22 = vpop.f32.mrf.mxu1 }
  0xef   : > { %v689_v24 = vadd.f32 %v6886_v21, %v688_v20  ;;  %v1201_v36 = vmax.f32 %v697_v27, 0.0 }
  0xf0   : > { %v5611_v23 = vpop.f32.mrf.mxu0  ;;  %v6892_v26 = vpop.f32.mrf.mxu1 }
  0xf1   : > { %v700_v25 = vadd.f32 %v5611_v23, %v6886_v21  ;;  %v1199_v33 = vmax.f32 %v689_v24, 0.0 }
  0xf2   : > { %v691_v28 = vpop.f32.mrf.mxu0  ;;  %v6896_v30 = vpop.f32.mrf.mxu1 }
  0xf3   : > { %v692_v29 = vadd.f32 %v6886_v21, %v691_v28  ;;  %v1202_v31 = vmax.f32 %v700_v25, 0.0 }
  0xf4   : > { %v5614_v32 = vpop.f32.mrf.mxu0  ;;  %v6898_v35 = vpop.f32.mrf.mxu1 }
  0xf5   : > { %v1200_v34 = vmax.f32 %v692_v29, 0.0  ;;  %v1328_v40 = vpack.c.bf16 %v1202_v31, %v1201_v36  ;;  %v713_v45 = vadd.f32 %v5614_v32, %v6886_v21 }
  0xf6   : > { %v704_v37 = vpop.f32.mrf.mxu0  ;;  %v6900_v39 = vpop.f32.mrf.mxu1 }
  0xf7   : > { %v1327_v38 = vpack.c.bf16 %v1200_v34, %v1199_v33  ;;  %v705_v42 = vadd.f32 %v6886_v21, %v704_v37  ;;  %v1205_v54 = vmax.f32 %v713_v45, 0.0 }
  0xf8   : > { %v5615_v41 = vpop.f32.mrf.mxu0  ;;  %v6904_v44 = vpop.f32.mrf.mxu1 }
  0xf9   : > { %v716_v43 = vadd.f32 %v5615_v41, %v6886_v21  ;;  %5752 = vmatprep.mubr.bf16.mxu1 %v1327_v38  ;;  %v1203_v51 = vmax.f32 %v705_v42, 0.0 }
  0xfa   : > { %v707_v46 = vpop.f32.mrf.mxu0  ;;  %5753 = vmatmul.mubr.bf16.vlgmr.msra.gmra.mxu1 %v1328_v40  ;;  %v6908_v48 = vpop.f32.mrf.mxu1 }
  0xfb   : > { %v708_v47 = vadd.f32 %v6886_v21, %v707_v46  ;;  %v1206_v49 = vmax.f32 %v716_v43, 0.0 }
  0xfc   : > { %v5618_v50 = vpop.f32.mrf.mxu0  ;;  %v6910_v53 = vpop.f32.mrf.mxu1 }
  0xfd   : > { %v1204_v52 = vmax.f32 %v708_v47, 0.0  ;;  %v1330_v58 = vpack.c.bf16 %v1206_v49, %v1205_v54  ;;  %v729_v63 = vadd.f32 %v5618_v50, %v6886_v21  ;;  %v6339_v49 = vld [vmem:[%s8078_s7 + $0x18] sm:$0xff]  }
  0xfe   : > { %v720_v55 = vpop.f32.mrf.mxu0  ;;  %v6912_v57 = vpop.f32.mrf.mxu1  ;;  %6016 = vmatprep.subr.bf16.mxu1 %v6339_v49 }
  0xff   : > { %v1329_v56 = vpack.c.bf16 %v1204_v52, %v1203_v51  ;;  %v721_v60 = vadd.f32 %v6886_v21, %v720_v55  ;;  %v1209_v9 = vmax.f32 %v729_v63, 0.0  ;;  %6017 = vmatpush3.bf16.msra.mxu1 %v6339_v49 }
 0x100   : > { %v5619_v59 = vpop.f32.mrf.mxu0  ;;  %v6916_v62 = vpop.f32.mrf.mxu1 }
 0x101   : > { %v732_v61 = vadd.f32 %v5619_v59, %v6886_v21  ;;  %5756 = vmatprep.mubr.bf16.mxu1 %v1329_v56  ;;  %v1207_v6 = vmax.f32 %v721_v60, 0.0 }
 0x102   : > { %v723_v0 = vpop.f32.mrf.mxu0  ;;  %5757 = vmatmul.mubr.bf16.gmra.mxu1 %v1330_v58  ;;  %v6920_v2 = vpop.f32.mrf.mxu1 }
 0x103   : > { %v724_v1 = vadd.f32 %v6886_v21, %v723_v0  ;;  %v1210_v4 = vmax.f32 %v732_v61, 0.0 }
 0x104   : > { %v5622_v5 = vpop.f32.mrf.mxu0  ;;  %v6925_v8 = vpop.f32.mrf.mxu1 }
 0x105   : > { %v1208_v7 = vmax.f32 %v724_v1, 0.0  ;;  %v1332_v13 = vpack.c.bf16 %v1210_v4, %v1209_v9  ;;  %v745_v18 = vadd.f32 %v5622_v5, %v6886_v21 }
 0x106   : > { %v736_v10 = vpop.f32.mrf.mxu0  ;;  %v6927_v12 = vpop.f32.mrf.mxu1 }
 0x107   : > { %v1331_v11 = vpack.c.bf16 %v1208_v7, %v1207_v6  ;;  %v737_v15 = vadd.f32 %v6886_v21, %v736_v10  ;;  %v1213_v32 = vmax.f32 %v745_v18, 0.0 }
 0x108   : > { %v5623_v14 = vpop.f32.mrf.mxu0  ;;  %v6931_v17 = vpop.f32.mrf.mxu1 }
 0x109   : > { %v748_v16 = vadd.f32 %v5623_v14, %v6886_v21  ;;  %5760 = vmatprep.mubr.bf16.mxu1 %v1331_v11  ;;  %v1211_v28 = vmax.f32 %v737_v15, 0.0 }
 0x10a   : > { %v739_v20 = vpop.f32.mrf.mxu0  ;;  %5761 = vmatmul.mubr.bf16.gmra.mxu1 %v1332_v13  ;;  %v6935_v24 = vpop.f32.mrf.mxu1 }
 0x10b   : > { %v740_v23 = vadd.f32 %v6886_v21, %v739_v20  ;;  %v1214_v25 = vmax.f32 %v748_v16, 0.0 }
 0x10c   : > { %v5626_v27 = vpop.f32.mrf.mxu0  ;;  %v6937_v31 = vpop.f32.mrf.mxu1 }
 0x10d   : > { %v1212_v29 = vmax.f32 %v740_v23, 0.0  ;;  %v1334_v37 = vpack.c.bf16 %v1214_v25, %v1213_v32  ;;  %v761_v43 = vadd.f32 %v5626_v27, %v6886_v21 }
 0x10e   : > { %v752_v33 = vpop.f32.mrf.mxu0  ;;  %v6939_v36 = vpop.f32.mrf.mxu1 }
 0x10f   : > { %v1333_v34 = vpack.c.bf16 %v1212_v29, %v1211_v28  ;;  %v753_v40 = vadd.f32 %v6886_v21, %v752_v33  ;;  %v1217_v56 = vmax.f32 %v761_v43, 0.0 }
 0x110   : > { %v5627_v38 = vpop.f32.mrf.mxu0  ;;  %v6943_v42 = vpop.f32.mrf.mxu1 }
 0x111   : > { %v764_v41 = vadd.f32 %v5627_v38, %v6886_v21  ;;  %5764 = vmatprep.mubr.bf16.mxu1 %v1333_v34  ;;  %v1215_v52 = vmax.f32 %v753_v40, 0.0  ;;  %v6340_v34 = vld [vmem:[%s8076_s5] sm:$0xff]  }
 0x112   : > { %v755_v45 = vpop.f32.mrf.mxu0  ;;  %5765 = vmatmul.mubr.bf16.gmra.mxu1 %v1334_v37  ;;  %v6947_v47 = vpop.f32.mrf.mxu1  ;;  %5886 = vmatprep.subr.bf16.mxu0 %v6340_v34 }
 0x113   : > { %v756_v46 = vadd.f32 %v6886_v21, %v755_v45  ;;  %v1218_v50 = vmax.f32 %v764_v41, 0.0  ;;  %5887 = vmatpush3.bf16.msra.mxu0 %v6340_v34 }
 0x114   : > { %v5630_v51 = vpop.f32.mrf.mxu0  ;;  %v6952_v55 = vpop.f32.mrf.mxu1 }
 0x115   : > { %v1216_v54 = vmax.f32 %v756_v46, 0.0  ;;  %v1336_v61 = vpack.c.bf16 %v1218_v50, %v1217_v56  ;;  %v777_v4 = vadd.f32 %v5630_v51, %v6886_v21 }
 0x116   : > { %v768_v58 = vpop.f32.mrf.mxu0  ;;  %v6954_v60 = vpop.f32.mrf.mxu1 }
 0x117   : > { %v1335_v59 = vpack.c.bf16 %v1216_v54, %v1215_v52  ;;  %v769_v0 = vadd.f32 %v6886_v21, %v768_v58  ;;  %v1221_v15 = vmax.f32 %v777_v4, 0.0 }
 0x118   : > { %v5631_v63 = vpop.f32.mrf.mxu0  ;;  %v6958_v3 = vpop.f32.mrf.mxu1 }
 0x119   : > { %v780_v1 = vadd.f32 %v5631_v63, %v6886_v21  ;;  %5768 = vmatprep.mubr.bf16.mxu1 %v1335_v59  ;;  %v1219_v11 = vmax.f32 %v769_v0, 0.0 }
 0x11a   : > { %v771_v5 = vpop.f32.mrf.mxu0  ;;  %5769 = vmatmul.mubr.bf16.gmra.mxu1 %v1336_v61  ;;  %v6962_v7 = vpop.f32.mrf.mxu1 }
 0x11b   : > { %v772_v6 = vadd.f32 %v6886_v21, %v771_v5  ;;  %v1222_v9 = vmax.f32 %v780_v1, 0.0 }
 0x11c   : > { %v5634_v10 = vpop.f32.mrf.mxu0  ;;  %v6964_v14 = vpop.f32.mrf.mxu1 }
 0x11d   : > { %v1220_v13 = vmax.f32 %v772_v6, 0.0  ;;  %v1338_v20 = vpack.c.bf16 %v1222_v9, %v1221_v15  ;;  %v793_v29 = vadd.f32 %v5634_v10, %v6886_v21 }
 0x11e   : > { %v784_v16 = vpop.f32.mrf.mxu0  ;;  %v6966_v25 = vpop.f32.mrf.mxu1 }
 0x11f   : > { %v1337_v18 = vpack.c.bf16 %v1220_v13, %v1219_v11  ;;  %v785_v27 = vadd.f32 %v6886_v21, %v784_v16  ;;  %v1225_v45 = vmax.f32 %v793_v29, 0.0 }
 0x120   : > { %v5635_v23 = vpop.f32.mrf.mxu0  ;;  %v6975_v40 = vpop.f32.mrf.mxu1 }
 0x121   : > { %v796_v28 = vadd.f32 %v5635_v23, %v6886_v21  ;;  %5772 = vmatprep.mubr.bf16.mxu1 %v1337_v18  ;;  %v1223_v41 = vmax.f32 %v785_v27, 0.0 }
 0x122   : > { %v787_v32 = vpop.f32.mrf.mxu0  ;;  %5773 = vmatmul.mubr.bf16.gmra.mxu1 %v1338_v20  ;;  %v6977_v52 = vpop.f32.mrf.mxu1 }
 0x123   : > { %v788_v33 = vadd.f32 %v6886_v21, %v787_v32  ;;  %v1226_v37 = vmax.f32 %v796_v28, 0.0 }
 0x124   : > { %v5638_v38 = vpop.f32.mrf.mxu0  ;;  %v6983_v1 = vpop.f32.mrf.mxu1 }
 0x125   : > { %v1224_v43 = vmax.f32 %v788_v33, 0.0  ;;  %v1340_v50 = vpack.c.bf16 %v1226_v37, %v1225_v45  ;;  %v809_v58 = vadd.f32 %v5638_v38, %v6886_v21 }
 0x126   : > { %v800_v46 = vpop.f32.mrf.mxu0  ;;  %v6985_v15 = vpop.f32.mrf.mxu1 }
 0x127   : > { %v1339_v49 = vpack.c.bf16 %v1224_v43, %v1223_v41  ;;  %v801_v54 = vadd.f32 %v6886_v21, %v800_v46  ;;  %v1229_v6 = vmax.f32 %v809_v58, 0.0 }
 0x128   : > { %v5639_v51 = vpop.f32.mrf.mxu0  ;;  %v6991_v32 = vpop.f32.mrf.mxu1 }
 0x129   : > { %v812_v56 = vadd.f32 %v5639_v51, %v6886_v21  ;;  %5776 = vmatprep.mubr.bf16.mxu1 %v1339_v49  ;;  %v1227_v4 = vmax.f32 %v801_v54, 0.0 }
 0x12a   : > { %v803_v59 = vpop.f32.mrf.mxu0  ;;  %5777 = vmatmul.mubr.bf16.gmra.mxu1 %v1340_v50  ;;  %v6993_v46 = vpop.f32.mrf.mxu1 }
 0x12b   : > { %v804_v61 = vadd.f32 %v6886_v21, %v803_v59  ;;  %v1230_v63 = vmax.f32 %v812_v56, 0.0 }
 0x12c   : > { %v5642_v0 = vpop.f32.mrf.mxu0 }
 0x12d   : > { %v1228_v5 = vmax.f32 %v804_v61, 0.0  ;;  %v1342_v11 = vpack.c.bf16 %v1230_v63, %v1229_v6  ;;  %v825_v20 = vadd.f32 %v5642_v0, %v6886_v21  ;;  %v6999_v61 = vpop.f32.mrf.mxu1 }
 0x12e   : > { %v816_v9 = vpop.f32.mrf.mxu0 }
 0x12f   : > { %v1341_v10 = vpack.c.bf16 %v1228_v5, %v1227_v4  ;;  %v817_v16 = vadd.f32 %v6886_v21, %v816_v9  ;;  %v1233_v37 = vmax.f32 %v825_v20, 0.0 }
 0x130   : > { %v5643_v13 = vpop.f32.mrf.mxu0 }
 0x131   : > { %v828_v18 = vadd.f32 %v5643_v13, %v6886_v21  ;;  %5780 = vmatprep.mubr.bf16.mxu1 %v1341_v10  ;;  %v1231_v33 = vmax.f32 %v817_v16, 0.0 }
 0x132   : > { %v819_v23 = vpop.f32.mrf.mxu0  ;;  %5781 = vmatmul.mubr.bf16.gmra.mxu1 %v1342_v11  ;;  %v7001_v11 = vpop.f32.mrf.mxu1 }
 0x133   : > { %v820_v27 = vadd.f32 %v6886_v21, %v819_v23  ;;  %v1234_v28 = vmax.f32 %v828_v18, 0.0 }
 0x134   : > { %v5646_v29 = vpop.f32.mrf.mxu0 }
 0x135   : > { %v1232_v34 = vmax.f32 %v820_v27, 0.0  ;;  %v1344_v43 = vpack.c.bf16 %v1234_v28, %v1233_v37  ;;  %v841_v51 = vadd.f32 %v5646_v29, %v6886_v21  ;;  %v7007_v29 = vpop.f32.mrf.mxu1 }
 0x136   : > { %v832_v38 = vpop.f32.mrf.mxu0 }
 0x137   : > { %v1343_v41 = vpack.c.bf16 %v1232_v34, %v1231_v33  ;;  %v833_v49 = vadd.f32 %v6886_v21, %v832_v38  ;;  %v1237_v4 = vmax.f32 %v841_v51, 0.0 }
 0x138   : > { %v5647_v45 = vpop.f32.mrf.mxu0 }
 0x139   : > { %v844_v50 = vadd.f32 %v5647_v45, %v6886_v21  ;;  %5784 = vmatprep.mubr.bf16.mxu1 %v1343_v41  ;;  %v1235_v63 = vmax.f32 %v833_v49, 0.0  ;;  %v7009_v49 = vpop.f32.mrf.mxu1 }
 0x13a   : > { %v835_v54 = vpop.f32.mrf.mxu0  ;;  %5785 = vmatmul.mubr.bf16.gmra.mxu1 %v1344_v43 }
 0x13b   : > { %v836_v56 = vadd.f32 %v6886_v21, %v835_v54  ;;  %v1238_v58 = vmax.f32 %v844_v50, 0.0 }
 0x13c   : > { %v5650_v59 = vpop.f32.mrf.mxu0 }
 0x13d   : > { %v1236_v0 = vmax.f32 %v836_v56, 0.0  ;;  %v1346_v9 = vpack.c.bf16 %v1238_v58, %v1237_v4  ;;  %v857_v18 = vadd.f32 %v5650_v59, %v6886_v21 }
 0x13e   : > { %v848_v5 = vpop.f32.mrf.mxu0 }
 0x13f   : > { %v1345_v6 = vpack.c.bf16 %v1236_v0, %v1235_v63  ;;  %v849_v13 = vadd.f32 %v6886_v21, %v848_v5  ;;  %v1241_v37 = vmax.f32 %v857_v18, 0.0  ;;  %v7015_v0 = vpop.f32.mrf.mxu1 }
 0x140   : > { %v5651_v10 = vpop.f32.mrf.mxu0 }
 0x141   : > { %v860_v16 = vadd.f32 %v5651_v10, %v6886_v21  ;;  %5788 = vmatprep.mubr.bf16.mxu1 %v1345_v6  ;;  %v1239_v33 = vmax.f32 %v849_v13, 0.0  ;;  %v7017_v18 = vpop.f32.mrf.mxu1 }
 0x142   : > { %v851_v20 = vpop.f32.mrf.mxu0  ;;  %5789 = vmatmul.mubr.bf16.gmra.mxu1 %v1346_v9 }
 0x143   : > { %v852_v23 = vadd.f32 %v6886_v21, %v851_v20  ;;  %v1242_v27 = vmax.f32 %v860_v16, 0.0 }
 0x144   : > { %v5654_v28 = vpop.f32.mrf.mxu0 }
 0x145   : > { %v1240_v34 = vmax.f32 %v852_v23, 0.0  ;;  %v1348_v43 = vpack.c.bf16 %v1242_v27, %v1241_v37  ;;  %v873_v54 = vadd.f32 %v5654_v28, %v6886_v21 }
 0x146   : > { %v864_v38 = vpop.f32.mrf.mxu0 }
 0x147   : > { %v1347_v41 = vpack.c.bf16 %v1240_v34, %v1239_v33  ;;  %v865_v50 = vadd.f32 %v6886_v21, %v864_v38  ;;  %v1245_v6 = vmax.f32 %v873_v54, 0.0  ;;  %v7023_v38 = vpop.f32.mrf.mxu1  ;;  %v6341_v54 = vld [vmem:[%s8078_s7 + $0x10] sm:$0xff]  }
 0x148   : > { %v5655_v45 = vpop.f32.mrf.mxu0  ;;  %6018 = vmatprep.subr.bf16.mxu1 %v6341_v54 }
 0x149   : > { %v876_v51 = vadd.f32 %v5655_v45, %v6886_v21  ;;  %5792 = vmatprep.mubr.bf16.mxu1 %v1347_v41  ;;  %v1243_v4 = vmax.f32 %v865_v50, 0.0  ;;  %6019 = vmatpush3.bf16.msra.mxu1 %v6341_v54 }
 0x14a   : > { %v867_v56 = vpop.f32.mrf.mxu0  ;;  %5793 = vmatmul.mubr.bf16.gmra.mxu1 %v1348_v43 }
 0x14b   : > { %v868_v58 = vadd.f32 %v6886_v21, %v867_v56  ;;  %v1246_v59 = vmax.f32 %v876_v51, 0.0 }
 0x14c   : > { %v5658_v63 = vpop.f32.mrf.mxu0 }
 0x14d   : > { %v1244_v5 = vmax.f32 %v868_v58, 0.0  ;;  %v1350_v13 = vpack.c.bf16 %v1246_v59, %v1245_v6  ;;  %v889_v27 = vadd.f32 %v5658_v63, %v6886_v21  ;;  %v7028_v59 = vpop.f32.mrf.mxu1 }
 0x14e   : > { %v880_v9 = vpop.f32.mrf.mxu0 }
 0x14f   : > { %v1349_v10 = vpack.c.bf16 %v1244_v5, %v1243_v4  ;;  %v881_v20 = vadd.f32 %v6886_v21, %v880_v9  ;;  %v1249_v45 = vmax.f32 %v889_v27, 0.0 }
 0x150   : > { %v5659_v16 = vpop.f32.mrf.mxu0 }
 0x151   : > { %v892_v23 = vadd.f32 %v5659_v16, %v6886_v21  ;;  %5796 = vmatprep.mubr.bf16.mxu1 %v1349_v10  ;;  %v1247_v41 = vmax.f32 %v881_v20, 0.0  ;;  %v7034_v16 = vpop.f32.mrf.mxu1 }
 0x152   : > { %v883_v28 = vpop.f32.mrf.mxu0  ;;  %5797 = vmatmul.mubr.bf16.gmra.mxu1 %v1350_v13 }
 0x153   : > { %v884_v33 = vadd.f32 %v6886_v21, %v883_v28  ;;  %v1250_v34 = vmax.f32 %v892_v23, 0.0 }
 0x154   : > { %v5662_v37 = vpop.f32.mrf.mxu0 }
 0x155   : > { %v1248_v43 = vmax.f32 %v884_v33, 0.0  ;;  %v1352_v56 = vpack.c.bf16 %v1250_v34, %v1249_v45  ;;  %v905_v5 = vadd.f32 %v5662_v37, %v6886_v21 }
 0x156   : > { %v896_v50 = vpop.f32.mrf.mxu0 }
 0x157   : > { %v1351_v51 = vpack.c.bf16 %v1248_v43, %v1247_v41  ;;  %v897_v63 = vadd.f32 %v6886_v21, %v896_v50  ;;  %v1253_v27 = vmax.f32 %v905_v5, 0.0  ;;  %v7036_v43 = vpop.f32.mrf.mxu1 }
 0x158   : > { %v5663_v58 = vpop.f32.mrf.mxu0 }
 0x159   : > { %v908_v4 = vadd.f32 %v5663_v58, %v6886_v21  ;;  %5800 = vmatprep.mubr.bf16.mxu1 %v1351_v51  ;;  %v1251_v20 = vmax.f32 %v897_v63, 0.0  ;;  %v7042_v63 = vpop.f32.mrf.mxu1 }
 0x15a   : > { %v899_v6 = vpop.f32.mrf.mxu0  ;;  %5801 = vmatmul.mubr.bf16.gmra.mxu1 %v1352_v56 }
 0x15b   : > { %v900_v9 = vadd.f32 %v6886_v21, %v899_v6  ;;  %v1254_v10 = vmax.f32 %v908_v4, 0.0 }
 0x15c   : > { %v5666_v13 = vpop.f32.mrf.mxu0 }
 0x15d   : > { %v1252_v23 = vmax.f32 %v900_v9, 0.0  ;;  %v1354_v34 = vpack.c.bf16 %v1254_v10, %v1253_v27  ;;  %v921_v50 = vadd.f32 %v5666_v13, %v6886_v21  ;;  %v7044_v27 = vpop.f32.mrf.mxu1  ;;  %v945_v13 = vadd.f32 %v6886_v21, %v6888_v22 }
 0x15e   : > { %v912_v28 = vpop.f32.mrf.mxu0 }
 0x15f   : > { %v1353_v33 = vpack.c.bf16 %v1252_v23, %v1251_v20  ;;  %v913_v37 = vadd.f32 %v6886_v21, %v912_v28  ;;  %v1257_v6 = vmax.f32 %v921_v50, 0.0  ;;  %v948_v28 = vadd.f32 %v6886_v21, %v6896_v30 }
 0x160   : > { %v5667_v41 = vpop.f32.mrf.mxu0 }
 0x161   : > { %v924_v45 = vadd.f32 %v5667_v41, %v6886_v21  ;;  %5804 = vmatprep.mubr.bf16.mxu1 %v1353_v33  ;;  %v1255_v4 = vmax.f32 %v913_v37, 0.0 }
 0x162   : > { %v915_v51 = vpop.f32.mrf.mxu0  ;;  %5805 = vmatmul.mubr.bf16.gmra.mxu1 %v1354_v34 }
 0x163   : > { %v916_v54 = vadd.f32 %v6886_v21, %v915_v51  ;;  %v1258_v56 = vmax.f32 %v924_v45, 0.0  ;;  %v7054_v51 = vpop.f32.mrf.mxu1 }
 0x164   : > { %v5670_v58 = vpop.f32.mrf.mxu0 }
 0x165   : > { %v1256_v5 = vmax.f32 %v916_v54, 0.0  ;;  %v1356_v20 = vpack.c.bf16 %v1258_v56, %v1257_v6  ;;  %v937_v41 = vadd.f32 %v5670_v58, %v6886_v21  ;;  %v1263_v54 = vmax.f32 %v945_v13, 0.0 }
 0x166   : > { %v928_v9 = vpop.f32.mrf.mxu0  ;;  %v1264_v56 = vmax.f32 %v948_v28, 0.0  ;;  %v953_v6 = vadd.f32 %v6881_v19, %v6886_v21 }
 0x167   : > { %v1355_v10 = vpack.c.bf16 %v1256_v5, %v1255_v4  ;;  %v929_v33 = vadd.f32 %v6886_v21, %v928_v9  ;;  %v1261_v5 = vmax.f32 %v937_v41, 0.0  ;;  %v956_v9 = vadd.f32 %v6892_v26, %v6886_v21 }
 0x168   : > { %v5671_v23 = vpop.f32.mrf.mxu0  ;;  %v1359_v13 = vpack.c.bf16 %v1264_v56, %v1263_v54  ;;  %v1265_v28 = vmax.f32 %v953_v6, 0.0  ;;  %v988_v6 = vadd.f32 %v6916_v62, %v6886_v21  ;;  %v1001_v62 = vadd.f32 %v6925_v8, %v6886_v21 }
 0x169   : > { %v940_v34 = vadd.f32 %v5671_v23, %v6886_v21  ;;  %5808 = vmatprep.mubr.bf16.mxu1 %v1355_v10  ;;  %v1259_v22 = vmax.f32 %v929_v33, 0.0  ;;  %v7060_v10 = vpop.f32.mrf.mxu1  ;;  %v964_v23 = vadd.f32 %v6886_v21, %v6908_v48  ;;  %v1266_v33 = vmax.f32 %v956_v9, 0.0 }
 0x16a   : > { %v931_v37 = vpop.f32.mrf.mxu0  ;;  %5809 = vmatmul.mubr.bf16.gmra.mxu1 %v1356_v20  ;;  %v961_v20 = vadd.f32 %v6886_v21, %v6900_v39  ;;  %v972_v39 = vadd.f32 %v6904_v44, %v6886_v21  ;;  %v977_v48 = vadd.f32 %v6886_v21, %v6912_v57  ;;  %v985_v44 = vadd.f32 %v6910_v53, %v6886_v21 }
 0x16b   : > { %v932_v45 = vadd.f32 %v6886_v21, %v931_v37  ;;  %v1262_v50 = vmax.f32 %v940_v34, 0.0  ;;  %v7066_v34 = vpop.f32.mrf.mxu1  ;;  %v1268_v41 = vmax.f32 %v964_v23, 0.0  ;;  %v1360_v26 = vpack.c.bf16 %v1266_v33, %v1265_v28 }
 0x16c   : > { %v1267_v19 = vmax.f32 %v961_v20, 0.0  ;;  %v969_v37 = vadd.f32 %v6898_v35, %v6886_v21  ;;  %v996_v9 = vadd.f32 %v6886_v21, %v6935_v24  ;;  %v1273_v20 = vmax.f32 %v985_v44, 0.0 }
 0x16d   : > { %v1260_v4 = vmax.f32 %v932_v45, 0.0  ;;  %v1358_v58 = vpack.c.bf16 %v1262_v50, %v1261_v5  ;;  %v7072_v45 = vpop.f32.mrf.mxu1  ;;  %v980_v50 = vadd.f32 %v6886_v21, %v6920_v2  ;;  %v1271_v5 = vmax.f32 %v977_v48, 0.0 }
 0x16e   : > { %v1361_v54 = vpack.c.bf16 %v1268_v41, %v1267_v19  ;;  %v1269_v56 = vmax.f32 %v969_v37, 0.0  ;;  %v993_v2 = vadd.f32 %v6886_v21, %v6927_v12  ;;  %v1274_v23 = vmax.f32 %v988_v6, 0.0 }
 0x16f   : > { %v1357_v30 = vpack.c.bf16 %v1260_v4, %v1259_v22  ;;  %v1270_v22 = vmax.f32 %v972_v39, 0.0  ;;  %v7078_v4 = vpop.f32.mrf.mxu1  ;;  %v1272_v35 = vmax.f32 %v980_v50, 0.0  ;;  %v1276_v53 = vmax.f32 %v996_v9, 0.0 }
 0x170   : > { %v1275_v28 = vmax.f32 %v993_v2, 0.0  ;;  %v1364_v33 = vpack.c.bf16 %v1274_v23, %v1273_v20  ;;  %v1004_v19 = vadd.f32 %v6931_v17, %v6886_v21  ;;  %v1009_v24 = vadd.f32 %v6886_v21, %v6939_v36 }
 0x171   : > { %5812 = vmatprep.mubr.bf16.mxu1 %v1357_v30  ;;  %v1362_v30 = vpack.c.bf16 %v1270_v22, %v1269_v56  ;;  %v7084_v57 = vpop.f32.mrf.mxu1  ;;  %v1012_v41 = vadd.f32 %v6886_v21, %v6947_v47  ;;  %v1277_v37 = vmax.f32 %v1001_v62, 0.0  ;;  %v1017_v17 = vadd.f32 %v6937_v31, %v6886_v21 }
 0x172   : > { %5813 = vmatmul.mubr.bf16.gmra.mxu1 %v1358_v58  ;;  %v1363_v58 = vpack.c.bf16 %v1272_v35, %v1271_v5  ;;  %v1278_v39 = vmax.f32 %v1004_v19, 0.0  ;;  %v1279_v50 = vmax.f32 %v1009_v24, 0.0  ;;  %v1020_v56 = vadd.f32 %v6943_v42, %v6886_v21  ;;  %v6342_v42 = vld [vmem:[%s8078_s7 + $0x8] sm:$0xff]  }
 0x173   : > { %5816 = vmatprep.mubr.bf16.mxu1 %v1359_v13  ;;  %v7090_v13 = vpop.f32.mrf.mxu1  ;;  %v1280_v8 = vmax.f32 %v1012_v41, 0.0  ;;  %v1025_v47 = vadd.f32 %v6886_v21, %v6954_v60  ;;  %v1028_v22 = vadd.f32 %v6886_v21, %v6962_v7  ;;  %v1281_v35 = vmax.f32 %v1017_v17, 0.0  ;;  %6020 = vmatprep.subr.bf16.mxu1 %v6342_v42 }
 0x174   : > { %v1033_v60 = vadd.f32 %v6952_v55, %v6886_v21  ;;  %v1036_v7 = vadd.f32 %v6958_v3, %v6886_v21  ;;  %v1044_v20 = vadd.f32 %v6886_v21, %v6977_v52  ;;  %6021 = vmatpush3.bf16.msra.mxu1 %v6342_v42  ;;  %v1049_v19 = vadd.f32 %v6964_v14, %v6886_v21 }
 0x175   : > { %v7096_v12 = vpop.f32.mrf.mxu1  ;;  %v1367_v5 = vpack.c.bf16 %v1280_v8, %v1279_v50  ;;  %v1283_v6 = vmax.f32 %v1025_v47, 0.0  ;;  %v1284_v31 = vmax.f32 %v1028_v22, 0.0  ;;  %v1057_v52 = vadd.f32 %v6886_v21, %v6985_v15 }
 0x176   : > { %v1288_v62 = vmax.f32 %v1044_v20, 0.0  ;;  %v1060_v41 = vadd.f32 %v6886_v21, %v6993_v46  ;;  %v1068_v17 = vadd.f32 %v6991_v32, %v6886_v21  ;;  %v1073_v46 = vadd.f32 %v6886_v21, %v7001_v11 }
 0x177   : > { %v7102_v48 = vpop.f32.mrf.mxu1  ;;  %v1369_v23 = vpack.c.bf16 %v1284_v31, %v1283_v6  ;;  %v1291_v8 = vmax.f32 %v1057_v52, 0.0  ;;  %v1081_v32 = vadd.f32 %v6999_v61, %v6886_v21  ;;  %v1084_v31 = vadd.f32 %v7007_v29, %v6886_v21 }
 0x178   : > { %v1292_v14 = vmax.f32 %v1060_v41, 0.0  ;;  %v1092_v42 = vadd.f32 %v6886_v21, %v7028_v59  ;;  %v1097_v29 = vadd.f32 %v7015_v0, %v6886_v21  ;;  %v1105_v59 = vadd.f32 %v6886_v21, %v7036_v43 }
 0x179   : > { %v7108_v36 = vpop.f32.mrf.mxu1 }
 0x17a   : > { %5817 = vmatmul.mubr.bf16.gmra.mxu1 %v1360_v26  ;;  %v1365_v26 = vpack.c.bf16 %v1276_v53, %v1275_v28  ;;  %v1285_v28 = vmax.f32 %v1033_v60, 0.0  ;;  %v1286_v53 = vmax.f32 %v1036_v7, 0.0  ;;  %v1373_v47 = vpack.c.bf16 %v1292_v14, %v1291_v8 }
 0x17b   : > { %5820 = vmatprep.mubr.bf16.mxu1 %v1361_v54  ;;  %v1366_v54 = vpack.c.bf16 %v1278_v39, %v1277_v37  ;;  %v7114_v44 = vpop.f32.mrf.mxu1  ;;  %v1289_v37 = vmax.f32 %v1049_v19, 0.0  ;;  %v1297_v60 = vmax.f32 %v1081_v32, 0.0  ;;  %v1298_v7 = vmax.f32 %v1084_v31, 0.0 }
 0x17c   : > { %v1370_v3 = vpack.c.bf16 %v1286_v53, %v1285_v28  ;;  %v1300_v61 = vmax.f32 %v1092_v42, 0.0  ;;  %v1100_v28 = vadd.f32 %v7023_v38, %v6886_v21  ;;  %v1108_v53 = vadd.f32 %v6886_v21, %v7044_v27  ;;  %v7180_v38 = vld [vmem:[%s8075_s4] ss:$0 sm:$0xff] }
 0x17d   : > { %v7123_v9 = vpop.f32.mrf.mxu1  ;;  %v1303_v52 = vmax.f32 %v1105_v59, 0.0 }
 0x17e   : > { %v1302_v19 = vmax.f32 %v1100_v28, 0.0  ;;  %v1304_v0 = vmax.f32 %v1108_v53, 0.0 }
 0x182   : > { %5821 = vmatmul.mubr.bf16.gmra.mxu1 %v1362_v30  ;;  %v1282_v30 = vmax.f32 %v1020_v56, 0.0  ;;  %v1076_v56 = vadd.f32 %v6886_v21, %v7009_v49  ;;  %v1089_v49 = vadd.f32 %v6886_v21, %v7017_v18 }
 0x183   : > { %5824 = vmatprep.mubr.bf16.mxu1 %v1363_v58  ;;  %v1041_v58 = vadd.f32 %v6886_v21, %v6966_v25  ;;  %v1052_v25 = vadd.f32 %v6975_v40, %v6886_v21  ;;  %v1065_v40 = vadd.f32 %v6983_v1, %v6886_v21 }
 0x184   : > { %v1368_v2 = vpack.c.bf16 %v1282_v30, %v1281_v35  ;;  %v1295_v30 = vmax.f32 %v1073_v46, 0.0  ;;  %v1296_v1 = vmax.f32 %v1076_v56, 0.0  ;;  %v1299_v20 = vmax.f32 %v1089_v49, 0.0 }
 0x185   : > { %v1287_v55 = vmax.f32 %v1041_v58, 0.0  ;;  %v1290_v39 = vmax.f32 %v1052_v25, 0.0  ;;  %v1293_v22 = vmax.f32 %v1065_v40, 0.0  ;;  %v1124_v40 = vadd.f32 %v6886_v21, %v7072_v45 }
 0x186   : > { %v1379_v46 = vpack.c.bf16 %v1304_v0, %v1303_v52 }
 0x187   : > { %v1308_v32 = vmax.f32 %v1124_v40, 0.0 }
 0x18a   : > { %5825 = vmatmul.mubr.bf16.gmra.mxu1 %v1364_v33  ;;  %v7129_v33 = vpop.f32.mrf.mxu1 }
 0x18b   : > { %5828 = vmatprep.mubr.bf16.mxu1 %v1365_v26  ;;  %v1371_v26 = vpack.c.bf16 %v1288_v62, %v1287_v55  ;;  %v1377_v55 = vpack.c.bf16 %v1300_v61, %v1299_v20 }
 0x18c   : > { %v7135_v24 = vpop.f32.mrf.mxu1 }
 0x18e   : > { %v7141_v50 = vpop.f32.mrf.mxu1 }
 0x190   : > { %v7147_v15 = vpop.f32.mrf.mxu1 }
 0x192   : > { %5829 = vmatmul.mubr.bf16.gmra.mxu1 %v1366_v54  ;;  %v1372_v54 = vpack.c.bf16 %v1290_v39, %v1289_v37  ;;  %v7153_v35 = vpop.f32.mrf.mxu1  ;;  %v1113_v37 = vadd.f32 %v7034_v16, %v6886_v21  ;;  %v1116_v39 = vadd.f32 %v7042_v63, %v6886_v21 }
 0x193   : > { %5832 = vmatprep.mubr.bf16.mxu1 %v1367_v5  ;;  %v1294_v5 = vmax.f32 %v1068_v17, 0.0 }
 0x194   : > { %v7159_v11 = vpop.f32.mrf.mxu1  ;;  %v1306_v63 = vmax.f32 %v1116_v39, 0.0 }
 0x195   : > { %v1374_v6 = vpack.c.bf16 %v1294_v5, %v1293_v22  ;;  %v1305_v5 = vmax.f32 %v1113_v37, 0.0 }
 0x196   : > { %v7165_v58 = vpop.f32.mrf.mxu1 }
 0x198   : > { %v7171_v18 = vpop.f32.mrf.mxu1 }
 0x19a   : > { %5833 = vmatmul.mubr.bf16.gmra.mxu1 %v1368_v2  ;;  %v1375_v2 = vpack.c.bf16 %v1296_v1, %v1295_v30 }
 0x19b   : > { %5836 = vmatprep.mubr.bf16.mxu1 %v1369_v23  ;;  %v1376_v23 = vpack.c.bf16 %v1298_v7, %v1297_v60  ;;  %v1129_v60 = vadd.f32 %v7054_v51, %v6886_v21  ;;  %v1132_v7 = vadd.f32 %v7066_v34, %v6886_v21 }
 0x19d   : > { %v1309_v34 = vmax.f32 %v1129_v60, 0.0 }
 0x1a2   : > { %5837 = vmatmul.mubr.bf16.gmra.mxu1 %v1370_v3  ;;  %v1301_v3 = vmax.f32 %v1097_v29, 0.0  ;;  %v1140_v29 = vadd.f32 %v6886_v21, %v7096_v12 }
 0x1a3   : > { %5840 = vmatprep.mubr.bf16.mxu1 %v1371_v26 }
 0x1a4   : > { %v1378_v27 = vpack.c.bf16 %v1302_v19, %v1301_v3  ;;  %v1310_v3 = vmax.f32 %v1132_v7, 0.0  ;;  %v1312_v0 = vmax.f32 %v1140_v29, 0.0 }
 0x1aa   : > { %5841 = vmatmul.mubr.bf16.gmra.mxu1 %v1372_v54  ;;  %v1121_v54 = vadd.f32 %v6886_v21, %v7060_v10 }
 0x1ab   : > { %5844 = vmatprep.mubr.bf16.mxu1 %v1373_v47 }
 0x1b2   : > { %5845 = vmatmul.mubr.bf16.gmra.mxu1 %v1374_v6  ;;  %v1307_v6 = vmax.f32 %v1121_v54, 0.0 }
 0x1b3   : > { %5848 = vmatprep.mubr.bf16.mxu1 %v1375_v2  ;;  %v1380_v2 = vpack.c.bf16 %v1306_v63, %v1305_v5 }
 0x1b4   : > { %v1381_v59 = vpack.c.bf16 %v1308_v32, %v1307_v6 }
 0x1ba   : > { %v5754_v62 = vpop.f32.mrf.mxu1  ;;  %5849 = vmatmul.mubr.bf16.gmra.mxu1 %v1376_v23  ;;  %v1137_v23 = vadd.f32 %v6886_v21, %v7084_v57 }
 0x1bb   : > { %5852 = vmatprep.mubr.bf16.mxu1 %v1377_v55  ;;  %v1505_v8 = vadd.f32 %v5754_v62, %v7180_v38 }
 0x1bc   : > { %v1496_v25 = vpop.f32.mrf.mxu1  ;;  %v1311_v52 = vmax.f32 %v1137_v23, 0.0 }
 0x1bd   : > { %v1497_v43 = vadd.f32 %v7180_v38, %v1496_v25  ;;  %v2009_v30 = vmax.f32 %v1505_v8, 0.0 }
 0x1be   : > { %v5755_v41 = vpop.f32.mrf.mxu1 }
 0x1bf   : > { %v1508_v26 = vadd.f32 %v5755_v41, %v7180_v38  ;;  %v2007_v22 = vmax.f32 %v1497_v43, 0.0 }
 0x1c0   : > { %v1499_v14 = vpop.f32.mrf.mxu1 }
 0x1c1   : > { %v1500_v17 = vadd.f32 %v7180_v38, %v1499_v14  ;;  %v2010_v56 = vmax.f32 %v1508_v26, 0.0  ;;  %v1382_v26 = vpack.c.bf16 %v1310_v3, %v1309_v34 }
 0x1c2   : > { %v5758_v47 = vpop.f32.mrf.mxu1  ;;  %5853 = vmatmul.mubr.bf16.gmra.mxu1 %v1378_v27  ;;  %v7214_v27 = vld [vmem:[%s8073_s2] ss:$0 sm:$0xff] }
 0x1c3   : > { %v2008_v16 = vmax.f32 %v1500_v17, 0.0  ;;  %5856 = vmatprep.mubr.bf16.mxu1 %v1379_v46  ;;  %v2136_v31 = vpack.c.bf16 %v2010_v56, %v2009_v30  ;;  %v1521_v20 = vadd.f32 %v5758_v47, %v7180_v38  ;;  %v1145_v37 = vadd.f32 %v7214_v27, %v7078_v4 }
 0x1c4   : > { %v1512_v1 = vpop.f32.mrf.mxu1  ;;  %v1148_v39 = vadd.f32 %v7214_v27, %v7090_v13  ;;  %v1153_v54 = vadd.f32 %v7214_v27, %v7108_v36  ;;  %v1156_v40 = vadd.f32 %v7214_v27, %v7123_v9  ;;  %v1383_v46 = vpack.c.bf16 %v1312_v0, %v1311_v52 }
 0x1c5   : > { %v2135_v10 = vpack.c.bf16 %v2008_v16, %v2007_v22  ;;  %v1513_v45 = vadd.f32 %v7180_v38, %v1512_v1  ;;  %v2013_v19 = vmax.f32 %v1521_v20, 0.0  ;;  %v1313_v13 = vmax.f32 %v1145_v37, 0.0 }
 0x1c6   : > { %v5759_v49 = vpop.f32.mrf.mxu1  ;;  %v1314_v16 = vmax.f32 %v1148_v39, 0.0  ;;  %v1315_v30 = vmax.f32 %v1153_v54, 0.0  ;;  %v1316_v1 = vmax.f32 %v1156_v40, 0.0  ;;  %v1169_v7 = vadd.f32 %v7214_v27, %v7135_v24 }
 0x1c7   : > { %v1524_v42 = vadd.f32 %v5759_v49, %v7180_v38  ;;  %5888 = vmatprep.mubr.msk.bf16.mxu0 %vm2238_vm0, %v2135_v10  ;;  %v2011_v51 = vmax.f32 %v1513_v45, 0.0  ;;  %v1161_v45 = vadd.f32 %v7214_v27, %v7102_v48  ;;  %v1172_v20 = vadd.f32 %v7214_v27, %v7147_v15 }
 0x1c8   : > { %v1515_v61 = vpop.f32.mrf.mxu1  ;;  %5889 = vmatmul.mubr.msk.bf16.vlgmr.msra.gmra.mxu0 %vm2238_vm0, %v2136_v31  ;;  %v6343_v31 = vld [vmem:[%s8078_s7] sm:$0xff]   ;;  %v1384_v49 = vpack.c.bf16 %v1314_v16, %v1313_v13  ;;  %v1385_v23 = vpack.c.bf16 %v1316_v1, %v1315_v30  ;;  %v1177_v0 = vadd.f32 %v7214_v27, %v7129_v33 }
 0x1c9   : > { %v1516_v28 = vadd.f32 %v7180_v38, %v1515_v61  ;;  %v2014_v53 = vmax.f32 %v1524_v42, 0.0  ;;  %v1164_v42 = vadd.f32 %v7214_v27, %v7114_v44  ;;  %6022 = vmatprep.subr.bf16.mxu1 %v6343_v31  ;;  %v1320_v24 = vmax.f32 %v1172_v20, 0.0 }
 0x1ca   : > { %v5762_v55 = vpop.f32.mrf.mxu1  ;;  %5857 = vmatmul.mubr.bf16.gmra.mxu1 %v1380_v2 }
 0x1cb   : > { %v2012_v62 = vmax.f32 %v1516_v28, 0.0  ;;  %5860 = vmatprep.mubr.bf16.mxu1 %v1381_v59  ;;  %v2138_v57 = vpack.c.bf16 %v2014_v53, %v2013_v19  ;;  %v1537_v8 = vadd.f32 %v5762_v55, %v7180_v38  ;;  %6023 = vmatpush3.bf16.msra.mxu1 %v6343_v31  ;;  %v1317_v59 = vmax.f32 %v1161_v45, 0.0 }
 0x1cc   : > { %v1528_v25 = vpop.f32.mrf.mxu1  ;;  %v1318_v53 = vmax.f32 %v1164_v42, 0.0 }
 0x1cd   : > { %v2137_v41 = vpack.c.bf16 %v2012_v62, %v2011_v51  ;;  %v1529_v21 = vadd.f32 %v7180_v38, %v1528_v25  ;;  %v2017_v5 = vmax.f32 %v1537_v8, 0.0  ;;  %v1319_v62 = vmax.f32 %v1169_v7, 0.0 }
 0x1ce   : > { %v5763_v43 = vpop.f32.mrf.mxu1  ;;  %v1386_v52 = vpack.c.bf16 %v1318_v53, %v1317_v59 }
 0x1cf   : > { %v1540_v12 = vadd.f32 %v5763_v43, %v7180_v38  ;;  %5892 = vmatprep.mubr.msk.bf16.mxu0 %vm2238_vm0, %v2137_v41  ;;  %v2015_v4 = vmax.f32 %v1529_v21, 0.0  ;;  %v1180_v41 = vadd.f32 %v7214_v27, %v7141_v50  ;;  %v1185_v21 = vadd.f32 %v7214_v27, %v7159_v11  ;;  %v6344_v11 = vld [vmem:[%s8080_s9 + $0x38] sm:$0xff]  }
 0x1d0   : > { %v1531_v14 = vpop.f32.mrf.mxu1  ;;  %5893 = vmatmul.mubr.msk.bf16.gmra.mxu0 %vm2238_vm0, %v2138_v57  ;;  %v1387_v37 = vpack.c.bf16 %v1320_v24, %v1319_v62  ;;  %v1321_v50 = vmax.f32 %v1177_v0, 0.0  ;;  %6152 = vmatprep.subr.bf16.mxu0 %v6344_v11 }
 0x1d1   : > { %v1532_v17 = vadd.f32 %v7180_v38, %v1531_v14  ;;  %v2018_v56 = vmax.f32 %v1540_v12, 0.0  ;;  %v1188_v12 = vadd.f32 %v7214_v27, %v7171_v18  ;;  %v1322_v54 = vmax.f32 %v1180_v41, 0.0  ;;  %6153 = vmatpush3.bf16.msra.mxu0 %v6344_v11 }
 0x1d2   : > { %v5766_v47 = vpop.f32.mrf.mxu1  ;;  %5861 = vmatmul.mubr.bf16.gmra.mxu1 %v1382_v26 }
 0x1d3   : > { %v2016_v22 = vmax.f32 %v1532_v17, 0.0  ;;  %5864 = vmatprep.mubr.bf16.mxu1 %v1383_v46  ;;  %v2140_v36 = vpack.c.bf16 %v2018_v56, %v2017_v5  ;;  %v1553_v2 = vadd.f32 %v5766_v47, %v7180_v38  ;;  %v1323_v46 = vmax.f32 %v1185_v21, 0.0 }
 0x1d4   : > { %v1544_v63 = vpop.f32.mrf.mxu1  ;;  %v1324_v56 = vmax.f32 %v1188_v12, 0.0  ;;  %v1388_v16 = vpack.c.bf16 %v1322_v54, %v1321_v50  ;;  %v1193_v5 = vadd.f32 %v7214_v27, %v7153_v35 }
 0x1d5   : > { %v2139_v6 = vpack.c.bf16 %v2016_v22, %v2015_v4  ;;  %v1545_v9 = vadd.f32 %v7180_v38, %v1544_v63  ;;  %v2021_v55 = vmax.f32 %v1553_v2, 0.0  ;;  %v1196_v63 = vadd.f32 %v7214_v27, %v7165_v58 }
 0x1d6   : > { %v5767_v32 = vpop.f32.mrf.mxu1 }
 0x1d7   : > { %v1556_v10 = vadd.f32 %v5767_v32, %v7180_v38  ;;  %5896 = vmatprep.mubr.msk.bf16.mxu0 %vm2238_vm0, %v2139_v6  ;;  %v2019_v28 = vmax.f32 %v1545_v9, 0.0  ;;  %v1326_v35 = vmax.f32 %v1196_v63, 0.0 }
 0x1d8   : > { %v1547_v60 = vpop.f32.mrf.mxu1  ;;  %5897 = vmatmul.mubr.msk.bf16.gmra.mxu0 %vm2238_vm0, %v2140_v36  ;;  %v1389_v36 = vpack.c.bf16 %v1324_v56, %v1323_v46 }
 0x1d9   : > { %v1548_v61 = vadd.f32 %v7180_v38, %v1547_v60  ;;  %v2022_v29 = vmax.f32 %v1556_v10, 0.0 }
 0x1da   : > { %v5770_v48 = vpop.f32.mrf.mxu1  ;;  %5865 = vmatmul.mubr.bf16.gmra.mxu1 %v1384_v49  ;;  %v1325_v49 = vmax.f32 %v1193_v5, 0.0 }
 0x1db   : > { %v2020_v44 = vmax.f32 %v1548_v61, 0.0  ;;  %5868 = vmatprep.mubr.bf16.mxu1 %v1385_v23  ;;  %v2142_v3 = vpack.c.bf16 %v2022_v29, %v2021_v55  ;;  %v1569_v57 = vadd.f32 %v5770_v48, %v7180_v38 }
 0x1dc   : > { %v1560_v51 = vpop.f32.mrf.mxu1  ;;  %v1390_v20 = vpack.c.bf16 %v1326_v35, %v1325_v49 }
 0x1dd   : > { %v2141_v34 = vpack.c.bf16 %v2020_v44, %v2019_v28  ;;  %v1561_v19 = vadd.f32 %v7180_v38, %v1560_v51  ;;  %v2025_v40 = vmax.f32 %v1569_v57, 0.0 }
 0x1de   : > { %v5771_v15 = vpop.f32.mrf.mxu1 }
 0x1df   : > { %v1572_v25 = vadd.f32 %v5771_v15, %v7180_v38  ;;  %5900 = vmatprep.mubr.msk.bf16.mxu0 %vm2238_vm0, %v2141_v34  ;;  %v2023_v33 = vmax.f32 %v1561_v19, 0.0 }
 0x1e0   : > { %v1563_v43 = vpop.f32.mrf.mxu1  ;;  %5901 = vmatmul.mubr.msk.bf16.gmra.mxu0 %vm2238_vm0, %v2142_v3 }
 0x1e1   : > { %v1564_v26 = vadd.f32 %v7180_v38, %v1563_v43  ;;  %v2026_v39 = vmax.f32 %v1572_v25, 0.0 }
 0x1e2   : > { %v5774_v8 = vpop.f32.mrf.mxu1  ;;  %5869 = vmatmul.mubr.bf16.gmra.mxu1 %v1386_v52 }
 0x1e3   : > { %v2024_v14 = vmax.f32 %v1564_v26, 0.0  ;;  %5872 = vmatprep.mubr.bf16.mxu1 %v1387_v37  ;;  %v2144_v18 = vpack.c.bf16 %v2026_v39, %v2025_v40  ;;  %v1585_v30 = vadd.f32 %v5774_v8, %v7180_v38 }
 0x1e4   : > { %v1576_v17 = vpop.f32.mrf.mxu1 }
 0x1e5   : > { %v2143_v47 = vpack.c.bf16 %v2024_v14, %v2023_v33  ;;  %v1577_v22 = vadd.f32 %v7180_v38, %v1576_v17  ;;  %v2029_v45 = vmax.f32 %v1585_v30, 0.0 }
 0x1e6   : > { %v5775_v4 = vpop.f32.mrf.mxu1 }
 0x1e7   : > { %v1588_v13 = vadd.f32 %v5775_v4, %v7180_v38  ;;  %5904 = vmatprep.mubr.msk.bf16.mxu0 %vm2238_vm0, %v2143_v47  ;;  %v2027_v10 = vmax.f32 %v1577_v22, 0.0 }
 0x1e8   : > { %v1579_v1 = vpop.f32.mrf.mxu1  ;;  %5905 = vmatmul.mubr.msk.bf16.gmra.mxu0 %vm2238_vm0, %v2144_v18  ;;  %v6345_v18 = vld [vmem:[%s8080_s9 + $0x30] sm:$0xff]  }
 0x1e9   : > { %v1580_v6 = vadd.f32 %v7180_v38, %v1579_v1  ;;  %v2030_v32 = vmax.f32 %v1588_v13, 0.0  ;;  %6154 = vmatprep.subr.bf16.mxu0 %v6345_v18 }
 0x1ea   : > { %v5778_v9 = vpop.f32.mrf.mxu1  ;;  %5873 = vmatmul.mubr.bf16.gmra.mxu1 %v1388_v16  ;;  %6155 = vmatpush3.bf16.msra.mxu0 %v6345_v18 }
 0x1eb   : > { %v2028_v31 = vmax.f32 %v1580_v6, 0.0  ;;  %5876 = vmatprep.mubr.bf16.mxu1 %v1389_v36  ;;  %v2146_v27 = vpack.c.bf16 %v2030_v32, %v2029_v45  ;;  %v1601_v61 = vadd.f32 %v5778_v9, %v7180_v38 }
 0x1ec   : > { %v1592_v42 = vpop.f32.mrf.mxu1 }
 0x1ed   : > { %v2145_v58 = vpack.c.bf16 %v2028_v31, %v2027_v10  ;;  %v1593_v60 = vadd.f32 %v7180_v38, %v1592_v42  ;;  %v2033_v53 = vmax.f32 %v1601_v61, 0.0 }
 0x1ee   : > { %v5779_v2 = vpop.f32.mrf.mxu1 }
 0x1ef   : > { %v1604_v7 = vadd.f32 %v5779_v2, %v7180_v38  ;;  %5908 = vmatprep.mubr.msk.bf16.mxu0 %vm2238_vm0, %v2145_v58  ;;  %v2031_v44 = vmax.f32 %v1593_v60, 0.0 }
 0x1f0   : > { %v1595_v23 = vpop.f32.mrf.mxu1  ;;  %5909 = vmatmul.mubr.msk.bf16.gmra.mxu0 %vm2238_vm0, %v2146_v27 }
 0x1f1   : > { %v1596_v29 = vadd.f32 %v7180_v38, %v1595_v23  ;;  %v2034_v48 = vmax.f32 %v1604_v7, 0.0 }
 0x1f2   : > { %v5782_v28 = vpop.f32.mrf.mxu1  ;;  %5877 = vmatmul.mubr.bf16.gmra.mxu1 %v1390_v20 }
 0x1f3   : > { %v2032_v59 = vmax.f32 %v1596_v29, 0.0  ;;  %v2148_v62 = vpack.c.bf16 %v2034_v48, %v2033_v53  ;;  %v1617_v15 = vadd.f32 %v5782_v28, %v7180_v38 }
 0x1f4   : > { %v1608_v55 = vpop.f32.mrf.mxu1 }
 0x1f5   : > { %v2147_v51 = vpack.c.bf16 %v2032_v59, %v2031_v44  ;;  %v1609_v34 = vadd.f32 %v7180_v38, %v1608_v55  ;;  %v2037_v43 = vmax.f32 %v1617_v15, 0.0 }
 0x1f6   : > { %v5783_v24 = vpop.f32.mrf.mxu1 }
 0x1f7   : > { %v1620_v3 = vadd.f32 %v5783_v24, %v7180_v38  ;;  %5912 = vmatprep.mubr.msk.bf16.mxu0 %vm2238_vm0, %v2147_v51  ;;  %v2035_v41 = vmax.f32 %v1609_v34, 0.0 }
 0x1f8   : > { %v1611_v19 = vpop.f32.mrf.mxu1  ;;  %5913 = vmatmul.mubr.msk.bf16.gmra.mxu0 %vm2238_vm0, %v2148_v62 }
 0x1f9   : > { %v1612_v25 = vadd.f32 %v7180_v38, %v1611_v19  ;;  %v2038_v52 = vmax.f32 %v1620_v3, 0.0 }
 0x1fa   : > { %v5786_v0 = vpop.f32.mrf.mxu1 }
 0x1fb   : > { %v2036_v57 = vmax.f32 %v1612_v25, 0.0  ;;  %v2150_v26 = vpack.c.bf16 %v2038_v52, %v2037_v43  ;;  %v1633_v33 = vadd.f32 %v5786_v0, %v7180_v38 }
 0x1fc   : > { %v1624_v21 = vpop.f32.mrf.mxu1 }
 0x1fd   : > { %v2149_v12 = vpack.c.bf16 %v2036_v57, %v2035_v41  ;;  %v1625_v39 = vadd.f32 %v7180_v38, %v1624_v21  ;;  %v2041_v56 = vmax.f32 %v1633_v33, 0.0 }
 0x1fe   : > { %v5787_v37 = vpop.f32.mrf.mxu1 }
 0x1ff   : > { %v1636_v8 = vadd.f32 %v5787_v37, %v7180_v38  ;;  %5916 = vmatprep.mubr.msk.bf16.mxu0 %vm2238_vm0, %v2149_v12  ;;  %v2039_v17 = vmax.f32 %v1625_v39, 0.0 }
 0x200   : > { %v1627_v14 = vpop.f32.mrf.mxu1  ;;  %5917 = vmatmul.mubr.msk.bf16.gmra.mxu0 %vm2238_vm0, %v2150_v26 }
 0x201   : > { %v1628_v50 = vadd.f32 %v7180_v38, %v1627_v14  ;;  %v2042_v54 = vmax.f32 %v1636_v8, 0.0 }
 0x202   : > { %v5790_v40 = vpop.f32.mrf.mxu1 }
 0x203   : > { %v2040_v46 = vmax.f32 %v1628_v50, 0.0  ;;  %v2152_v4 = vpack.c.bf16 %v2042_v54, %v2041_v56  ;;  %v1649_v5 = vadd.f32 %v5790_v40, %v7180_v38 }
 0x204   : > { %v1640_v47 = vpop.f32.mrf.mxu1 }
 0x205   : > { %v2151_v11 = vpack.c.bf16 %v2040_v46, %v2039_v17  ;;  %v1641_v13 = vadd.f32 %v7180_v38, %v1640_v47  ;;  %v2045_v9 = vmax.f32 %v1649_v5, 0.0  ;;  %v6346_v46 = vld [vmem:[%s8080_s9 + $0x28] sm:$0xff]  }
 0x206   : > { %v5791_v22 = vpop.f32.mrf.mxu1  ;;  %6156 = vmatprep.subr.bf16.mxu0 %v6346_v46 }
 0x207   : > { %v1652_v16 = vadd.f32 %v5791_v22, %v7180_v38  ;;  %5920 = vmatprep.mubr.msk.bf16.mxu0 %vm2238_vm0, %v2151_v11  ;;  %v2043_v36 = vmax.f32 %v1641_v13, 0.0  ;;  %6157 = vmatpush3.bf16.msra.mxu0 %v6346_v46 }
 0x208   : > { %v1643_v63 = vpop.f32.mrf.mxu1  ;;  %5921 = vmatmul.mubr.msk.bf16.gmra.mxu0 %vm2238_vm0, %v2152_v4 }
 0x209   : > { %v1644_v30 = vadd.f32 %v7180_v38, %v1643_v63  ;;  %v2046_v1 = vmax.f32 %v1652_v16, 0.0 }
 0x20a   : > { %v5794_v6 = vpop.f32.mrf.mxu1 }
 0x20b   : > { %v2044_v32 = vmax.f32 %v1644_v30, 0.0  ;;  %v2154_v49 = vpack.c.bf16 %v2046_v1, %v2045_v9  ;;  %v1665_v58 = vadd.f32 %v5794_v6, %v7180_v38 }
 0x20c   : > { %v1656_v10 = vpop.f32.mrf.mxu1 }
 0x20d   : > { %v2153_v31 = vpack.c.bf16 %v2044_v32, %v2043_v36  ;;  %v1657_v45 = vadd.f32 %v7180_v38, %v1656_v10  ;;  %v2049_v23 = vmax.f32 %v1665_v58, 0.0 }
 0x20e   : > { %v5795_v35 = vpop.f32.mrf.mxu1 }
 0x20f   : > { %v1668_v42 = vadd.f32 %v5795_v35, %v7180_v38  ;;  %5924 = vmatprep.mubr.msk.bf16.mxu0 %vm2238_vm0, %v2153_v31  ;;  %v2047_v20 = vmax.f32 %v1657_v45, 0.0 }
 0x210   : > { %v1659_v27 = vpop.f32.mrf.mxu1  ;;  %5925 = vmatmul.mubr.msk.bf16.gmra.mxu0 %vm2238_vm0, %v2154_v49 }
 0x211   : > { %v1660_v2 = vadd.f32 %v7180_v38, %v1659_v27  ;;  %v2050_v60 = vmax.f32 %v1668_v42, 0.0 }
 0x212   : > { %v5798_v7 = vpop.f32.mrf.mxu1 }
 0x213   : > { %v2048_v61 = vmax.f32 %v1660_v2, 0.0  ;;  %v2156_v28 = vpack.c.bf16 %v2050_v60, %v2049_v23  ;;  %v1681_v55 = vadd.f32 %v5798_v7, %v7180_v38 }
 0x214   : > { %v1672_v29 = vpop.f32.mrf.mxu1 }
 0x215   : > { %v2155_v48 = vpack.c.bf16 %v2048_v61, %v2047_v20  ;;  %v1673_v59 = vadd.f32 %v7180_v38, %v1672_v29  ;;  %v2053_v19 = vmax.f32 %v1681_v55, 0.0 }
 0x216   : > { %v5799_v44 = vpop.f32.mrf.mxu1 }
 0x217   : > { %v1684_v53 = vadd.f32 %v5799_v44, %v7180_v38  ;;  %5928 = vmatprep.mubr.msk.bf16.mxu0 %vm2238_vm0, %v2155_v48  ;;  %v2051_v3 = vmax.f32 %v1673_v59, 0.0 }
 0x218   : > { %v1675_v51 = vpop.f32.mrf.mxu1  ;;  %5929 = vmatmul.mubr.msk.bf16.gmra.mxu0 %vm2238_vm0, %v2156_v28 }
 0x219   : > { %v1676_v62 = vadd.f32 %v7180_v38, %v1675_v51  ;;  %v2054_v24 = vmax.f32 %v1684_v53, 0.0 }
 0x21a   : > { %v5802_v34 = vpop.f32.mrf.mxu1 }
 0x21b   : > { %v2052_v15 = vmax.f32 %v1676_v62, 0.0  ;;  %v2158_v0 = vpack.c.bf16 %v2054_v24, %v2053_v19  ;;  %v1697_v21 = vadd.f32 %v5802_v34, %v7180_v38 }
 0x21c   : > { %v1688_v25 = vpop.f32.mrf.mxu1 }
 0x21d   : > { %v2157_v52 = vpack.c.bf16 %v2052_v15, %v2051_v3  ;;  %v1689_v57 = vadd.f32 %v7180_v38, %v1688_v25  ;;  %v2057_v14 = vmax.f32 %v1697_v21, 0.0 }
 0x21e   : > { %v5803_v41 = vpop.f32.mrf.mxu1 }
 0x21f   : > { %v1700_v43 = vadd.f32 %v5803_v41, %v7180_v38  ;;  %5932 = vmatprep.mubr.msk.bf16.mxu0 %vm2238_vm0, %v2157_v52  ;;  %v2055_v8 = vmax.f32 %v1689_v57, 0.0 }
 0x220   : > { %v1691_v12 = vpop.f32.mrf.mxu1  ;;  %5933 = vmatmul.mubr.msk.bf16.gmra.mxu0 %vm2238_vm0, %v2158_v0 }
 0x221   : > { %v1692_v26 = vadd.f32 %v7180_v38, %v1691_v12  ;;  %v2058_v37 = vmax.f32 %v1700_v43, 0.0 }
 0x222   : > { %v5806_v39 = vpop.f32.mrf.mxu1 }
 0x223   : > { %v2056_v33 = vmax.f32 %v1692_v26, 0.0  ;;  %v2160_v40 = vpack.c.bf16 %v2058_v37, %v2057_v14  ;;  %v1713_v11 = vadd.f32 %v5806_v39, %v7180_v38  ;;  %v6347_v39 = vld [vmem:[%s8080_s9 + $0x20] sm:$0xff]  }
 0x224   : > { %v1704_v50 = vpop.f32.mrf.mxu1  ;;  %6158 = vmatprep.subr.bf16.mxu0 %v6347_v39 }
 0x225   : > { %v2159_v54 = vpack.c.bf16 %v2056_v33, %v2055_v8  ;;  %v1705_v56 = vadd.f32 %v7180_v38, %v1704_v50  ;;  %v2061_v63 = vmax.f32 %v1713_v11, 0.0  ;;  %6159 = vmatpush3.bf16.msra.mxu0 %v6347_v39 }
 0x226   : > { %v5807_v17 = vpop.f32.mrf.mxu1 }
 0x227   : > { %v1716_v47 = vadd.f32 %v5807_v17, %v7180_v38  ;;  %5936 = vmatprep.mubr.msk.bf16.mxu0 %vm2238_vm0, %v2159_v54  ;;  %v2059_v16 = vmax.f32 %v1705_v56, 0.0 }
 0x228   : > { %v1707_v18 = vpop.f32.mrf.mxu1  ;;  %5937 = vmatmul.mubr.msk.bf16.gmra.mxu0 %vm2238_vm0, %v2160_v40 }
 0x229   : > { %v1708_v4 = vadd.f32 %v7180_v38, %v1707_v18  ;;  %v2062_v22 = vmax.f32 %v1716_v47, 0.0 }
 0x22a   : > { %v5810_v13 = vpop.f32.mrf.mxu1 }
 0x22b   : > { %v2060_v5 = vmax.f32 %v1708_v4, 0.0  ;;  %v2162_v6 = vpack.c.bf16 %v2062_v22, %v2061_v63  ;;  %v1729_v10 = vadd.f32 %v5810_v13, %v7180_v38 }
 0x22c   : > { %v1720_v30 = vpop.f32.mrf.mxu1 }
 0x22d   : > { %v2161_v1 = vpack.c.bf16 %v2060_v5, %v2059_v16  ;;  %v1721_v32 = vadd.f32 %v7180_v38, %v1720_v30  ;;  %v2065_v27 = vmax.f32 %v1729_v10, 0.0 }
 0x22e   : > { %v5811_v36 = vpop.f32.mrf.mxu1 }
 0x22f   : > { %v1732_v9 = vadd.f32 %v5811_v36, %v7180_v38  ;;  %5940 = vmatprep.mubr.msk.bf16.mxu0 %vm2238_vm0, %v2161_v1  ;;  %v2063_v42 = vmax.f32 %v1721_v32, 0.0 }
 0x230   : > { %v1723_v31 = vpop.f32.mrf.mxu1  ;;  %5941 = vmatmul.mubr.msk.bf16.gmra.mxu0 %vm2238_vm0, %v2162_v6 }
 0x231   : > { %v1724_v49 = vadd.f32 %v7180_v38, %v1723_v31  ;;  %v2066_v35 = vmax.f32 %v1732_v9, 0.0 }
 0x232   : > { %v5814_v45 = vpop.f32.mrf.mxu1 }
 0x233   : > { %v2064_v58 = vmax.f32 %v1724_v49, 0.0  ;;  %v2164_v7 = vpack.c.bf16 %v2066_v35, %v2065_v27  ;;  %v1745_v29 = vadd.f32 %v5814_v45, %v7180_v38 }
 0x234   : > { %v1736_v2 = vpop.f32.mrf.mxu1 }
 0x235   : > { %v2163_v60 = vpack.c.bf16 %v2064_v58, %v2063_v42  ;;  %v1737_v61 = vadd.f32 %v7180_v38, %v1736_v2  ;;  %v2069_v51 = vmax.f32 %v1745_v29, 0.0 }
 0x236   : > { %v5815_v20 = vpop.f32.mrf.mxu1 }
 0x237   : > { %v1748_v23 = vadd.f32 %v5815_v20, %v7180_v38  ;;  %5944 = vmatprep.mubr.msk.bf16.mxu0 %vm2238_vm0, %v2163_v60  ;;  %v2067_v53 = vmax.f32 %v1737_v61, 0.0 }
 0x238   : > { %v1739_v48 = vpop.f32.mrf.mxu1  ;;  %5945 = vmatmul.mubr.msk.bf16.gmra.mxu0 %vm2238_vm0, %v2164_v7 }
 0x239   : > { %v1740_v28 = vadd.f32 %v7180_v38, %v1739_v48  ;;  %v2070_v44 = vmax.f32 %v1748_v23, 0.0 }
 0x23a   : > { %v5818_v59 = vpop.f32.mrf.mxu1 }
 0x23b   : > { %v2068_v55 = vmax.f32 %v1740_v28, 0.0  ;;  %v2166_v34 = vpack.c.bf16 %v2070_v44, %v2069_v51  ;;  %v1761_v25 = vadd.f32 %v5818_v59, %v7180_v38 }
 0x23c   : > { %v1752_v62 = vpop.f32.mrf.mxu1 }
 0x23d   : > { %v2165_v24 = vpack.c.bf16 %v2068_v55, %v2067_v53  ;;  %v1753_v15 = vadd.f32 %v7180_v38, %v1752_v62  ;;  %v2073_v12 = vmax.f32 %v1761_v25, 0.0 }
 0x23e   : > { %v5819_v3 = vpop.f32.mrf.mxu1 }
 0x23f   : > { %v1764_v19 = vadd.f32 %v5819_v3, %v7180_v38  ;;  %5948 = vmatprep.mubr.msk.bf16.mxu0 %vm2238_vm0, %v2165_v24  ;;  %v2071_v43 = vmax.f32 %v1753_v15, 0.0 }
 0x240   : > { %v1755_v52 = vpop.f32.mrf.mxu1  ;;  %5949 = vmatmul.mubr.msk.bf16.gmra.mxu0 %vm2238_vm0, %v2166_v34 }
 0x241   : > { %v1756_v0 = vadd.f32 %v7180_v38, %v1755_v52  ;;  %v2074_v41 = vmax.f32 %v1764_v19, 0.0 }
 0x242   : > { %v5822_v57 = vpop.f32.mrf.mxu1 }
 0x243   : > { %v2072_v21 = vmax.f32 %v1756_v0, 0.0  ;;  %v2168_v8 = vpack.c.bf16 %v2074_v41, %v2073_v12  ;;  %v1777_v54 = vadd.f32 %v5822_v57, %v7180_v38  ;;  %v6348_v57 = vld [vmem:[%s8080_s9 + $0x18] sm:$0xff]  }
 0x244   : > { %v1768_v26 = vpop.f32.mrf.mxu1  ;;  %6160 = vmatprep.subr.bf16.mxu0 %v6348_v57 }
 0x245   : > { %v2167_v37 = vpack.c.bf16 %v2072_v21, %v2071_v43  ;;  %v1769_v14 = vadd.f32 %v7180_v38, %v1768_v26  ;;  %v2077_v18 = vmax.f32 %v1777_v54, 0.0  ;;  %6161 = vmatpush3.bf16.msra.mxu0 %v6348_v57 }
 0x246   : > { %v5823_v33 = vpop.f32.mrf.mxu1 }
 0x247   : > { %v1780_v50 = vadd.f32 %v5823_v33, %v7180_v38  ;;  %5952 = vmatprep.mubr.msk.bf16.mxu0 %vm2238_vm0, %v2167_v37  ;;  %v2075_v47 = vmax.f32 %v1769_v14, 0.0 }
 0x248   : > { %v1771_v40 = vpop.f32.mrf.mxu1  ;;  %5953 = vmatmul.mubr.msk.bf16.gmra.mxu0 %vm2238_vm0, %v2168_v8 }
 0x249   : > { %v1772_v17 = vadd.f32 %v7180_v38, %v1771_v40  ;;  %v2078_v46 = vmax.f32 %v1780_v50, 0.0 }
 0x24a   : > { %v5826_v56 = vpop.f32.mrf.mxu1 }
 0x24b   : > { %v2076_v11 = vmax.f32 %v1772_v17, 0.0  ;;  %v2170_v13 = vpack.c.bf16 %v2078_v46, %v2077_v18  ;;  %v1793_v30 = vadd.f32 %v5826_v56, %v7180_v38 }
 0x24c   : > { %v1784_v4 = vpop.f32.mrf.mxu1 }
 0x24d   : > { %v2169_v22 = vpack.c.bf16 %v2076_v11, %v2075_v47  ;;  %v1785_v5 = vadd.f32 %v7180_v38, %v1784_v4  ;;  %v2081_v31 = vmax.f32 %v1793_v30, 0.0 }
 0x24e   : > { %v5827_v16 = vpop.f32.mrf.mxu1 }
 0x24f   : > { %v1796_v63 = vadd.f32 %v5827_v16, %v7180_v38  ;;  %5956 = vmatprep.mubr.msk.bf16.mxu0 %vm2238_vm0, %v2169_v22  ;;  %v2079_v9 = vmax.f32 %v1785_v5, 0.0 }
 0x250   : > { %v1787_v1 = vpop.f32.mrf.mxu1  ;;  %5957 = vmatmul.mubr.msk.bf16.gmra.mxu0 %vm2238_vm0, %v2170_v13 }
 0x251   : > { %v1788_v6 = vadd.f32 %v7180_v38, %v1787_v1  ;;  %v2082_v36 = vmax.f32 %v1796_v63, 0.0 }
 0x252   : > { %v5830_v32 = vpop.f32.mrf.mxu1 }
 0x253   : > { %v2080_v10 = vmax.f32 %v1788_v6, 0.0  ;;  %v2172_v45 = vpack.c.bf16 %v2082_v36, %v2081_v31  ;;  %v1809_v2 = vadd.f32 %v5830_v32, %v7180_v38 }
 0x254   : > { %v1800_v49 = vpop.f32.mrf.mxu1 }
 0x255   : > { %v2171_v35 = vpack.c.bf16 %v2080_v10, %v2079_v9  ;;  %v1801_v58 = vadd.f32 %v7180_v38, %v1800_v49  ;;  %v2085_v48 = vmax.f32 %v1809_v2, 0.0 }
 0x256   : > { %v5831_v42 = vpop.f32.mrf.mxu1 }
 0x257   : > { %v1812_v27 = vadd.f32 %v5831_v42, %v7180_v38  ;;  %5960 = vmatprep.mubr.msk.bf16.mxu0 %vm2238_vm0, %v2171_v35  ;;  %v2083_v23 = vmax.f32 %v1801_v58, 0.0 }
 0x258   : > { %v1803_v60 = vpop.f32.mrf.mxu1  ;;  %5961 = vmatmul.mubr.msk.bf16.gmra.mxu0 %vm2238_vm0, %v2172_v45 }
 0x259   : > { %v1804_v7 = vadd.f32 %v7180_v38, %v1803_v60  ;;  %v2086_v20 = vmax.f32 %v1812_v27, 0.0 }
 0x25a   : > { %v5834_v61 = vpop.f32.mrf.mxu1 }
 0x25b   : > { %v2084_v29 = vmax.f32 %v1804_v7, 0.0  ;;  %v2174_v59 = vpack.c.bf16 %v2086_v20, %v2085_v48  ;;  %v1825_v62 = vadd.f32 %v5834_v61, %v7180_v38 }
 0x25c   : > { %v1816_v28 = vpop.f32.mrf.mxu1 }
 0x25d   : > { %v2173_v44 = vpack.c.bf16 %v2084_v29, %v2083_v23  ;;  %v1817_v55 = vadd.f32 %v7180_v38, %v1816_v28  ;;  %v2089_v52 = vmax.f32 %v1825_v62, 0.0 }
 0x25e   : > { %v5835_v53 = vpop.f32.mrf.mxu1 }
 0x25f   : > { %v1828_v51 = vadd.f32 %v5835_v53, %v7180_v38  ;;  %5964 = vmatprep.mubr.msk.bf16.mxu0 %vm2238_vm0, %v2173_v44  ;;  %v2087_v19 = vmax.f32 %v1817_v55, 0.0 }
 0x260   : > { %v1819_v24 = vpop.f32.mrf.mxu1  ;;  %5965 = vmatmul.mubr.msk.bf16.gmra.mxu0 %vm2238_vm0, %v2174_v59 }
 0x261   : > { %v1820_v34 = vadd.f32 %v7180_v38, %v1819_v24  ;;  %v2090_v3 = vmax.f32 %v1828_v51, 0.0 }
 0x262   : > { %v5838_v15 = vpop.f32.mrf.mxu1 }
 0x263   : > { %v2088_v25 = vmax.f32 %v1820_v34, 0.0  ;;  %v2176_v43 = vpack.c.bf16 %v2090_v3, %v2089_v52  ;;  %v1841_v37 = vadd.f32 %v5838_v15, %v7180_v38  ;;  %v6349_v15 = vld [vmem:[%s8080_s9 + $0x10] sm:$0xff]  }
 0x264   : > { %v1832_v0 = vpop.f32.mrf.mxu1  ;;  %6162 = vmatprep.subr.bf16.mxu0 %v6349_v15 }
 0x265   : > { %v2175_v41 = vpack.c.bf16 %v2088_v25, %v2087_v19  ;;  %v1833_v12 = vadd.f32 %v7180_v38, %v1832_v0  ;;  %v2093_v40 = vmax.f32 %v1841_v37, 0.0  ;;  %6163 = vmatpush3.bf16.msra.mxu0 %v6349_v15 }
 0x266   : > { %v5839_v21 = vpop.f32.mrf.mxu1 }
 0x267   : > { %v1844_v26 = vadd.f32 %v5839_v21, %v7180_v38  ;;  %5968 = vmatprep.mubr.msk.bf16.mxu0 %vm2238_vm0, %v2175_v41  ;;  %v2091_v50 = vmax.f32 %v1833_v12, 0.0 }
 0x268   : > { %v1835_v39 = vpop.f32.mrf.mxu1  ;;  %5969 = vmatmul.mubr.msk.bf16.gmra.mxu0 %vm2238_vm0, %v2176_v43 }
 0x269   : > { %v1836_v8 = vadd.f32 %v7180_v38, %v1835_v39  ;;  %v2094_v33 = vmax.f32 %v1844_v26, 0.0 }
 0x26a   : > { %v5842_v14 = vpop.f32.mrf.mxu1 }
 0x26b   : > { %v2092_v54 = vmax.f32 %v1836_v8, 0.0  ;;  %v2178_v56 = vpack.c.bf16 %v2094_v33, %v2093_v40  ;;  %v1857_v4 = vadd.f32 %v5842_v14, %v7180_v38  ;;  %v7409_v33 = vld [vmem:[%s8077_s6] ss:$0 sm:$0xff] }
 0x26c   : > { %v1848_v17 = vpop.f32.mrf.mxu1 }
 0x26d   : > { %v2177_v46 = vpack.c.bf16 %v2092_v54, %v2091_v50  ;;  %v1849_v11 = vadd.f32 %v7180_v38, %v1848_v17  ;;  %v2097_v1 = vmax.f32 %v1857_v4, 0.0 }
 0x26e   : > { %v5843_v47 = vpop.f32.mrf.mxu1 }
 0x26f   : > { %v1860_v18 = vadd.f32 %v5843_v47, %v7180_v38  ;;  %5972 = vmatprep.mubr.msk.bf16.mxu0 %vm2238_vm0, %v2177_v46  ;;  %v2095_v63 = vmax.f32 %v1849_v11, 0.0 }
 0x270   : > { %v1851_v22 = vpop.f32.mrf.mxu1  ;;  %5973 = vmatmul.mubr.msk.bf16.gmra.mxu0 %vm2238_vm0, %v2178_v56 }
 0x271   : > { %v1852_v13 = vadd.f32 %v7180_v38, %v1851_v22  ;;  %v2098_v16 = vmax.f32 %v1860_v18, 0.0  ;;  %v7417_v18 = vld [vmem:[%s8075_s4] ss:$0 sm:$0xff] }
 0x272   : > { %v5846_v5 = vpop.f32.mrf.mxu1 }
 0x273   : > { %v2096_v30 = vmax.f32 %v1852_v13, 0.0  ;;  %v2180_v32 = vpack.c.bf16 %v2098_v16, %v2097_v1  ;;  %v1873_v49 = vadd.f32 %v5846_v5, %v7180_v38 }
 0x274   : > { %v1864_v6 = vpop.f32.mrf.mxu1 }
 0x275   : > { %v2179_v36 = vpack.c.bf16 %v2096_v30, %v2095_v63  ;;  %v1865_v10 = vadd.f32 %v7180_v38, %v1864_v6  ;;  %v2101_v60 = vmax.f32 %v1873_v49, 0.0 }
 0x276   : > { %v5847_v9 = vpop.f32.mrf.mxu1 }
 0x277   : > { %v1876_v31 = vadd.f32 %v5847_v9, %v7180_v38  ;;  %5976 = vmatprep.mubr.msk.bf16.mxu0 %vm2238_vm0, %v2179_v36  ;;  %v2099_v27 = vmax.f32 %v1865_v10, 0.0 }
 0x278   : > { %v1867_v35 = vpop.f32.mrf.mxu1  ;;  %5977 = vmatmul.mubr.msk.bf16.gmra.mxu0 %vm2238_vm0, %v2180_v32 }
 0x279   : > { %v1868_v45 = vadd.f32 %v7180_v38, %v1867_v35  ;;  %v2102_v42 = vmax.f32 %v1876_v31, 0.0 }
 0x27a   : > { %v5850_v58 = vpop.f32.mrf.mxu1 }
 0x27b   : > { %v2100_v2 = vmax.f32 %v1868_v45, 0.0  ;;  %v2182_v61 = vpack.c.bf16 %v2102_v42, %v2101_v60  ;;  %v1889_v28 = vadd.f32 %v5850_v58, %v7180_v38 }
 0x27c   : > { %v1880_v7 = vpop.f32.mrf.mxu1 }
 0x27d   : > { %v2181_v20 = vpack.c.bf16 %v2100_v2, %v2099_v27  ;;  %v1881_v29 = vadd.f32 %v7180_v38, %v1880_v7  ;;  %v2105_v24 = vmax.f32 %v1889_v28, 0.0 }
 0x27e   : > { %v5851_v23 = vpop.f32.mrf.mxu1 }
 0x27f   : > { %v1892_v48 = vadd.f32 %v5851_v23, %v7180_v38  ;;  %5980 = vmatprep.mubr.msk.bf16.mxu0 %vm2238_vm0, %v2181_v20  ;;  %v2103_v51 = vmax.f32 %v1881_v29, 0.0 }
 0x280   : > { %v1883_v44 = vpop.f32.mrf.mxu1  ;;  %5981 = vmatmul.mubr.msk.bf16.gmra.mxu0 %vm2238_vm0, %v2182_v61 }
 0x281   : > { %v1884_v59 = vadd.f32 %v7180_v38, %v1883_v44  ;;  %v2106_v53 = vmax.f32 %v1892_v48, 0.0 }
 0x282   : > { %v5854_v55 = vpop.f32.mrf.mxu1 }
 0x283   : > { %v2104_v62 = vmax.f32 %v1884_v59, 0.0  ;;  %v2184_v19 = vpack.c.bf16 %v2106_v53, %v2105_v24  ;;  %v1905_v41 = vadd.f32 %v5854_v55, %v7180_v38 }
 0x284   : > { %v1896_v34 = vpop.f32.mrf.mxu1 }
 0x285   : > { %v2183_v3 = vpack.c.bf16 %v2104_v62, %v2103_v51  ;;  %v1897_v52 = vadd.f32 %v7180_v38, %v1896_v34  ;;  %v2109_v14 = vmax.f32 %v1905_v41, 0.0 }
 0x286   : > { %v5855_v25 = vpop.f32.mrf.mxu1 }
 0x287   : > { %v1908_v0 = vadd.f32 %v5855_v25, %v7180_v38  ;;  %5984 = vmatprep.mubr.msk.bf16.mxu0 %vm2238_vm0, %v2183_v3  ;;  %v2107_v39 = vmax.f32 %v1897_v52, 0.0 }
 0x288   : > { %v1899_v57 = vpop.f32.mrf.mxu1  ;;  %v5890_v43 = vpop.f32.mrf.mxu0  ;;  %5985 = vmatmul.mubr.msk.bf16.gmra.mxu0 %vm2238_vm0, %v2184_v19 }
 0x289   : > { %v1900_v21 = vadd.f32 %v7180_v38, %v1899_v57  ;;  %v2110_v12 = vmax.f32 %v1908_v0, 0.0  ;;  %v2474_v56 = vadd.f32 %v5890_v43, %v7409_v33 }
 0x28a   : > { %v5858_v26 = vpop.f32.mrf.mxu1  ;;  %v2465_v37 = vpop.f32.mrf.mxu0 }
 0x28b   : > { %v2108_v8 = vmax.f32 %v1900_v21, 0.0  ;;  %v2466_v17 = vadd.f32 %v7409_v33, %v2465_v37  ;;  %v2186_v38 = vpack.c.bf16 %v2110_v12, %v2109_v14  ;;  %v1921_v16 = vadd.f32 %v7417_v18, %v5858_v26 }
 0x28c   : > { %v1912_v50 = vpop.f32.mrf.mxu1  ;;  %v5891_v54 = vpop.f32.mrf.mxu0  ;;  %v2978_v32 = vmax.f32 %v2474_v56, 0.0 }
 0x28d   : > { %v2185_v40 = vpack.c.bf16 %v2108_v8, %v2107_v39  ;;  %v2477_v46 = vadd.f32 %v5891_v54, %v7409_v33  ;;  %v1913_v4 = vadd.f32 %v7417_v18, %v1912_v50  ;;  %v2976_v1 = vmax.f32 %v2466_v17, 0.0 }
 0x28e   : > { %v5859_v47 = vpop.f32.mrf.mxu1  ;;  %v2468_v11 = vpop.f32.mrf.mxu0  ;;  %v2113_v42 = vmax.f32 %v1921_v16, 0.0 }
 0x28f   : > { %v1924_v22 = vadd.f32 %v7417_v18, %v5859_v47  ;;  %v2469_v13 = vadd.f32 %v7409_v33, %v2468_v11  ;;  %5988 = vmatprep.mubr.msk.bf16.mxu0 %vm2238_vm0, %v2185_v40  ;;  %v2979_v5 = vmax.f32 %v2477_v46, 0.0  ;;  %v2111_v49 = vmax.f32 %v1913_v4, 0.0 }
 0x290   : > { %v1915_v63 = vpop.f32.mrf.mxu1  ;;  %v5894_v30 = vpop.f32.mrf.mxu0  ;;  %5989 = vmatmul.mubr.msk.bf16.gmra.mxu0 %vm2238_vm0, %v2186_v38 }
 0x291   : > { %v2977_v6 = vmax.f32 %v2469_v13, 0.0  ;;  %v1916_v36 = vadd.f32 %v7417_v18, %v1915_v63  ;;  %v2114_v9 = vmax.f32 %v1924_v22, 0.0  ;;  %v3105_v58 = vpack.c.bf16 %v2979_v5, %v2978_v32 }
 0x292   : > { %v5862_v10 = vpop.f32.mrf.mxu1  ;;  %v2481_v31 = vpop.f32.mrf.mxu0  ;;  %v2490_v23 = vadd.f32 %v5894_v30, %v7409_v33 }
 0x293   : > { %v3104_v35 = vpack.c.bf16 %v2977_v6, %v2976_v1  ;;  %v2112_v45 = vmax.f32 %v1916_v36, 0.0  ;;  %v2482_v7 = vadd.f32 %v7409_v33, %v2481_v31  ;;  %v2188_v61 = vpack.c.bf16 %v2114_v9, %v2113_v42 }
 0x294   : > { %v1928_v27 = vpop.f32.mrf.mxu1  ;;  %v5895_v2 = vpop.f32.mrf.mxu0  ;;  %v1937_v53 = vadd.f32 %v7417_v18, %v5862_v10  ;;  %v2982_v15 = vmax.f32 %v2490_v23, 0.0 }
 0x295   : > { %v2187_v60 = vpack.c.bf16 %v2112_v45, %v2111_v49  ;;  %v2493_v20 = vadd.f32 %v5895_v2, %v7409_v33  ;;  %6024 = vmatprep.mubr.msk.bf16.mxu1 %vm2238_vm0, %v3104_v35  ;;  %v1929_v28 = vadd.f32 %v7417_v18, %v1928_v27  ;;  %v2980_v24 = vmax.f32 %v2482_v7, 0.0 }
 0x296   : > { %v5863_v29 = vpop.f32.mrf.mxu1  ;;  %v2484_v48 = vpop.f32.mrf.mxu0  ;;  %6025 = vmatmul.mubr.msk.bf16.vlgmr.msra.gmra.mxu1 %vm2238_vm0, %v3105_v58  ;;  %v2117_v43 = vmax.f32 %v1937_v53, 0.0  ;;  %v6350_v58 = vld [vmem:[%s8080_s9 + $0x8] sm:$0xff]  }
 0x297   : > { %v1940_v44 = vadd.f32 %v7417_v18, %v5863_v29  ;;  %v2485_v59 = vadd.f32 %v7409_v33, %v2484_v48  ;;  %5992 = vmatprep.mubr.msk.bf16.mxu0 %vm2238_vm0, %v2187_v60  ;;  %v2983_v55 = vmax.f32 %v2493_v20, 0.0  ;;  %v2115_v0 = vmax.f32 %v1929_v28, 0.0  ;;  %6164 = vmatprep.subr.bf16.mxu0 %v6350_v58 }
 0x298   : > { %v1931_v51 = vpop.f32.mrf.mxu1  ;;  %v5898_v62 = vpop.f32.mrf.mxu0  ;;  %5993 = vmatmul.mubr.msk.bf16.gmra.mxu0 %vm2238_vm0, %v2188_v61 }
 0x299   : > { %v2981_v34 = vmax.f32 %v2485_v59, 0.0  ;;  %v1932_v3 = vadd.f32 %v7417_v18, %v1931_v51  ;;  %v2118_v19 = vmax.f32 %v1940_v44, 0.0  ;;  %v3107_v21 = vpack.c.bf16 %v2983_v55, %v2982_v15  ;;  %6165 = vmatpush3.bf16.msra.mxu0 %v6350_v58 }
 0x29a   : > { %v5866_v25 = vpop.f32.mrf.mxu1  ;;  %v2497_v52 = vpop.f32.mrf.mxu0  ;;  %v2506_v50 = vadd.f32 %v5898_v62, %v7409_v33 }
 0x29b   : > { %v3106_v41 = vpack.c.bf16 %v2981_v34, %v2980_v24  ;;  %v2116_v57 = vmax.f32 %v1932_v3, 0.0  ;;  %v2498_v39 = vadd.f32 %v7409_v33, %v2497_v52  ;;  %v2190_v14 = vpack.c.bf16 %v2118_v19, %v2117_v43 }
 0x29c   : > { %v1944_v12 = vpop.f32.mrf.mxu1  ;;  %v5899_v26 = vpop.f32.mrf.mxu0  ;;  %v1953_v56 = vadd.f32 %v7417_v18, %v5866_v25  ;;  %v2986_v5 = vmax.f32 %v2506_v50, 0.0 }
 0x29d   : > { %v2189_v37 = vpack.c.bf16 %v2116_v57, %v2115_v0  ;;  %v2509_v8 = vadd.f32 %v5899_v26, %v7409_v33  ;;  %6028 = vmatprep.mubr.msk.bf16.mxu1 %vm2238_vm0, %v3106_v41  ;;  %v1945_v17 = vadd.f32 %v7417_v18, %v1944_v12  ;;  %v2984_v22 = vmax.f32 %v2498_v39, 0.0 }
 0x29e   : > { %v5867_v54 = vpop.f32.mrf.mxu1  ;;  %v2500_v40 = vpop.f32.mrf.mxu0  ;;  %6029 = vmatmul.mubr.msk.bf16.gmra.mxu1 %vm2238_vm0, %v3107_v21  ;;  %v2121_v9 = vmax.f32 %v1953_v56, 0.0 }
 0x29f   : > { %v1956_v46 = vadd.f32 %v7417_v18, %v5867_v54  ;;  %v2501_v38 = vadd.f32 %v7409_v33, %v2500_v40  ;;  %5996 = vmatprep.mubr.msk.bf16.mxu0 %vm2238_vm0, %v2189_v37  ;;  %v2987_v47 = vmax.f32 %v2509_v8, 0.0  ;;  %v2119_v6 = vmax.f32 %v1945_v17, 0.0 }
 0x2a0   : > { %v1947_v11 = vpop.f32.mrf.mxu1  ;;  %v5902_v4 = vpop.f32.mrf.mxu0  ;;  %5997 = vmatmul.mubr.msk.bf16.gmra.mxu0 %vm2238_vm0, %v2190_v14 }
 0x2a1   : > { %v2985_v13 = vmax.f32 %v2501_v38, 0.0  ;;  %v1948_v16 = vadd.f32 %v7417_v18, %v1947_v11  ;;  %v2122_v63 = vmax.f32 %v1956_v46, 0.0  ;;  %v3109_v10 = vpack.c.bf16 %v2987_v47, %v2986_v5 }
 0x2a2   : > { %v5870_v30 = vpop.f32.mrf.mxu1  ;;  %v2513_v1 = vpop.f32.mrf.mxu0  ;;  %v2522_v2 = vadd.f32 %v5902_v4, %v7409_v33 }
 0x2a3   : > { %v3108_v36 = vpack.c.bf16 %v2985_v13, %v2984_v22  ;;  %v2120_v32 = vmax.f32 %v1948_v16, 0.0  ;;  %v2514_v45 = vadd.f32 %v7409_v33, %v2513_v1  ;;  %v2192_v27 = vpack.c.bf16 %v2122_v63, %v2121_v9 }
 0x2a4   : > { %v1960_v31 = vpop.f32.mrf.mxu1  ;;  %v5903_v49 = vpop.f32.mrf.mxu0  ;;  %v1969_v29 = vadd.f32 %v7417_v18, %v5870_v30  ;;  %v2990_v51 = vmax.f32 %v2522_v2, 0.0 }
 0x2a5   : > { %v2191_v35 = vpack.c.bf16 %v2120_v32, %v2119_v6  ;;  %v2525_v42 = vadd.f32 %v5903_v49, %v7409_v33  ;;  %6032 = vmatprep.mubr.msk.bf16.mxu1 %vm2238_vm0, %v3108_v36  ;;  %v1961_v20 = vadd.f32 %v7417_v18, %v1960_v31  ;;  %v2988_v59 = vmax.f32 %v2514_v45, 0.0 }
 0x2a6   : > { %v5871_v60 = vpop.f32.mrf.mxu1  ;;  %v2516_v7 = vpop.f32.mrf.mxu0  ;;  %6033 = vmatmul.mubr.msk.bf16.gmra.mxu1 %vm2238_vm0, %v3109_v10  ;;  %v2125_v25 = vmax.f32 %v1969_v29, 0.0 }
 0x2a7   : > { %v1972_v61 = vadd.f32 %v7417_v18, %v5871_v60  ;;  %v2517_v23 = vadd.f32 %v7409_v33, %v2516_v7  ;;  %6000 = vmatprep.mubr.msk.bf16.mxu0 %vm2238_vm0, %v2191_v35  ;;  %v2991_v48 = vmax.f32 %v2525_v42, 0.0  ;;  %v2123_v3 = vmax.f32 %v1961_v20, 0.0 }
 0x2a8   : > { %v1963_v28 = vpop.f32.mrf.mxu1  ;;  %v5906_v44 = vpop.f32.mrf.mxu0  ;;  %6001 = vmatmul.mubr.msk.bf16.gmra.mxu0 %vm2238_vm0, %v2192_v27 }
 0x2a9   : > { %v2989_v53 = vmax.f32 %v2517_v23, 0.0  ;;  %v1964_v55 = vadd.f32 %v7417_v18, %v1963_v28  ;;  %v2126_v62 = vmax.f32 %v1972_v61, 0.0  ;;  %v3111_v52 = vpack.c.bf16 %v2991_v48, %v2990_v51 }
 0x2aa   : > { %v5874_v24 = vpop.f32.mrf.mxu1  ;;  %v2529_v34 = vpop.f32.mrf.mxu0  ;;  %v2538_v26 = vadd.f32 %v5906_v44, %v7409_v33 }
 0x2ab   : > { %v3110_v15 = vpack.c.bf16 %v2989_v53, %v2988_v59  ;;  %v2124_v19 = vmax.f32 %v1964_v55, 0.0  ;;  %v2530_v43 = vadd.f32 %v7409_v33, %v2529_v34  ;;  %v2194_v12 = vpack.c.bf16 %v2126_v62, %v2125_v25 }
 0x2ac   : > { %v1976_v0 = vpop.f32.mrf.mxu1  ;;  %v5907_v41 = vpop.f32.mrf.mxu0  ;;  %v1985_v54 = vadd.f32 %v7417_v18, %v5874_v24  ;;  %v2994_v11 = vmax.f32 %v2538_v26, 0.0 }
 0x2ad   : > { %v2193_v57 = vpack.c.bf16 %v2124_v19, %v2123_v3  ;;  %v2541_v21 = vadd.f32 %v5907_v41, %v7409_v33  ;;  %6036 = vmatprep.mubr.msk.bf16.mxu1 %vm2238_vm0, %v3110_v15  ;;  %v1977_v8 = vadd.f32 %v7417_v18, %v1976_v0  ;;  %v2992_v38 = vmax.f32 %v2530_v43, 0.0 }
 0x2ae   : > { %v5875_v37 = vpop.f32.mrf.mxu1  ;;  %v2532_v39 = vpop.f32.mrf.mxu0  ;;  %6037 = vmatmul.mubr.msk.bf16.gmra.mxu1 %vm2238_vm0, %v3111_v52  ;;  %v2129_v30 = vmax.f32 %v1985_v54, 0.0 }
 0x2af   : > { %v1988_v14 = vadd.f32 %v7417_v18, %v5875_v37  ;;  %v2533_v50 = vadd.f32 %v7409_v33, %v2532_v39  ;;  %6004 = vmatprep.mubr.msk.bf16.mxu0 %vm2238_vm0, %v2193_v57  ;;  %v2995_v40 = vmax.f32 %v2541_v21, 0.0  ;;  %v2127_v16 = vmax.f32 %v1977_v8, 0.0 }
 0x2b0   : > { %v1979_v17 = vpop.f32.mrf.mxu1  ;;  %v5910_v46 = vpop.f32.mrf.mxu0  ;;  %6005 = vmatmul.mubr.msk.bf16.gmra.mxu0 %vm2238_vm0, %v2194_v12 }
 0x2b1   : > { %v2993_v56 = vmax.f32 %v2533_v50, 0.0  ;;  %v1980_v47 = vadd.f32 %v7417_v18, %v1979_v17  ;;  %v2130_v4 = vmax.f32 %v1988_v14, 0.0  ;;  %v3113_v1 = vpack.c.bf16 %v2995_v40, %v2994_v11  ;;  %v6351_v50 = vld [vmem:[%s8080_s9] sm:$0xff]  }
 0x2b2   : > { %v5878_v22 = vpop.f32.mrf.mxu1  ;;  %v2545_v13 = vpop.f32.mrf.mxu0  ;;  %v2554_v49 = vadd.f32 %v5910_v46, %v7409_v33  ;;  %6166 = vmatprep.subr.bf16.mxu0 %v6351_v50 }
 0x2b3   : > { %v3112_v5 = vpack.c.bf16 %v2993_v56, %v2992_v38  ;;  %v2128_v63 = vmax.f32 %v1980_v47, 0.0  ;;  %v2546_v9 = vadd.f32 %v7409_v33, %v2545_v13  ;;  %v2196_v31 = vpack.c.bf16 %v2130_v4, %v2129_v30  ;;  %6167 = vmatpush3.bf16.msra.mxu0 %v6351_v50 }
 0x2b4   : > { %v1992_v6 = vpop.f32.mrf.mxu1  ;;  %v5911_v36 = vpop.f32.mrf.mxu0  ;;  %v2001_v2 = vadd.f32 %v7417_v18, %v5878_v22  ;;  %v2998_v48 = vmax.f32 %v2554_v49, 0.0 }
 0x2b5   : > { %v2195_v32 = vpack.c.bf16 %v2128_v63, %v2127_v16  ;;  %v2557_v10 = vadd.f32 %v5911_v36, %v7409_v33  ;;  %6040 = vmatprep.mubr.msk.bf16.mxu1 %vm2238_vm0, %v3112_v5  ;;  %v1993_v42 = vadd.f32 %v7417_v18, %v1992_v6  ;;  %v2996_v61 = vmax.f32 %v2546_v9, 0.0 }
 0x2b6   : > { %v5879_v35 = vpop.f32.mrf.mxu1  ;;  %v2548_v45 = vpop.f32.mrf.mxu0  ;;  %6041 = vmatmul.mubr.msk.bf16.gmra.mxu1 %vm2238_vm0, %v3113_v1  ;;  %v2133_v51 = vmax.f32 %v2001_v2, 0.0 }
 0x2b7   : > { %v2004_v58 = vadd.f32 %v7417_v18, %v5879_v35  ;;  %v2549_v27 = vadd.f32 %v7409_v33, %v2548_v45  ;;  %6008 = vmatprep.mubr.msk.bf16.mxu0 %vm2238_vm0, %v2195_v32  ;;  %v2999_v60 = vmax.f32 %v2557_v10, 0.0  ;;  %v2131_v59 = vmax.f32 %v1993_v42, 0.0 }
 0x2b8   : > { %v1995_v7 = vpop.f32.mrf.mxu1  ;;  %v5914_v20 = vpop.f32.mrf.mxu0  ;;  %6009 = vmatmul.mubr.msk.bf16.gmra.mxu0 %vm2238_vm0, %v2196_v31 }
 0x2b9   : > { %v2997_v23 = vmax.f32 %v2549_v27, 0.0  ;;  %v1996_v29 = vadd.f32 %v7417_v18, %v1995_v7  ;;  %v2134_v28 = vmax.f32 %v2004_v58, 0.0  ;;  %v3115_v62 = vpack.c.bf16 %v2999_v60, %v2998_v48 }
 0x2ba   : > { %v2561_v44 = vpop.f32.mrf.mxu0  ;;  %v2570_v25 = vadd.f32 %v5914_v20, %v7409_v33 }
 0x2bb   : > { %v3114_v53 = vpack.c.bf16 %v2997_v23, %v2996_v61  ;;  %v2132_v55 = vmax.f32 %v1996_v29, 0.0  ;;  %v2562_v3 = vadd.f32 %v7409_v33, %v2561_v44  ;;  %v2198_v19 = vpack.c.bf16 %v2134_v28, %v2133_v51 }
 0x2bc   : > { %v5915_v24 = vpop.f32.mrf.mxu0  ;;  %v3002_v21 = vmax.f32 %v2570_v25, 0.0 }
 0x2bd   : > { %v2197_v34 = vpack.c.bf16 %v2132_v55, %v2131_v59  ;;  %v2573_v15 = vadd.f32 %v5915_v24, %v7409_v33  ;;  %6044 = vmatprep.mubr.msk.bf16.mxu1 %vm2238_vm0, %v3114_v53  ;;  %v3000_v57 = vmax.f32 %v2562_v3, 0.0 }
 0x2be   : > { %v2564_v18 = vpop.f32.mrf.mxu0  ;;  %6045 = vmatmul.mubr.msk.bf16.gmra.mxu1 %vm2238_vm0, %v3115_v62 }
 0x2bf   : > { %v2565_v52 = vadd.f32 %v7409_v33, %v2564_v18  ;;  %6012 = vmatprep.mubr.msk.bf16.mxu0 %vm2238_vm0, %v2197_v34  ;;  %v3003_v0 = vmax.f32 %v2573_v15, 0.0 }
 0x2c0   : > { %v5918_v41 = vpop.f32.mrf.mxu0  ;;  %6013 = vmatmul.mubr.msk.bf16.gmra.mxu0 %vm2238_vm0, %v2198_v19 }
 0x2c1   : > { %v3001_v43 = vmax.f32 %v2565_v52, 0.0  ;;  %v3117_v37 = vpack.c.bf16 %v3003_v0, %v3002_v21  ;;  %v2586_v54 = vadd.f32 %v5918_v41, %v7409_v33 }
 0x2c2   : > { %v2577_v12 = vpop.f32.mrf.mxu0 }
 0x2c3   : > { %v3116_v26 = vpack.c.bf16 %v3001_v43, %v3000_v57  ;;  %v2578_v8 = vadd.f32 %v7409_v33, %v2577_v12  ;;  %v3006_v11 = vmax.f32 %v2586_v54, 0.0 }
 0x2c4   : > { %v5919_v39 = vpop.f32.mrf.mxu0 }
 0x2c5   : > { %v2589_v14 = vadd.f32 %v5919_v39, %v7409_v33  ;;  %6048 = vmatprep.mubr.msk.bf16.mxu1 %vm2238_vm0, %v3116_v26  ;;  %v3004_v56 = vmax.f32 %v2578_v8, 0.0 }
 0x2c6   : > { %v2580_v40 = vpop.f32.mrf.mxu0  ;;  %6049 = vmatmul.mubr.msk.bf16.gmra.mxu1 %vm2238_vm0, %v3117_v37 }
 0x2c7   : > { %v2581_v17 = vadd.f32 %v7409_v33, %v2580_v40  ;;  %v3007_v46 = vmax.f32 %v2589_v14, 0.0 }
 0x2c8   : > { %v5922_v38 = vpop.f32.mrf.mxu0 }
 0x2c9   : > { %v3005_v47 = vmax.f32 %v2581_v17, 0.0  ;;  %v3119_v13 = vpack.c.bf16 %v3007_v46, %v3006_v11  ;;  %v2602_v30 = vadd.f32 %v5922_v38, %v7409_v33 }
 0x2ca   : > { %v2593_v4 = vpop.f32.mrf.mxu0 }
 0x2cb   : > { %v3118_v22 = vpack.c.bf16 %v3005_v47, %v3004_v56  ;;  %v2594_v5 = vadd.f32 %v7409_v33, %v2593_v4  ;;  %v3010_v31 = vmax.f32 %v2602_v30, 0.0 }
 0x2cc   : > { %v5923_v16 = vpop.f32.mrf.mxu0 }
 0x2cd   : > { %v2605_v63 = vadd.f32 %v5923_v16, %v7409_v33  ;;  %6052 = vmatprep.mubr.msk.bf16.mxu1 %vm2238_vm0, %v3118_v22  ;;  %v3008_v9 = vmax.f32 %v2594_v5, 0.0 }
 0x2ce   : > { %v2596_v1 = vpop.f32.mrf.mxu0  ;;  %6053 = vmatmul.mubr.msk.bf16.gmra.mxu1 %vm2238_vm0, %v3119_v13 }
 0x2cf   : > { %v2597_v6 = vadd.f32 %v7409_v33, %v2596_v1  ;;  %v3011_v36 = vmax.f32 %v2605_v63, 0.0 }
 0x2d0   : > { %v5926_v32 = vpop.f32.mrf.mxu0 }
 0x2d1   : > { %v3009_v10 = vmax.f32 %v2597_v6, 0.0  ;;  %v3121_v45 = vpack.c.bf16 %v3011_v36, %v3010_v31  ;;  %v2618_v2 = vadd.f32 %v5926_v32, %v7409_v33 }
 0x2d2   : > { %v2609_v49 = vpop.f32.mrf.mxu0 }
 0x2d3   : > { %v3120_v35 = vpack.c.bf16 %v3009_v10, %v3008_v9  ;;  %v2610_v58 = vadd.f32 %v7409_v33, %v2609_v49  ;;  %v3014_v48 = vmax.f32 %v2618_v2, 0.0 }
 0x2d4   : > { %v5927_v42 = vpop.f32.mrf.mxu0 }
 0x2d5   : > { %v2621_v27 = vadd.f32 %v5927_v42, %v7409_v33  ;;  %6056 = vmatprep.mubr.msk.bf16.mxu1 %vm2238_vm0, %v3120_v35  ;;  %v3012_v23 = vmax.f32 %v2610_v58, 0.0 }
 0x2d6   : > { %v2612_v60 = vpop.f32.mrf.mxu0  ;;  %6057 = vmatmul.mubr.msk.bf16.gmra.mxu1 %vm2238_vm0, %v3121_v45 }
 0x2d7   : > { %v2613_v7 = vadd.f32 %v7409_v33, %v2612_v60  ;;  %v3015_v20 = vmax.f32 %v2621_v27, 0.0 }
 0x2d8   : > { %v5930_v61 = vpop.f32.mrf.mxu0 }
 0x2d9   : > { %v3013_v29 = vmax.f32 %v2613_v7, 0.0  ;;  %v3123_v59 = vpack.c.bf16 %v3015_v20, %v3014_v48  ;;  %v2634_v62 = vadd.f32 %v5930_v61, %v7409_v33 }
 0x2da   : > { %v2625_v28 = vpop.f32.mrf.mxu0 }
 0x2db   : > { %v3122_v44 = vpack.c.bf16 %v3013_v29, %v3012_v23  ;;  %v2626_v55 = vadd.f32 %v7409_v33, %v2625_v28  ;;  %v3018_v18 = vmax.f32 %v2634_v62, 0.0 }
 0x2dc   : > { %v5931_v53 = vpop.f32.mrf.mxu0 }
 0x2dd   : > { %v2637_v51 = vadd.f32 %v5931_v53, %v7409_v33  ;;  %6060 = vmatprep.mubr.msk.bf16.mxu1 %vm2238_vm0, %v3122_v44  ;;  %v3016_v19 = vmax.f32 %v2626_v55, 0.0 }
 0x2de   : > { %v2628_v24 = vpop.f32.mrf.mxu0  ;;  %6061 = vmatmul.mubr.msk.bf16.gmra.mxu1 %vm2238_vm0, %v3123_v59 }
 0x2df   : > { %v2629_v34 = vadd.f32 %v7409_v33, %v2628_v24  ;;  %v3019_v3 = vmax.f32 %v2637_v51, 0.0 }
 0x2e0   : > { %v5934_v15 = vpop.f32.mrf.mxu0 }
 0x2e1   : > { %v3017_v25 = vmax.f32 %v2629_v34, 0.0  ;;  %v3125_v41 = vpack.c.bf16 %v3019_v3, %v3018_v18  ;;  %v2650_v12 = vadd.f32 %v5934_v15, %v7409_v33 }
 0x2e2   : > { %v2641_v52 = vpop.f32.mrf.mxu0 }
 0x2e3   : > { %v3124_v0 = vpack.c.bf16 %v3017_v25, %v3016_v19  ;;  %v2642_v43 = vadd.f32 %v7409_v33, %v2641_v52  ;;  %v3022_v54 = vmax.f32 %v2650_v12, 0.0 }
 0x2e4   : > { %v5935_v57 = vpop.f32.mrf.mxu0 }
 0x2e5   : > { %v2653_v21 = vadd.f32 %v5935_v57, %v7409_v33  ;;  %6064 = vmatprep.mubr.msk.bf16.mxu1 %vm2238_vm0, %v3124_v0  ;;  %v3020_v14 = vmax.f32 %v2642_v43, 0.0 }
 0x2e6   : > { %v2644_v26 = vpop.f32.mrf.mxu0  ;;  %6065 = vmatmul.mubr.msk.bf16.gmra.mxu1 %vm2238_vm0, %v3125_v41 }
 0x2e7   : > { %v2645_v37 = vadd.f32 %v7409_v33, %v2644_v26  ;;  %v3023_v39 = vmax.f32 %v2653_v21, 0.0 }
 0x2e8   : > { %v5938_v8 = vpop.f32.mrf.mxu0 }
 0x2e9   : > { %v3021_v50 = vmax.f32 %v2645_v37, 0.0  ;;  %v3127_v46 = vpack.c.bf16 %v3023_v39, %v3022_v54  ;;  %v2666_v11 = vadd.f32 %v5938_v8, %v7409_v33 }
 0x2ea   : > { %v2657_v40 = vpop.f32.mrf.mxu0 }
 0x2eb   : > { %v3126_v17 = vpack.c.bf16 %v3021_v50, %v3020_v14  ;;  %v2658_v56 = vadd.f32 %v7409_v33, %v2657_v40  ;;  %v3026_v30 = vmax.f32 %v2666_v11, 0.0 }
 0x2ec   : > { %v5939_v38 = vpop.f32.mrf.mxu0 }
 0x2ed   : > { %v2669_v47 = vadd.f32 %v5939_v38, %v7409_v33  ;;  %6068 = vmatprep.mubr.msk.bf16.mxu1 %vm2238_vm0, %v3126_v17  ;;  %v3024_v5 = vmax.f32 %v2658_v56, 0.0 }
 0x2ee   : > { %v2660_v4 = vpop.f32.mrf.mxu0  ;;  %6069 = vmatmul.mubr.msk.bf16.gmra.mxu1 %vm2238_vm0, %v3127_v46 }
 0x2ef   : > { %v2661_v22 = vadd.f32 %v7409_v33, %v2660_v4  ;;  %v3027_v13 = vmax.f32 %v2669_v47, 0.0 }
 0x2f0   : > { %v5942_v16 = vpop.f32.mrf.mxu0 }
 0x2f1   : > { %v3025_v63 = vmax.f32 %v2661_v22, 0.0  ;;  %v3129_v36 = vpack.c.bf16 %v3027_v13, %v3026_v30  ;;  %v2682_v31 = vadd.f32 %v5942_v16, %v7409_v33 }
 0x2f2   : > { %v2673_v1 = vpop.f32.mrf.mxu0 }
 0x2f3   : > { %v3128_v6 = vpack.c.bf16 %v3025_v63, %v3024_v5  ;;  %v2674_v9 = vadd.f32 %v7409_v33, %v2673_v1  ;;  %v3030_v2 = vmax.f32 %v2682_v31, 0.0 }
 0x2f4   : > { %v5943_v32 = vpop.f32.mrf.mxu0 }
 0x2f5   : > { %v2685_v10 = vadd.f32 %v5943_v32, %v7409_v33  ;;  %6072 = vmatprep.mubr.msk.bf16.mxu1 %vm2238_vm0, %v3128_v6  ;;  %v3028_v58 = vmax.f32 %v2674_v9, 0.0 }
 0x2f6   : > { %v2676_v49 = vpop.f32.mrf.mxu0  ;;  %6073 = vmatmul.mubr.msk.bf16.gmra.mxu1 %vm2238_vm0, %v3129_v36 }
 0x2f7   : > { %v2677_v35 = vadd.f32 %v7409_v33, %v2676_v49  ;;  %v3031_v45 = vmax.f32 %v2685_v10, 0.0 }
 0x2f8   : > { %v5946_v42 = vpop.f32.mrf.mxu0 }
 0x2f9   : > { %v3029_v27 = vmax.f32 %v2677_v35, 0.0  ;;  %v3131_v20 = vpack.c.bf16 %v3031_v45, %v3030_v2  ;;  %v2698_v48 = vadd.f32 %v5946_v42, %v7409_v33 }
 0x2fa   : > { %v2689_v60 = vpop.f32.mrf.mxu0 }
 0x2fb   : > { %v3130_v7 = vpack.c.bf16 %v3029_v27, %v3028_v58  ;;  %v2690_v23 = vadd.f32 %v7409_v33, %v2689_v60  ;;  %v3034_v62 = vmax.f32 %v2698_v48, 0.0 }
 0x2fc   : > { %v5947_v61 = vpop.f32.mrf.mxu0 }
 0x2fd   : > { %v2701_v29 = vadd.f32 %v5947_v61, %v7409_v33  ;;  %6076 = vmatprep.mubr.msk.bf16.mxu1 %vm2238_vm0, %v3130_v7  ;;  %v3032_v55 = vmax.f32 %v2690_v23, 0.0 }
 0x2fe   : > { %v2692_v28 = vpop.f32.mrf.mxu0  ;;  %6077 = vmatmul.mubr.msk.bf16.gmra.mxu1 %vm2238_vm0, %v3131_v20 }
 0x2ff   : > { %v2693_v44 = vadd.f32 %v7409_v33, %v2692_v28  ;;  %v3035_v59 = vmax.f32 %v2701_v29, 0.0 }
 0x300   : > { %v5950_v53 = vpop.f32.mrf.mxu0 }
 0x301   : > { %v3033_v51 = vmax.f32 %v2693_v44, 0.0  ;;  %v3133_v3 = vpack.c.bf16 %v3035_v59, %v3034_v62  ;;  %v2714_v18 = vadd.f32 %v5950_v53, %v7409_v33 }
 0x302   : > { %v2705_v24 = vpop.f32.mrf.mxu0 }
 0x303   : > { %v3132_v34 = vpack.c.bf16 %v3033_v51, %v3032_v55  ;;  %v2706_v19 = vadd.f32 %v7409_v33, %v2705_v24  ;;  %v3038_v12 = vmax.f32 %v2714_v18, 0.0 }
 0x304   : > { %v5951_v15 = vpop.f32.mrf.mxu0 }
 0x305   : > { %v2717_v25 = vadd.f32 %v5951_v15, %v7409_v33  ;;  %6080 = vmatprep.mubr.msk.bf16.mxu1 %vm2238_vm0, %v3132_v34  ;;  %v3036_v43 = vmax.f32 %v2706_v19, 0.0 }
 0x306   : > { %v2708_v52 = vpop.f32.mrf.mxu0  ;;  %6081 = vmatmul.mubr.msk.bf16.gmra.mxu1 %vm2238_vm0, %v3133_v3 }
 0x307   : > { %v2709_v0 = vadd.f32 %v7409_v33, %v2708_v52  ;;  %v3039_v41 = vmax.f32 %v2717_v25, 0.0 }
 0x308   : > { %v5954_v57 = vpop.f32.mrf.mxu0 }
 0x309   : > { %v3037_v21 = vmax.f32 %v2709_v0, 0.0  ;;  %v3135_v39 = vpack.c.bf16 %v3039_v41, %v3038_v12  ;;  %v2730_v54 = vadd.f32 %v5954_v57, %v7409_v33 }
 0x30a   : > { %v2721_v26 = vpop.f32.mrf.mxu0 }
 0x30b   : > { %v3134_v37 = vpack.c.bf16 %v3037_v21, %v3036_v43  ;;  %v2722_v14 = vadd.f32 %v7409_v33, %v2721_v26  ;;  %v3042_v11 = vmax.f32 %v2730_v54, 0.0 }
 0x30c   : > { %v5955_v8 = vpop.f32.mrf.mxu0 }
 0x30d   : > { %v2733_v50 = vadd.f32 %v5955_v8, %v7409_v33  ;;  %6084 = vmatprep.mubr.msk.bf16.mxu1 %vm2238_vm0, %v3134_v37  ;;  %v3040_v56 = vmax.f32 %v2722_v14, 0.0 }
 0x30e   : > { %v2724_v40 = vpop.f32.mrf.mxu0  ;;  %6085 = vmatmul.mubr.msk.bf16.gmra.mxu1 %vm2238_vm0, %v3135_v39 }
 0x30f   : > { %v2725_v17 = vadd.f32 %v7409_v33, %v2724_v40  ;;  %v3043_v46 = vmax.f32 %v2733_v50, 0.0 }
 0x310   : > { %v5958_v38 = vpop.f32.mrf.mxu0 }
 0x311   : > { %v3041_v47 = vmax.f32 %v2725_v17, 0.0  ;;  %v3137_v13 = vpack.c.bf16 %v3043_v46, %v3042_v11  ;;  %v2746_v30 = vadd.f32 %v5958_v38, %v7409_v33 }
 0x312   : > { %v2737_v4 = vpop.f32.mrf.mxu0 }
 0x313   : > { %v3136_v22 = vpack.c.bf16 %v3041_v47, %v3040_v56  ;;  %v2738_v5 = vadd.f32 %v7409_v33, %v2737_v4  ;;  %v3046_v31 = vmax.f32 %v2746_v30, 0.0 }
 0x314   : > { %v5959_v16 = vpop.f32.mrf.mxu0 }
 0x315   : > { %v2749_v63 = vadd.f32 %v5959_v16, %v7409_v33  ;;  %6088 = vmatprep.mubr.msk.bf16.mxu1 %vm2238_vm0, %v3136_v22  ;;  %v3044_v9 = vmax.f32 %v2738_v5, 0.0 }
 0x316   : > { %v2740_v1 = vpop.f32.mrf.mxu0  ;;  %6089 = vmatmul.mubr.msk.bf16.gmra.mxu1 %vm2238_vm0, %v3137_v13 }
 0x317   : > { %v2741_v6 = vadd.f32 %v7409_v33, %v2740_v1  ;;  %v3047_v36 = vmax.f32 %v2749_v63, 0.0 }
 0x318   : > { %v5962_v32 = vpop.f32.mrf.mxu0 }
 0x319   : > { %v3045_v10 = vmax.f32 %v2741_v6, 0.0  ;;  %v3139_v45 = vpack.c.bf16 %v3047_v36, %v3046_v31  ;;  %v2762_v2 = vadd.f32 %v5962_v32, %v7409_v33 }
 0x31a   : > { %v2753_v49 = vpop.f32.mrf.mxu0 }
 0x31b   : > { %v3138_v35 = vpack.c.bf16 %v3045_v10, %v3044_v9  ;;  %v2754_v58 = vadd.f32 %v7409_v33, %v2753_v49  ;;  %v3050_v48 = vmax.f32 %v2762_v2, 0.0 }
 0x31c   : > { %v5963_v42 = vpop.f32.mrf.mxu0 }
 0x31d   : > { %v2765_v27 = vadd.f32 %v5963_v42, %v7409_v33  ;;  %6092 = vmatprep.mubr.msk.bf16.mxu1 %vm2238_vm0, %v3138_v35  ;;  %v3048_v23 = vmax.f32 %v2754_v58, 0.0 }
 0x31e   : > { %v2756_v60 = vpop.f32.mrf.mxu0  ;;  %6093 = vmatmul.mubr.msk.bf16.gmra.mxu1 %vm2238_vm0, %v3139_v45 }
 0x31f   : > { %v2757_v7 = vadd.f32 %v7409_v33, %v2756_v60  ;;  %v3051_v20 = vmax.f32 %v2765_v27, 0.0 }
 0x320   : > { %v5966_v61 = vpop.f32.mrf.mxu0 }
 0x321   : > { %v3049_v29 = vmax.f32 %v2757_v7, 0.0  ;;  %v3141_v59 = vpack.c.bf16 %v3051_v20, %v3050_v48  ;;  %v2778_v62 = vadd.f32 %v5966_v61, %v7409_v33 }
 0x322   : > { %v2769_v28 = vpop.f32.mrf.mxu0 }
 0x323   : > { %v3140_v44 = vpack.c.bf16 %v3049_v29, %v3048_v23  ;;  %v2770_v55 = vadd.f32 %v7409_v33, %v2769_v28  ;;  %v3054_v18 = vmax.f32 %v2778_v62, 0.0 }
 0x324   : > { %v5967_v53 = vpop.f32.mrf.mxu0 }
 0x325   : > { %v2781_v51 = vadd.f32 %v5967_v53, %v7409_v33  ;;  %6096 = vmatprep.mubr.msk.bf16.mxu1 %vm2238_vm0, %v3140_v44  ;;  %v3052_v19 = vmax.f32 %v2770_v55, 0.0 }
 0x326   : > { %v2772_v24 = vpop.f32.mrf.mxu0  ;;  %6097 = vmatmul.mubr.msk.bf16.gmra.mxu1 %vm2238_vm0, %v3141_v59 }
 0x327   : > { %v2773_v34 = vadd.f32 %v7409_v33, %v2772_v24  ;;  %v3055_v3 = vmax.f32 %v2781_v51, 0.0 }
 0x328   : > { %v5970_v15 = vpop.f32.mrf.mxu0 }
 0x329   : > { %v3053_v25 = vmax.f32 %v2773_v34, 0.0  ;;  %v3143_v41 = vpack.c.bf16 %v3055_v3, %v3054_v18  ;;  %v2794_v12 = vadd.f32 %v5970_v15, %v7409_v33 }
 0x32a   : > { %v2785_v52 = vpop.f32.mrf.mxu0 }
 0x32b   : > { %v3142_v0 = vpack.c.bf16 %v3053_v25, %v3052_v19  ;;  %v2786_v43 = vadd.f32 %v7409_v33, %v2785_v52  ;;  %v3058_v54 = vmax.f32 %v2794_v12, 0.0 }
 0x32c   : > { %v5971_v57 = vpop.f32.mrf.mxu0 }
 0x32d   : > { %v2797_v21 = vadd.f32 %v5971_v57, %v7409_v33  ;;  %6100 = vmatprep.mubr.msk.bf16.mxu1 %vm2238_vm0, %v3142_v0  ;;  %v3056_v14 = vmax.f32 %v2786_v43, 0.0 }
 0x32e   : > { %v2788_v26 = vpop.f32.mrf.mxu0  ;;  %6101 = vmatmul.mubr.msk.bf16.gmra.mxu1 %vm2238_vm0, %v3143_v41 }
 0x32f   : > { %v2789_v37 = vadd.f32 %v7409_v33, %v2788_v26  ;;  %v3059_v39 = vmax.f32 %v2797_v21, 0.0 }
 0x330   : > { %v5974_v8 = vpop.f32.mrf.mxu0 }
 0x331   : > { %v3057_v50 = vmax.f32 %v2789_v37, 0.0  ;;  %v3145_v46 = vpack.c.bf16 %v3059_v39, %v3058_v54  ;;  %v2810_v11 = vadd.f32 %v5974_v8, %v7409_v33 }
 0x332   : > { %v2801_v40 = vpop.f32.mrf.mxu0 }
 0x333   : > { %v3144_v17 = vpack.c.bf16 %v3057_v50, %v3056_v14  ;;  %v2802_v56 = vadd.f32 %v7409_v33, %v2801_v40  ;;  %v3062_v30 = vmax.f32 %v2810_v11, 0.0 }
 0x334   : > { %v5975_v38 = vpop.f32.mrf.mxu0 }
 0x335   : > { %v2813_v47 = vadd.f32 %v5975_v38, %v7409_v33  ;;  %6104 = vmatprep.mubr.msk.bf16.mxu1 %vm2238_vm0, %v3144_v17  ;;  %v3060_v5 = vmax.f32 %v2802_v56, 0.0 }
 0x336   : > { %v2804_v4 = vpop.f32.mrf.mxu0  ;;  %6105 = vmatmul.mubr.msk.bf16.gmra.mxu1 %vm2238_vm0, %v3145_v46  ;;  %v7616_v46 = vld [vmem:[%s8077_s6] ss:$0 sm:$0xff] }
 0x337   : > { %v2805_v22 = vadd.f32 %v7409_v33, %v2804_v4  ;;  %v3063_v13 = vmax.f32 %v2813_v47, 0.0 }
 0x338   : > { %v5978_v16 = vpop.f32.mrf.mxu0 }
 0x339   : > { %v3061_v63 = vmax.f32 %v2805_v22, 0.0  ;;  %v3147_v36 = vpack.c.bf16 %v3063_v13, %v3062_v30  ;;  %v2826_v31 = vadd.f32 %v5978_v16, %v7409_v33 }
 0x33a   : > { %v2817_v1 = vpop.f32.mrf.mxu0 }
 0x33b   : > { %v3146_v6 = vpack.c.bf16 %v3061_v63, %v3060_v5  ;;  %v2818_v9 = vadd.f32 %v7409_v33, %v2817_v1  ;;  %v3066_v2 = vmax.f32 %v2826_v31, 0.0 }
 0x33c   : > { %v5979_v32 = vpop.f32.mrf.mxu0 }
 0x33d   : > { %v2829_v10 = vadd.f32 %v5979_v32, %v7409_v33  ;;  %6108 = vmatprep.mubr.msk.bf16.mxu1 %vm2238_vm0, %v3146_v6  ;;  %v3064_v58 = vmax.f32 %v2818_v9, 0.0 }
 0x33e   : > { %v2820_v49 = vpop.f32.mrf.mxu0  ;;  %6109 = vmatmul.mubr.msk.bf16.gmra.mxu1 %vm2238_vm0, %v3147_v36 }
 0x33f   : > { %v2821_v35 = vadd.f32 %v7409_v33, %v2820_v49  ;;  %v3067_v45 = vmax.f32 %v2829_v10, 0.0 }
 0x340   : > { %v5982_v42 = vpop.f32.mrf.mxu0 }
 0x341   : > { %v3065_v27 = vmax.f32 %v2821_v35, 0.0  ;;  %v3149_v20 = vpack.c.bf16 %v3067_v45, %v3066_v2  ;;  %v2842_v48 = vadd.f32 %v5982_v42, %v7409_v33 }
 0x342   : > { %v2833_v60 = vpop.f32.mrf.mxu0 }
 0x343   : > { %v3148_v7 = vpack.c.bf16 %v3065_v27, %v3064_v58  ;;  %v2834_v23 = vadd.f32 %v7409_v33, %v2833_v60  ;;  %v3070_v62 = vmax.f32 %v2842_v48, 0.0 }
 0x344   : > { %v5983_v61 = vpop.f32.mrf.mxu0 }
 0x345   : > { %v2845_v29 = vadd.f32 %v5983_v61, %v7409_v33  ;;  %6112 = vmatprep.mubr.msk.bf16.mxu1 %vm2238_vm0, %v3148_v7  ;;  %v3068_v55 = vmax.f32 %v2834_v23, 0.0 }
 0x346   : > { %v2836_v28 = vpop.f32.mrf.mxu0  ;;  %6113 = vmatmul.mubr.msk.bf16.gmra.mxu1 %vm2238_vm0, %v3149_v20 }
 0x347   : > { %v2837_v44 = vadd.f32 %v7409_v33, %v2836_v28  ;;  %v3071_v59 = vmax.f32 %v2845_v29, 0.0 }
 0x348   : > { %v5986_v53 = vpop.f32.mrf.mxu0 }
 0x349   : > { %v3069_v51 = vmax.f32 %v2837_v44, 0.0  ;;  %v3151_v3 = vpack.c.bf16 %v3071_v59, %v3070_v62  ;;  %v2858_v18 = vadd.f32 %v5986_v53, %v7409_v33 }
 0x34a   : > { %v2849_v24 = vpop.f32.mrf.mxu0 }
 0x34b   : > { %v3150_v34 = vpack.c.bf16 %v3069_v51, %v3068_v55  ;;  %v2850_v19 = vadd.f32 %v7409_v33, %v2849_v24  ;;  %v3074_v12 = vmax.f32 %v2858_v18, 0.0 }
 0x34c   : > { %v5987_v15 = vpop.f32.mrf.mxu0 }
 0x34d   : > { %v2861_v25 = vadd.f32 %v5987_v15, %v7409_v33  ;;  %6116 = vmatprep.mubr.msk.bf16.mxu1 %vm2238_vm0, %v3150_v34  ;;  %v3072_v43 = vmax.f32 %v2850_v19, 0.0 }
 0x34e   : > { %v2852_v52 = vpop.f32.mrf.mxu0  ;;  %6117 = vmatmul.mubr.msk.bf16.gmra.mxu1 %vm2238_vm0, %v3151_v3 }
 0x34f   : > { %v2853_v0 = vadd.f32 %v7409_v33, %v2852_v52  ;;  %v3075_v41 = vmax.f32 %v2861_v25, 0.0 }
 0x350   : > { %v5990_v57 = vpop.f32.mrf.mxu0 }
 0x351   : > { %v3073_v21 = vmax.f32 %v2853_v0, 0.0  ;;  %v3153_v39 = vpack.c.bf16 %v3075_v41, %v3074_v12  ;;  %v2874_v54 = vadd.f32 %v5990_v57, %v7409_v33 }
 0x352   : > { %v2865_v26 = vpop.f32.mrf.mxu0 }
 0x353   : > { %v3152_v37 = vpack.c.bf16 %v3073_v21, %v3072_v43  ;;  %v2866_v14 = vadd.f32 %v7409_v33, %v2865_v26  ;;  %v3078_v13 = vmax.f32 %v2874_v54, 0.0 }
 0x354   : > { %v5991_v8 = vpop.f32.mrf.mxu0 }
 0x355   : > { %v2877_v50 = vadd.f32 %v5991_v8, %v7409_v33  ;;  %6120 = vmatprep.mubr.msk.bf16.mxu1 %vm2238_vm0, %v3152_v37  ;;  %v3076_v4 = vmax.f32 %v2866_v14, 0.0  ;;  %v7622_v33 = vld [vmem:[%s8079_s8] ss:$0 sm:$0xff] }
 0x356   : > { %v2868_v40 = vpop.f32.mrf.mxu0  ;;  %v6026_v17 = vpop.f32.mrf.mxu1  ;;  %6121 = vmatmul.mubr.msk.bf16.gmra.mxu1 %vm2238_vm0, %v3153_v39 }
 0x357   : > { %v2869_v38 = vadd.f32 %v7616_v46, %v2868_v40  ;;  %v3079_v56 = vmax.f32 %v2877_v50, 0.0  ;;  %v3442_v9 = vadd.f32 %v6026_v17, %v7622_v33 }
 0x358   : > { %v5994_v47 = vpop.f32.mrf.mxu0  ;;  %v3433_v11 = vpop.f32.mrf.mxu1 }
 0x359   : > { %v3077_v22 = vmax.f32 %v2869_v38, 0.0  ;;  %v3155_v1 = vpack.c.bf16 %v3079_v56, %v3078_v13  ;;  %v3434_v6 = vadd.f32 %v7622_v33, %v3433_v11  ;;  %v2890_v35 = vadd.f32 %v7616_v46, %v5994_v47 }
 0x35a   : > { %v2881_v16 = vpop.f32.mrf.mxu0  ;;  %v6027_v5 = vpop.f32.mrf.mxu1  ;;  %v3946_v23 = vmax.f32 %v3442_v9, 0.0 }
 0x35b   : > { %v3154_v63 = vpack.c.bf16 %v3077_v22, %v3076_v4  ;;  %v3445_v30 = vadd.f32 %v6027_v5, %v7622_v33  ;;  %v2882_v10 = vadd.f32 %v7616_v46, %v2881_v16  ;;  %v3944_v60 = vmax.f32 %v3434_v6, 0.0 }
 0x35c   : > { %v5995_v36 = vpop.f32.mrf.mxu0  ;;  %v3436_v32 = vpop.f32.mrf.mxu1  ;;  %v3082_v28 = vmax.f32 %v2890_v35, 0.0 }
 0x35d   : > { %v2893_v31 = vadd.f32 %v7616_v46, %v5995_v36  ;;  %v3437_v49 = vadd.f32 %v7622_v33, %v3436_v32  ;;  %6124 = vmatprep.mubr.msk.bf16.mxu1 %vm2238_vm0, %v3154_v63  ;;  %v3947_v58 = vmax.f32 %v3445_v30, 0.0  ;;  %v3080_v29 = vmax.f32 %v2882_v10, 0.0 }
 0x35e   : > { %v2884_v45 = vpop.f32.mrf.mxu0  ;;  %v6030_v42 = vpop.f32.mrf.mxu1  ;;  %6125 = vmatmul.mubr.msk.bf16.gmra.mxu1 %vm2238_vm0, %v3155_v1 }
 0x35f   : > { %v3945_v27 = vmax.f32 %v3437_v49, 0.0  ;;  %v2885_v2 = vadd.f32 %v7616_v46, %v2884_v45  ;;  %v3083_v7 = vmax.f32 %v2893_v31, 0.0  ;;  %v4073_v55 = vpack.c.bf16 %v3947_v58, %v3946_v23 }
 0x360   : > { %v5998_v20 = vpop.f32.mrf.mxu0  ;;  %v3449_v61 = vpop.f32.mrf.mxu1  ;;  %v3458_v24 = vadd.f32 %v6030_v42, %v7622_v33 }
 0x361   : > { %v3081_v48 = vmax.f32 %v2885_v2, 0.0  ;;  %v4072_v53 = vpack.c.bf16 %v3945_v27, %v3944_v60  ;;  %v3157_v62 = vpack.c.bf16 %v3083_v7, %v3082_v28  ;;  %v3450_v34 = vadd.f32 %v7622_v33, %v3449_v61 }
 0x362   : > { %v2897_v44 = vpop.f32.mrf.mxu0  ;;  %v6031_v59 = vpop.f32.mrf.mxu1  ;;  %v2906_v0 = vadd.f32 %v7616_v46, %v5998_v20  ;;  %v3950_v14 = vmax.f32 %v3458_v24, 0.0 }
 0x363   : > { %v3156_v51 = vpack.c.bf16 %v3081_v48, %v3080_v29  ;;  %v3461_v3 = vadd.f32 %v6031_v59, %v7622_v33  ;;  %6168 = vmatprep.mubr.bf16.mxu0 %v4072_v53  ;;  %v2898_v25 = vadd.f32 %v7616_v46, %v2897_v44  ;;  %v3948_v26 = vmax.f32 %v3450_v34, 0.0 }
 0x364   : > { %v5999_v15 = vpop.f32.mrf.mxu0  ;;  %v3452_v19 = vpop.f32.mrf.mxu1  ;;  %6169 = vmatmul.mubr.bf16.vlgmr.msra.gmra.mxu0 %v4073_v55  ;;  %v3086_v40 = vmax.f32 %v2906_v0, 0.0 }
 0x365   : > { %v2909_v18 = vadd.f32 %v7616_v46, %v5999_v15  ;;  %v3453_v52 = vadd.f32 %v7622_v33, %v3452_v19  ;;  %6128 = vmatprep.mubr.msk.bf16.mxu1 %vm2238_vm0, %v3156_v51  ;;  %v3951_v43 = vmax.f32 %v3461_v3, 0.0  ;;  %v3084_v50 = vmax.f32 %v2898_v25, 0.0 }
 0x366   : > { %v2900_v41 = vpop.f32.mrf.mxu0  ;;  %v6034_v57 = vpop.f32.mrf.mxu1  ;;  %6129 = vmatmul.mubr.msk.bf16.gmra.mxu1 %vm2238_vm0, %v3157_v62 }
 0x367   : > { %v3949_v21 = vmax.f32 %v3453_v52, 0.0  ;;  %v2901_v12 = vadd.f32 %v7616_v46, %v2900_v41  ;;  %v3087_v37 = vmax.f32 %v2909_v18, 0.0  ;;  %v4075_v47 = vpack.c.bf16 %v3951_v43, %v3950_v14 }
 0x368   : > { %v6002_v39 = vpop.f32.mrf.mxu0  ;;  %v3465_v8 = vpop.f32.mrf.mxu1  ;;  %v3474_v13 = vadd.f32 %v6034_v57, %v7622_v33 }
 0x369   : > { %v3085_v54 = vmax.f32 %v2901_v12, 0.0  ;;  %v4074_v56 = vpack.c.bf16 %v3949_v21, %v3948_v26  ;;  %v3159_v22 = vpack.c.bf16 %v3087_v37, %v3086_v40  ;;  %v3466_v16 = vadd.f32 %v7622_v33, %v3465_v8 }
 0x36a   : > { %v2913_v17 = vpop.f32.mrf.mxu0  ;;  %v6035_v38 = vpop.f32.mrf.mxu1  ;;  %v2922_v36 = vadd.f32 %v7616_v46, %v6002_v39  ;;  %v3954_v27 = vmax.f32 %v3474_v13, 0.0 }
 0x36b   : > { %v3158_v11 = vpack.c.bf16 %v3085_v54, %v3084_v50  ;;  %v3477_v4 = vadd.f32 %v6035_v38, %v7622_v33  ;;  %6172 = vmatprep.mubr.bf16.mxu0 %v4074_v56  ;;  %v2914_v30 = vadd.f32 %v7616_v46, %v2913_v17  ;;  %v3952_v35 = vmax.f32 %v3466_v16, 0.0 }
 0x36c   : > { %v6003_v5 = vpop.f32.mrf.mxu0  ;;  %v3468_v63 = vpop.f32.mrf.mxu1  ;;  %6173 = vmatmul.mubr.bf16.gmra.mxu0 %v4075_v47  ;;  %v3090_v7 = vmax.f32 %v2922_v36, 0.0 }
 0x36d   : > { %v2925_v1 = vadd.f32 %v7616_v46, %v6003_v5  ;;  %v3469_v6 = vadd.f32 %v7622_v33, %v3468_v63  ;;  %6132 = vmatprep.mubr.msk.bf16.mxu1 %vm2238_vm0, %v3158_v11  ;;  %v3955_v10 = vmax.f32 %v3477_v4, 0.0  ;;  %v3088_v2 = vmax.f32 %v2914_v30, 0.0 }
 0x36e   : > { %v2916_v32 = vpop.f32.mrf.mxu0  ;;  %v6038_v9 = vpop.f32.mrf.mxu1  ;;  %6133 = vmatmul.mubr.msk.bf16.gmra.mxu1 %vm2238_vm0, %v3159_v22 }
 0x36f   : > { %v3953_v31 = vmax.f32 %v3469_v6, 0.0  ;;  %v2917_v49 = vadd.f32 %v7616_v46, %v2916_v32  ;;  %v3091_v45 = vmax.f32 %v2925_v1, 0.0  ;;  %v4077_v29 = vpack.c.bf16 %v3955_v10, %v3954_v27 }
 0x370   : > { %v6006_v42 = vpop.f32.mrf.mxu0  ;;  %v3481_v58 = vpop.f32.mrf.mxu1  ;;  %v3490_v44 = vadd.f32 %v6038_v9, %v7622_v33 }
 0x371   : > { %v3089_v60 = vmax.f32 %v2917_v49, 0.0  ;;  %v4076_v23 = vpack.c.bf16 %v3953_v31, %v3952_v35  ;;  %v3161_v28 = vpack.c.bf16 %v3091_v45, %v3090_v7  ;;  %v3482_v59 = vadd.f32 %v7622_v33, %v3481_v58 }
 0x372   : > { %v2929_v20 = vpop.f32.mrf.mxu0  ;;  %v6039_v61 = vpop.f32.mrf.mxu1  ;;  %v2938_v3 = vadd.f32 %v7616_v46, %v6006_v42  ;;  %v3958_v21 = vmax.f32 %v3490_v44, 0.0 }
 0x373   : > { %v3160_v48 = vpack.c.bf16 %v3089_v60, %v3088_v2  ;;  %v3493_v53 = vadd.f32 %v6039_v61, %v7622_v33  ;;  %6176 = vmatprep.mubr.bf16.mxu0 %v4076_v23  ;;  %v2930_v62 = vadd.f32 %v7616_v46, %v2929_v20  ;;  %v3956_v0 = vmax.f32 %v3482_v59, 0.0 }
 0x374   : > { %v6007_v55 = vpop.f32.mrf.mxu0  ;;  %v3484_v51 = vpop.f32.mrf.mxu1  ;;  %6177 = vmatmul.mubr.bf16.gmra.mxu0 %v4077_v29  ;;  %v3094_v37 = vmax.f32 %v2938_v3, 0.0 }
 0x375   : > { %v2941_v24 = vadd.f32 %v7616_v46, %v6007_v55  ;;  %v3485_v34 = vadd.f32 %v7622_v33, %v3484_v51  ;;  %6136 = vmatprep.mubr.msk.bf16.mxu1 %vm2238_vm0, %v3160_v48  ;;  %v3959_v25 = vmax.f32 %v3493_v53, 0.0  ;;  %v3092_v12 = vmax.f32 %v2930_v62, 0.0 }
 0x376   : > { %v2932_v15 = vpop.f32.mrf.mxu0  ;;  %v6042_v19 = vpop.f32.mrf.mxu1  ;;  %6137 = vmatmul.mubr.msk.bf16.gmra.mxu1 %vm2238_vm0, %v3161_v28 }
 0x377   : > { %v3957_v18 = vmax.f32 %v3485_v34, 0.0  ;;  %v2933_v52 = vadd.f32 %v7616_v46, %v2932_v15  ;;  %v3095_v41 = vmax.f32 %v2941_v24, 0.0  ;;  %v4079_v50 = vpack.c.bf16 %v3959_v25, %v3958_v21 }
 0x378   : > { %v6010_v57 = vpop.f32.mrf.mxu0  ;;  %v3497_v43 = vpop.f32.mrf.mxu1  ;;  %v3506_v56 = vadd.f32 %v6042_v19, %v7622_v33 }
 0x379   : > { %v3093_v26 = vmax.f32 %v2933_v52, 0.0  ;;  %v4078_v14 = vpack.c.bf16 %v3957_v18, %v3956_v0  ;;  %v3498_v40 = vadd.f32 %v7622_v33, %v3497_v43  ;;  %v3163_v38 = vpack.c.bf16 %v3095_v41, %v3094_v37 }
 0x37a   : > { %v2945_v39 = vpop.f32.mrf.mxu0  ;;  %v6043_v8 = vpop.f32.mrf.mxu1  ;;  %v2954_v16 = vadd.f32 %v7616_v46, %v6010_v57  ;;  %v3962_v31 = vmax.f32 %v3506_v56, 0.0 }
 0x37b   : > { %v3162_v54 = vpack.c.bf16 %v3093_v26, %v3092_v12  ;;  %v3509_v17 = vadd.f32 %v6043_v8, %v7622_v33  ;;  %6180 = vmatprep.mubr.bf16.mxu0 %v4078_v14  ;;  %v2946_v4 = vadd.f32 %v7616_v46, %v2945_v39  ;;  %v3960_v30 = vmax.f32 %v3498_v40, 0.0 }
 0x37c   : > { %v6011_v47 = vpop.f32.mrf.mxu0  ;;  %v3500_v11 = vpop.f32.mrf.mxu1  ;;  %6181 = vmatmul.mubr.bf16.gmra.mxu0 %v4079_v50  ;;  %v3098_v42 = vmax.f32 %v2954_v16, 0.0 }
 0x37d   : > { %v2957_v22 = vadd.f32 %v7616_v46, %v6011_v47  ;;  %v3501_v13 = vadd.f32 %v7622_v33, %v3500_v11  ;;  %6140 = vmatprep.mubr.msk.bf16.mxu1 %vm2238_vm0, %v3162_v54  ;;  %v3963_v1 = vmax.f32 %v3509_v17, 0.0  ;;  %v3096_v49 = vmax.f32 %v2946_v4, 0.0 }
 0x37e   : > { %v2948_v5 = vpop.f32.mrf.mxu0  ;;  %v6046_v63 = vpop.f32.mrf.mxu1  ;;  %6141 = vmatmul.mubr.msk.bf16.gmra.mxu1 %vm2238_vm0, %v3163_v38 }
 0x37f   : > { %v3961_v6 = vmax.f32 %v3501_v13, 0.0  ;;  %v2949_v36 = vadd.f32 %v7616_v46, %v2948_v5  ;;  %v3099_v32 = vmax.f32 %v2957_v22, 0.0  ;;  %v4081_v2 = vpack.c.bf16 %v3963_v1, %v3962_v31 }
 0x380   : > { %v6014_v9 = vpop.f32.mrf.mxu0  ;;  %v3513_v10 = vpop.f32.mrf.mxu1  ;;  %v3522_v23 = vadd.f32 %v6046_v63, %v7622_v33 }
 0x381   : > { %v4080_v35 = vpack.c.bf16 %v3961_v6, %v3960_v30  ;;  %v3097_v45 = vmax.f32 %v2949_v36, 0.0  ;;  %v3514_v7 = vadd.f32 %v7622_v33, %v3513_v10  ;;  %v3165_v61 = vpack.c.bf16 %v3099_v32, %v3098_v42 }
 0x382   : > { %v2961_v58 = vpop.f32.mrf.mxu0  ;;  %v6047_v27 = vpop.f32.mrf.mxu1  ;;  %v2970_v53 = vadd.f32 %v7616_v46, %v6014_v9  ;;  %v3966_v25 = vmax.f32 %v3522_v23, 0.0 }
 0x383   : > { %v3164_v60 = vpack.c.bf16 %v3097_v45, %v3096_v49  ;;  %v3525_v20 = vadd.f32 %v6047_v27, %v7622_v33  ;;  %6184 = vmatprep.mubr.bf16.mxu0 %v4080_v35  ;;  %v2962_v28 = vadd.f32 %v7616_v46, %v2961_v58  ;;  %v3964_v62 = vmax.f32 %v3514_v7, 0.0 }
 0x384   : > { %v6015_v29 = vpop.f32.mrf.mxu0  ;;  %v3516_v48 = vpop.f32.mrf.mxu1  ;;  %6185 = vmatmul.mubr.bf16.gmra.mxu0 %v4081_v2  ;;  %v3102_v41 = vmax.f32 %v2970_v53, 0.0 }
 0x385   : > { %v2973_v44 = vadd.f32 %v7616_v46, %v6015_v29  ;;  %v3517_v59 = vadd.f32 %v7622_v33, %v3516_v48  ;;  %6144 = vmatprep.mubr.msk.bf16.mxu1 %vm2238_vm0, %v3164_v60  ;;  %v3967_v24 = vmax.f32 %v3525_v20, 0.0  ;;  %v3100_v18 = vmax.f32 %v2962_v28, 0.0 }
 0x386   : > { %v2964_v55 = vpop.f32.mrf.mxu0  ;;  %v6050_v51 = vpop.f32.mrf.mxu1  ;;  %6145 = vmatmul.mubr.msk.bf16.gmra.mxu1 %vm2238_vm0, %v3165_v61 }
 0x387   : > { %v3965_v34 = vmax.f32 %v3517_v59, 0.0  ;;  %v2965_v3 = vadd.f32 %v7616_v46, %v2964_v55  ;;  %v3103_v15 = vmax.f32 %v2973_v44, 0.0  ;;  %v4083_v43 = vpack.c.bf16 %v3967_v24, %v3966_v25 }
 0x388   : > { %v3529_v19 = vpop.f32.mrf.mxu1  ;;  %v3538_v8 = vadd.f32 %v6050_v51, %v7622_v33 }
 0x389   : > { %v4082_v52 = vpack.c.bf16 %v3965_v34, %v3964_v62  ;;  %v3101_v0 = vmax.f32 %v2965_v3, 0.0  ;;  %v3530_v12 = vadd.f32 %v7622_v33, %v3529_v19  ;;  %v3167_v37 = vpack.c.bf16 %v3103_v15, %v3102_v41 }
 0x38a   : > { %v6051_v57 = vpop.f32.mrf.mxu1  ;;  %v3970_v38 = vmax.f32 %v3538_v8, 0.0 }
 0x38b   : > { %v3166_v21 = vpack.c.bf16 %v3101_v0, %v3100_v18  ;;  %v3541_v26 = vadd.f32 %v6051_v57, %v7622_v33  ;;  %6188 = vmatprep.mubr.bf16.mxu0 %v4082_v52  ;;  %v3968_v50 = vmax.f32 %v3530_v12, 0.0 }
 0x38c   : > { %v3532_v39 = vpop.f32.mrf.mxu1  ;;  %6189 = vmatmul.mubr.bf16.gmra.mxu0 %v4083_v43 }
 0x38d   : > { %v3533_v46 = vadd.f32 %v7622_v33, %v3532_v39  ;;  %6148 = vmatprep.mubr.msk.bf16.mxu1 %vm2238_vm0, %v3166_v21  ;;  %v3971_v54 = vmax.f32 %v3541_v26, 0.0 }
 0x38e   : > { %v6054_v14 = vpop.f32.mrf.mxu1  ;;  %6149 = vmatmul.mubr.msk.bf16.gmra.mxu1 %vm2238_vm0, %v3167_v37 }
 0x38f   : > { %v3969_v40 = vmax.f32 %v3533_v46, 0.0  ;;  %v4085_v11 = vpack.c.bf16 %v3971_v54, %v3970_v38  ;;  %v3554_v16 = vadd.f32 %v6054_v14, %v7622_v33 }
 0x390   : > { %v3545_v17 = vpop.f32.mrf.mxu1 }
 0x391   : > { %v4084_v56 = vpack.c.bf16 %v3969_v40, %v3968_v50  ;;  %v3546_v4 = vadd.f32 %v7622_v33, %v3545_v17  ;;  %v3974_v32 = vmax.f32 %v3554_v16, 0.0 }
 0x392   : > { %v6055_v47 = vpop.f32.mrf.mxu1 }
 0x393   : > { %v3557_v22 = vadd.f32 %v6055_v47, %v7622_v33  ;;  %6192 = vmatprep.mubr.bf16.mxu0 %v4084_v56  ;;  %v3972_v30 = vmax.f32 %v3546_v4, 0.0 }
 0x394   : > { %v3548_v13 = vpop.f32.mrf.mxu1  ;;  %6193 = vmatmul.mubr.bf16.gmra.mxu0 %v4085_v11 }
 0x395   : > { %v3549_v5 = vadd.f32 %v7622_v33, %v3548_v13  ;;  %v3975_v1 = vmax.f32 %v3557_v22, 0.0 }
 0x396   : > { %v6058_v63 = vpop.f32.mrf.mxu1 }
 0x397   : > { %v3973_v6 = vmax.f32 %v3549_v5, 0.0  ;;  %v4087_v31 = vpack.c.bf16 %v3975_v1, %v3974_v32  ;;  %v3570_v42 = vadd.f32 %v6058_v63, %v7622_v33 }
 0x398   : > { %v3561_v36 = vpop.f32.mrf.mxu1 }
 0x399   : > { %v4086_v9 = vpack.c.bf16 %v3973_v6, %v3972_v30  ;;  %v3562_v49 = vadd.f32 %v7622_v33, %v3561_v36  ;;  %v3978_v61 = vmax.f32 %v3570_v42, 0.0 }
 0x39a   : > { %v6059_v10 = vpop.f32.mrf.mxu1 }
 0x39b   : > { %v3573_v35 = vadd.f32 %v6059_v10, %v7622_v33  ;;  %6196 = vmatprep.mubr.bf16.mxu0 %v4086_v9  ;;  %v3976_v2 = vmax.f32 %v3562_v49, 0.0 }
 0x39c   : > { %v3564_v45 = vpop.f32.mrf.mxu1  ;;  %6197 = vmatmul.mubr.bf16.gmra.mxu0 %v4087_v31 }
 0x39d   : > { %v3565_v58 = vadd.f32 %v7622_v33, %v3564_v45  ;;  %v3979_v60 = vmax.f32 %v3573_v35, 0.0 }
 0x39e   : > { %v6062_v27 = vpop.f32.mrf.mxu1 }
 0x39f   : > { %v3977_v7 = vmax.f32 %v3565_v58, 0.0  ;;  %v4089_v48 = vpack.c.bf16 %v3979_v60, %v3978_v61  ;;  %v3586_v53 = vadd.f32 %v6062_v27, %v7622_v33 }
 0x3a0   : > { %v3577_v20 = vpop.f32.mrf.mxu1 }
 0x3a1   : > { %v4088_v23 = vpack.c.bf16 %v3977_v7, %v3976_v2  ;;  %v3578_v28 = vadd.f32 %v7622_v33, %v3577_v20  ;;  %v3982_v15 = vmax.f32 %v3586_v53, 0.0 }
 0x3a2   : > { %v6063_v29 = vpop.f32.mrf.mxu1 }
 0x3a3   : > { %v3589_v44 = vadd.f32 %v6063_v29, %v7622_v33  ;;  %6200 = vmatprep.mubr.bf16.mxu0 %v4088_v23  ;;  %v3980_v62 = vmax.f32 %v3578_v28, 0.0 }
 0x3a4   : > { %v3580_v59 = vpop.f32.mrf.mxu1  ;;  %6201 = vmatmul.mubr.bf16.gmra.mxu0 %v4089_v48 }
 0x3a5   : > { %v3581_v55 = vadd.f32 %v7622_v33, %v3580_v59  ;;  %v3983_v24 = vmax.f32 %v3589_v44, 0.0 }
 0x3a6   : > { %v6066_v51 = vpop.f32.mrf.mxu1 }
 0x3a7   : > { %v3981_v34 = vmax.f32 %v3581_v55, 0.0  ;;  %v4091_v18 = vpack.c.bf16 %v3983_v24, %v3982_v15  ;;  %v3602_v57 = vadd.f32 %v6066_v51, %v7622_v33 }
 0x3a8   : > { %v3593_v3 = vpop.f32.mrf.mxu1 }
 0x3a9   : > { %v4090_v19 = vpack.c.bf16 %v3981_v34, %v3980_v62  ;;  %v3594_v52 = vadd.f32 %v7622_v33, %v3593_v3  ;;  %v3986_v8 = vmax.f32 %v3602_v57, 0.0 }
 0x3aa   : > { %v6067_v25 = vpop.f32.mrf.mxu1 }
 0x3ab   : > { %v3605_v0 = vadd.f32 %v6067_v25, %v7622_v33  ;;  %6204 = vmatprep.mubr.bf16.mxu0 %v4090_v19  ;;  %v3984_v12 = vmax.f32 %v3594_v52, 0.0 }
 0x3ac   : > { %v3596_v41 = vpop.f32.mrf.mxu1  ;;  %6205 = vmatmul.mubr.bf16.gmra.mxu0 %v4091_v18 }
 0x3ad   : > { %v3597_v43 = vadd.f32 %v7622_v33, %v3596_v41  ;;  %v3987_v26 = vmax.f32 %v3605_v0, 0.0 }
 0x3ae   : > { %v6070_v21 = vpop.f32.mrf.mxu1 }
 0x3af   : > { %v3985_v37 = vmax.f32 %v3597_v43, 0.0  ;;  %v4093_v50 = vpack.c.bf16 %v3987_v26, %v3986_v8  ;;  %v3618_v38 = vadd.f32 %v6070_v21, %v7622_v33 }
 0x3b0   : > { %v3609_v39 = vpop.f32.mrf.mxu1 }
 0x3b1   : > { %v4092_v46 = vpack.c.bf16 %v3985_v37, %v3984_v12  ;;  %v3610_v54 = vadd.f32 %v7622_v33, %v3609_v39  ;;  %v3990_v16 = vmax.f32 %v3618_v38, 0.0 }
 0x3b2   : > { %v6071_v14 = vpop.f32.mrf.mxu1 }
 0x3b3   : > { %v3621_v40 = vadd.f32 %v6071_v14, %v7622_v33  ;;  %6208 = vmatprep.mubr.bf16.mxu0 %v4092_v46  ;;  %v3988_v11 = vmax.f32 %v3610_v54, 0.0 }
 0x3b4   : > { %v3612_v17 = vpop.f32.mrf.mxu1  ;;  %6209 = vmatmul.mubr.bf16.gmra.mxu0 %v4093_v50 }
 0x3b5   : > { %v3613_v56 = vadd.f32 %v7622_v33, %v3612_v17  ;;  %v3991_v4 = vmax.f32 %v3621_v40, 0.0 }
 0x3b6   : > { %v6074_v47 = vpop.f32.mrf.mxu1 }
 0x3b7   : > { %v3989_v22 = vmax.f32 %v3613_v56, 0.0  ;;  %v4095_v30 = vpack.c.bf16 %v3991_v4, %v3990_v16  ;;  %v3634_v32 = vadd.f32 %v6074_v47, %v7622_v33 }
 0x3b8   : > { %v3625_v13 = vpop.f32.mrf.mxu1 }
 0x3b9   : > { %v4094_v5 = vpack.c.bf16 %v3989_v22, %v3988_v11  ;;  %v3626_v1 = vadd.f32 %v7622_v33, %v3625_v13  ;;  %v3994_v42 = vmax.f32 %v3634_v32, 0.0 }
 0x3ba   : > { %v6075_v63 = vpop.f32.mrf.mxu1 }
 0x3bb   : > { %v3637_v6 = vadd.f32 %v6075_v63, %v7622_v33  ;;  %6212 = vmatprep.mubr.bf16.mxu0 %v4094_v5  ;;  %v3992_v31 = vmax.f32 %v3626_v1, 0.0 }
 0x3bc   : > { %v3628_v36 = vpop.f32.mrf.mxu1  ;;  %6213 = vmatmul.mubr.bf16.gmra.mxu0 %v4095_v30 }
 0x3bd   : > { %v3629_v9 = vadd.f32 %v7622_v33, %v3628_v36  ;;  %v3995_v49 = vmax.f32 %v3637_v6, 0.0 }
 0x3be   : > { %v6078_v10 = vpop.f32.mrf.mxu1 }
 0x3bf   : > { %v3993_v35 = vmax.f32 %v3629_v9, 0.0  ;;  %v4097_v2 = vpack.c.bf16 %v3995_v49, %v3994_v42  ;;  %v3650_v61 = vadd.f32 %v6078_v10, %v7622_v33 }
 0x3c0   : > { %v3641_v45 = vpop.f32.mrf.mxu1 }
 0x3c1   : > { %v4096_v58 = vpack.c.bf16 %v3993_v35, %v3992_v31  ;;  %v3642_v60 = vadd.f32 %v7622_v33, %v3641_v45  ;;  %v3998_v53 = vmax.f32 %v3650_v61, 0.0 }
 0x3c2   : > { %v6079_v27 = vpop.f32.mrf.mxu1 }
 0x3c3   : > { %v3653_v7 = vadd.f32 %v6079_v27, %v7622_v33  ;;  %6216 = vmatprep.mubr.bf16.mxu0 %v4096_v58  ;;  %v3996_v48 = vmax.f32 %v3642_v60, 0.0 }
 0x3c4   : > { %v3644_v20 = vpop.f32.mrf.mxu1  ;;  %6217 = vmatmul.mubr.bf16.gmra.mxu0 %v4097_v2 }
 0x3c5   : > { %v3645_v23 = vadd.f32 %v7622_v33, %v3644_v20  ;;  %v3999_v28 = vmax.f32 %v3653_v7, 0.0 }
 0x3c6   : > { %v6082_v29 = vpop.f32.mrf.mxu1 }
 0x3c7   : > { %v3997_v44 = vmax.f32 %v3645_v23, 0.0  ;;  %v4099_v62 = vpack.c.bf16 %v3999_v28, %v3998_v53  ;;  %v3666_v15 = vadd.f32 %v6082_v29, %v7622_v33 }
 0x3c8   : > { %v3657_v59 = vpop.f32.mrf.mxu1 }
 0x3c9   : > { %v4098_v55 = vpack.c.bf16 %v3997_v44, %v3996_v48  ;;  %v3658_v24 = vadd.f32 %v7622_v33, %v3657_v59  ;;  %v4002_v57 = vmax.f32 %v3666_v15, 0.0 }
 0x3ca   : > { %v6083_v51 = vpop.f32.mrf.mxu1 }
 0x3cb   : > { %v3669_v34 = vadd.f32 %v6083_v51, %v7622_v33  ;;  %6220 = vmatprep.mubr.bf16.mxu0 %v4098_v55  ;;  %v4000_v18 = vmax.f32 %v3658_v24, 0.0 }
 0x3cc   : > { %v3660_v3 = vpop.f32.mrf.mxu1  ;;  %6221 = vmatmul.mubr.bf16.gmra.mxu0 %v4099_v62 }
 0x3cd   : > { %v3661_v19 = vadd.f32 %v7622_v33, %v3660_v3  ;;  %v4003_v52 = vmax.f32 %v3669_v34, 0.0 }
 0x3ce   : > { %v6086_v25 = vpop.f32.mrf.mxu1 }
 0x3cf   : > { %v4001_v0 = vmax.f32 %v3661_v19, 0.0  ;;  %v4101_v12 = vpack.c.bf16 %v4003_v52, %v4002_v57  ;;  %v3682_v8 = vadd.f32 %v6086_v25, %v7622_v33 }
 0x3d0   : > { %v3673_v41 = vpop.f32.mrf.mxu1 }
 0x3d1   : > { %v4100_v43 = vpack.c.bf16 %v4001_v0, %v4000_v18  ;;  %v3674_v26 = vadd.f32 %v7622_v33, %v3673_v41  ;;  %v4006_v38 = vmax.f32 %v3682_v8, 0.0 }
 0x3d2   : > { %v6087_v21 = vpop.f32.mrf.mxu1 }
 0x3d3   : > { %v3685_v37 = vadd.f32 %v6087_v21, %v7622_v33  ;;  %6224 = vmatprep.mubr.bf16.mxu0 %v4100_v43  ;;  %v4004_v50 = vmax.f32 %v3674_v26, 0.0 }
 0x3d4   : > { %v3676_v39 = vpop.f32.mrf.mxu1  ;;  %6225 = vmatmul.mubr.bf16.gmra.mxu0 %v4101_v12 }
 0x3d5   : > { %v3677_v46 = vadd.f32 %v7622_v33, %v3676_v39  ;;  %v4007_v54 = vmax.f32 %v3685_v37, 0.0 }
 0x3d6   : > { %v6090_v14 = vpop.f32.mrf.mxu1 }
 0x3d7   : > { %v4005_v40 = vmax.f32 %v3677_v46, 0.0  ;;  %v4103_v11 = vpack.c.bf16 %v4007_v54, %v4006_v38  ;;  %v3698_v16 = vadd.f32 %v6090_v14, %v7622_v33 }
 0x3d8   : > { %v3689_v17 = vpop.f32.mrf.mxu1 }
 0x3d9   : > { %v4102_v56 = vpack.c.bf16 %v4005_v40, %v4004_v50  ;;  %v3690_v4 = vadd.f32 %v7622_v33, %v3689_v17  ;;  %v4010_v32 = vmax.f32 %v3698_v16, 0.0 }
 0x3da   : > { %v6091_v47 = vpop.f32.mrf.mxu1 }
 0x3db   : > { %v3701_v22 = vadd.f32 %v6091_v47, %v7622_v33  ;;  %6228 = vmatprep.mubr.bf16.mxu0 %v4102_v56  ;;  %v4008_v30 = vmax.f32 %v3690_v4, 0.0 }
 0x3dc   : > { %v3692_v13 = vpop.f32.mrf.mxu1  ;;  %6229 = vmatmul.mubr.bf16.gmra.mxu0 %v4103_v11 }
 0x3dd   : > { %v3693_v5 = vadd.f32 %v7622_v33, %v3692_v13  ;;  %v4011_v1 = vmax.f32 %v3701_v22, 0.0 }
 0x3de   : > { %v6094_v63 = vpop.f32.mrf.mxu1 }
 0x3df   : > { %v4009_v6 = vmax.f32 %v3693_v5, 0.0  ;;  %v4105_v31 = vpack.c.bf16 %v4011_v1, %v4010_v32  ;;  %v3714_v42 = vadd.f32 %v6094_v63, %v7622_v33 }
 0x3e0   : > { %v3705_v36 = vpop.f32.mrf.mxu1 }
 0x3e1   : > { %v4104_v9 = vpack.c.bf16 %v4009_v6, %v4008_v30  ;;  %v3706_v49 = vadd.f32 %v7622_v33, %v3705_v36  ;;  %v4014_v61 = vmax.f32 %v3714_v42, 0.0 }
 0x3e2   : > { %v6095_v10 = vpop.f32.mrf.mxu1 }
 0x3e3   : > { %v3717_v35 = vadd.f32 %v6095_v10, %v7622_v33  ;;  %6232 = vmatprep.mubr.bf16.mxu0 %v4104_v9  ;;  %v4012_v2 = vmax.f32 %v3706_v49, 0.0 }
 0x3e4   : > { %v3708_v45 = vpop.f32.mrf.mxu1  ;;  %6233 = vmatmul.mubr.bf16.gmra.mxu0 %v4105_v31 }
 0x3e5   : > { %v3709_v58 = vadd.f32 %v7622_v33, %v3708_v45  ;;  %v4015_v60 = vmax.f32 %v3717_v35, 0.0 }
 0x3e6   : > { %v6098_v27 = vpop.f32.mrf.mxu1 }
 0x3e7   : > { %v4013_v7 = vmax.f32 %v3709_v58, 0.0  ;;  %v4107_v48 = vpack.c.bf16 %v4015_v60, %v4014_v61  ;;  %v3730_v53 = vadd.f32 %v6098_v27, %v7622_v33 }
 0x3e8   : > { %v3721_v20 = vpop.f32.mrf.mxu1 }
 0x3e9   : > { %v4106_v23 = vpack.c.bf16 %v4013_v7, %v4012_v2  ;;  %v3722_v28 = vadd.f32 %v7622_v33, %v3721_v20  ;;  %v4018_v15 = vmax.f32 %v3730_v53, 0.0 }
 0x3ea   : > { %v6099_v29 = vpop.f32.mrf.mxu1 }
 0x3eb   : > { %v3733_v44 = vadd.f32 %v6099_v29, %v7622_v33  ;;  %6236 = vmatprep.mubr.bf16.mxu0 %v4106_v23  ;;  %v4016_v62 = vmax.f32 %v3722_v28, 0.0 }
 0x3ec   : > { %v3724_v59 = vpop.f32.mrf.mxu1  ;;  %6237 = vmatmul.mubr.bf16.gmra.mxu0 %v4107_v48 }
 0x3ed   : > { %v3725_v55 = vadd.f32 %v7622_v33, %v3724_v59  ;;  %v4019_v24 = vmax.f32 %v3733_v44, 0.0 }
 0x3ee   : > { %v6102_v51 = vpop.f32.mrf.mxu1 }
 0x3ef   : > { %v4017_v34 = vmax.f32 %v3725_v55, 0.0  ;;  %v4109_v18 = vpack.c.bf16 %v4019_v24, %v4018_v15  ;;  %v3746_v57 = vadd.f32 %v6102_v51, %v7622_v33 }
 0x3f0   : > { %v3737_v3 = vpop.f32.mrf.mxu1 }
 0x3f1   : > { %v4108_v19 = vpack.c.bf16 %v4017_v34, %v4016_v62  ;;  %v3738_v52 = vadd.f32 %v7622_v33, %v3737_v3  ;;  %v4022_v8 = vmax.f32 %v3746_v57, 0.0 }
 0x3f2   : > { %v6103_v25 = vpop.f32.mrf.mxu1 }
 0x3f3   : > { %v3749_v0 = vadd.f32 %v6103_v25, %v7622_v33  ;;  %6240 = vmatprep.mubr.bf16.mxu0 %v4108_v19  ;;  %v4020_v12 = vmax.f32 %v3738_v52, 0.0 }
 0x3f4   : > { %v3740_v41 = vpop.f32.mrf.mxu1  ;;  %6241 = vmatmul.mubr.bf16.gmra.mxu0 %v4109_v18 }
 0x3f5   : > { %v3741_v43 = vadd.f32 %v7622_v33, %v3740_v41  ;;  %v4023_v26 = vmax.f32 %v3749_v0, 0.0 }
 0x3f6   : > { %v6106_v21 = vpop.f32.mrf.mxu1 }
 0x3f7   : > { %v4021_v37 = vmax.f32 %v3741_v43, 0.0  ;;  %v4111_v50 = vpack.c.bf16 %v4023_v26, %v4022_v8  ;;  %v3762_v38 = vadd.f32 %v6106_v21, %v7622_v33 }
 0x3f8   : > { %v3753_v39 = vpop.f32.mrf.mxu1 }
 0x3f9   : > { %v4110_v46 = vpack.c.bf16 %v4021_v37, %v4020_v12  ;;  %v3754_v54 = vadd.f32 %v7622_v33, %v3753_v39  ;;  %v4026_v16 = vmax.f32 %v3762_v38, 0.0 }
 0x3fa   : > { %v6107_v14 = vpop.f32.mrf.mxu1 }
 0x3fb   : > { %v3765_v40 = vadd.f32 %v6107_v14, %v7622_v33  ;;  %6244 = vmatprep.mubr.bf16.mxu0 %v4110_v46  ;;  %v4024_v11 = vmax.f32 %v3754_v54, 0.0 }
 0x3fc   : > { %v3756_v17 = vpop.f32.mrf.mxu1  ;;  %6245 = vmatmul.mubr.bf16.gmra.mxu0 %v4111_v50 }
 0x3fd   : > { %v3757_v56 = vadd.f32 %v7622_v33, %v3756_v17  ;;  %v4027_v4 = vmax.f32 %v3765_v40, 0.0 }
 0x3fe   : > { %v6110_v47 = vpop.f32.mrf.mxu1 }
 0x3ff   : > { %v4025_v22 = vmax.f32 %v3757_v56, 0.0  ;;  %v4113_v30 = vpack.c.bf16 %v4027_v4, %v4026_v16  ;;  %v3778_v32 = vadd.f32 %v6110_v47, %v7622_v33 }
 0x400   : > { %v3769_v13 = vpop.f32.mrf.mxu1 }
 0x401   : > { %v4112_v5 = vpack.c.bf16 %v4025_v22, %v4024_v11  ;;  %v3770_v1 = vadd.f32 %v7622_v33, %v3769_v13  ;;  %v4030_v42 = vmax.f32 %v3778_v32, 0.0  ;;  %v7767_v13 = vld [vmem:[%s8081_s10] ss:$0 sm:$0xff] }
 0x402   : > { %v6111_v63 = vpop.f32.mrf.mxu1 }
 0x403   : > { %v3781_v6 = vadd.f32 %v6111_v63, %v7622_v33  ;;  %6248 = vmatprep.mubr.bf16.mxu0 %v4112_v5  ;;  %v4028_v31 = vmax.f32 %v3770_v1, 0.0 }
 0x404   : > { %v3772_v36 = vpop.f32.mrf.mxu1  ;;  %6249 = vmatmul.mubr.bf16.gmra.mxu0 %v4113_v30 }
 0x405   : > { %v3773_v9 = vadd.f32 %v7622_v33, %v3772_v36  ;;  %v4031_v49 = vmax.f32 %v3781_v6, 0.0 }
 0x406   : > { %v6114_v10 = vpop.f32.mrf.mxu1 }
 0x407   : > { %v4029_v35 = vmax.f32 %v3773_v9, 0.0  ;;  %v4115_v2 = vpack.c.bf16 %v4031_v49, %v4030_v42  ;;  %v3794_v61 = vadd.f32 %v6114_v10, %v7622_v33 }
 0x408   : > { %v3785_v45 = vpop.f32.mrf.mxu1 }
 0x409   : > { %v4114_v58 = vpack.c.bf16 %v4029_v35, %v4028_v31  ;;  %v3786_v60 = vadd.f32 %v7622_v33, %v3785_v45  ;;  %v4034_v53 = vmax.f32 %v3794_v61, 0.0 }
 0x40a   : > { %v6115_v27 = vpop.f32.mrf.mxu1 }
 0x40b   : > { %v3797_v7 = vadd.f32 %v6115_v27, %v7622_v33  ;;  %6252 = vmatprep.mubr.bf16.mxu0 %v4114_v58  ;;  %v4032_v48 = vmax.f32 %v3786_v60, 0.0 }
 0x40c   : > { %v3788_v20 = vpop.f32.mrf.mxu1  ;;  %6253 = vmatmul.mubr.bf16.gmra.mxu0 %v4115_v2  ;;  %v7777_v2 = vld [vmem:[%s8079_s8] ss:$0 sm:$0xff] }
 0x40d   : > { %v3789_v23 = vadd.f32 %v7622_v33, %v3788_v20  ;;  %v4035_v28 = vmax.f32 %v3797_v7, 0.0 }
 0x40e   : > { %v6118_v29 = vpop.f32.mrf.mxu1 }
 0x40f   : > { %v4033_v44 = vmax.f32 %v3789_v23, 0.0  ;;  %v4117_v62 = vpack.c.bf16 %v4035_v28, %v4034_v53  ;;  %v3810_v15 = vadd.f32 %v6118_v29, %v7622_v33 }
 0x410   : > { %v3801_v59 = vpop.f32.mrf.mxu1 }
 0x411   : > { %v4116_v55 = vpack.c.bf16 %v4033_v44, %v4032_v48  ;;  %v3802_v24 = vadd.f32 %v7622_v33, %v3801_v59  ;;  %v4038_v57 = vmax.f32 %v3810_v15, 0.0 }
 0x412   : > { %v6119_v51 = vpop.f32.mrf.mxu1 }
 0x413   : > { %v3813_v34 = vadd.f32 %v6119_v51, %v7622_v33  ;;  %6256 = vmatprep.mubr.bf16.mxu0 %v4116_v55  ;;  %v4036_v18 = vmax.f32 %v3802_v24, 0.0 }
 0x414   : > { %v3804_v3 = vpop.f32.mrf.mxu1  ;;  %6257 = vmatmul.mubr.bf16.gmra.mxu0 %v4117_v62 }
 0x415   : > { %v3805_v19 = vadd.f32 %v7622_v33, %v3804_v3  ;;  %v4039_v52 = vmax.f32 %v3813_v34, 0.0 }
 0x416   : > { %v6122_v25 = vpop.f32.mrf.mxu1 }
 0x417   : > { %v4037_v0 = vmax.f32 %v3805_v19, 0.0  ;;  %v4119_v12 = vpack.c.bf16 %v4039_v52, %v4038_v57  ;;  %v3826_v8 = vadd.f32 %v6122_v25, %v7622_v33 }
 0x418   : > { %v3817_v41 = vpop.f32.mrf.mxu1 }
 0x419   : > { %v4118_v43 = vpack.c.bf16 %v4037_v0, %v4036_v18  ;;  %v3818_v26 = vadd.f32 %v7622_v33, %v3817_v41  ;;  %v4042_v38 = vmax.f32 %v3826_v8, 0.0 }
 0x41a   : > { %v6123_v21 = vpop.f32.mrf.mxu1 }
 0x41b   : > { %v3829_v37 = vadd.f32 %v6123_v21, %v7622_v33  ;;  %6260 = vmatprep.mubr.bf16.mxu0 %v4118_v43  ;;  %v4040_v50 = vmax.f32 %v3818_v26, 0.0 }
 0x41c   : > { %v3820_v39 = vpop.f32.mrf.mxu1  ;;  %6261 = vmatmul.mubr.bf16.gmra.mxu0 %v4119_v12 }
 0x41d   : > { %v3821_v46 = vadd.f32 %v7622_v33, %v3820_v39  ;;  %v4043_v54 = vmax.f32 %v3829_v37, 0.0 }
 0x41e   : > { %v6126_v14 = vpop.f32.mrf.mxu1 }
 0x41f   : > { %v4041_v40 = vmax.f32 %v3821_v46, 0.0  ;;  %v4121_v11 = vpack.c.bf16 %v4043_v54, %v4042_v38  ;;  %v3842_v5 = vadd.f32 %v6126_v14, %v7622_v33 }
 0x420   : > { %v3833_v17 = vpop.f32.mrf.mxu1 }
 0x421   : > { %v4120_v56 = vpack.c.bf16 %v4041_v40, %v4040_v50  ;;  %v3834_v4 = vadd.f32 %v7622_v33, %v3833_v17  ;;  %v4046_v35 = vmax.f32 %v3842_v5, 0.0 }
 0x422   : > { %v6127_v47 = vpop.f32.mrf.mxu1 }
 0x423   : > { %v3845_v22 = vadd.f32 %v6127_v47, %v7622_v33  ;;  %6264 = vmatprep.mubr.bf16.mxu0 %v4120_v56  ;;  %v4044_v36 = vmax.f32 %v3834_v4, 0.0 }
 0x424   : > { %v3836_v16 = vpop.f32.mrf.mxu1  ;;  %v6170_v30 = vpop.f32.mrf.mxu0  ;;  %6265 = vmatmul.mubr.bf16.gmra.mxu0 %v4121_v11 }
 0x425   : > { %v3837_v63 = vadd.f32 %v7622_v33, %v3836_v16  ;;  %v4250_v1 = vadd.f32 %v6170_v30, %v7767_v13  ;;  %v4047_v32 = vmax.f32 %v3845_v22, 0.0 }
 0x426   : > { %v6130_v6 = vpop.f32.mrf.mxu1  ;;  %v4241_v10 = vpop.f32.mrf.mxu0 }
 0x427   : > { %v4045_v9 = vmax.f32 %v3837_v63, 0.0  ;;  %6352 = vtanh.f32 %v4250_v1  ;;  %v4242_v31 = vadd.f32 %v7767_v13, %v4241_v10  ;;  %v4123_v27 = vpack.c.bf16 %v4047_v32, %v4046_v35 }
 0x428   : > { %v3849_v49 = vpop.f32.mrf.mxu1  ;;  %v6171_v42 = vpop.f32.mrf.mxu0  ;;  %v3858_v29 = vadd.f32 %v7777_v2, %v6130_v6 }
 0x429   : > { %v4122_v45 = vpack.c.bf16 %v4045_v9, %v4044_v36  ;;  %6354 = vtanh.f32 %v4242_v31  ;;  %v4253_v58 = vadd.f32 %v6171_v42, %v7767_v13  ;;  %v3850_v60 = vadd.f32 %v7777_v2, %v3849_v49 }
 0x42a   : > { %v6131_v33 = vpop.f32.mrf.mxu1  ;;  %v4244_v20 = vpop.f32.mrf.mxu0  ;;  %v4050_v3 = vmax.f32 %v3858_v29, 0.0 }
 0x42b   : > { %v3861_v7 = vadd.f32 %v7777_v2, %v6131_v33  ;;  %6268 = vmatprep.mubr.bf16.mxu0 %v4122_v45  ;;  %6356 = vtanh.f32 %v4253_v58  ;;  %v4245_v61 = vadd.f32 %v7767_v13, %v4244_v20  ;;  %v4048_v53 = vmax.f32 %v3850_v60, 0.0 }
 0x42c   : > { %v3852_v23 = vpop.f32.mrf.mxu1  ;;  %v6174_v28 = vpop.f32.mrf.mxu0  ;;  %6269 = vmatmul.mubr.bf16.gmra.mxu0 %v4123_v27 }
 0x42d   : > { %v3853_v48 = vadd.f32 %v7777_v2, %v3852_v23  ;;  %6358 = vtanh.f32 %v4245_v61  ;;  %v4266_v44 = vadd.f32 %v6174_v28, %v7767_v13  ;;  %v4051_v55 = vmax.f32 %v3861_v7, 0.0 }
 0x42e   : > { %v6134_v59 = vpop.f32.mrf.mxu1  ;;  %v4257_v62 = vpop.f32.mrf.mxu0 }
 0x42f   : > { %v4049_v51 = vmax.f32 %v3853_v48, 0.0  ;;  %6360 = vtanh.f32 %v4266_v44  ;;  %v4258_v24 = vadd.f32 %v7767_v13, %v4257_v62  ;;  %v4125_v52 = vpack.c.bf16 %v4051_v55, %v4050_v3 }
 0x430   : > { %v3865_v34 = vpop.f32.mrf.mxu1  ;;  %v6175_v19 = vpop.f32.mrf.mxu0  ;;  %v3874_v26 = vadd.f32 %v7777_v2, %v6134_v59 }
 0x431   : > { %v4124_v15 = vpack.c.bf16 %v4049_v51, %v4048_v53  ;;  %6362 = vtanh.f32 %v4258_v24  ;;  %v4269_v25 = vadd.f32 %v6175_v19, %v7767_v13  ;;  %v3866_v0 = vadd.f32 %v7777_v2, %v3865_v34 }
 0x432   : > { %v6135_v18 = vpop.f32.mrf.mxu1  ;;  %v4260_v57 = vpop.f32.mrf.mxu0  ;;  %v4054_v11 = vmax.f32 %v3874_v26, 0.0 }
 0x433   : > { %v3877_v41 = vadd.f32 %v7777_v2, %v6135_v18  ;;  %6272 = vmatprep.mubr.bf16.mxu0 %v4124_v15  ;;  %6364 = vtanh.f32 %v4269_v25  ;;  %v4261_v43 = vadd.f32 %v7767_v13, %v4260_v57  ;;  %v4052_v50 = vmax.f32 %v3866_v0, 0.0 }
 0x434   : > { %v3868_v21 = vpop.f32.mrf.mxu1  ;;  %v6353_v12 = vpop.eup %6352  ;;  %6273 = vmatmul.mubr.bf16.gmra.mxu0 %v4125_v52 }
 0x435   : > { %v3869_v37 = vadd.f32 %v7777_v2, %v3868_v21  ;;  %v6178_v39 = vpop.f32.mrf.mxu0  ;;  %4882 = vst [vmem:[%s7792_s29 + $0x10] sm:$0xff] %v6353_v12  ;;  %6366 = vtanh.f32 %v4261_v43  ;;  %v4055_v54 = vmax.f32 %v3877_v41, 0.0 }
 0x436   : > { %v4282_v8 = vadd.f32 %v6178_v39, %v7767_v13  ;;  %v6138_v46 = vpop.f32.mrf.mxu1  ;;  %v6355_v14 = vpop.eup %6354 }
 0x437   : > { %v4053_v40 = vmax.f32 %v3869_v37, 0.0  ;;  %v4273_v17 = vpop.f32.mrf.mxu0  ;;  %4880 = vst [vmem:[%s7792_s29] sm:$0xff] %v6355_v14  ;;  %v4127_v30 = vpack.c.bf16 %v4055_v54, %v4054_v11  ;;  %v3890_v31 = vadd.f32 %v7777_v2, %v6138_v46 }
 0x438   : > { %6368 = vtanh.f32 %v4282_v8  ;;  %v4274_v38 = vadd.f32 %v7767_v13, %v4273_v17  ;;  %v3881_v56 = vpop.f32.mrf.mxu1  ;;  %v6357_v47 = vpop.eup %6356 }
 0x439   : > { %v4126_v4 = vpack.c.bf16 %v4053_v40, %v4052_v50  ;;  %v6179_v22 = vpop.f32.mrf.mxu0  ;;  %4883 = vst [vmem:[%s7792_s29 + $0x18] sm:$0xff] %v6357_v47  ;;  %v3882_v1 = vadd.f32 %v7777_v2, %v3881_v56  ;;  %v4058_v29 = vmax.f32 %v3890_v31, 0.0 }
 0x43a   : > { %6370 = vtanh.f32 %v4274_v38  ;;  %v4285_v16 = vadd.f32 %v6179_v22, %v7767_v13  ;;  %v6139_v5 = vpop.f32.mrf.mxu1  ;;  %v6359_v63 = vpop.eup %6358 }
 0x43b   : > { %v3893_v6 = vadd.f32 %v7777_v2, %v6139_v5  ;;  %v4276_v36 = vpop.f32.mrf.mxu0  ;;  %6276 = vmatprep.mubr.bf16.mxu0 %v4126_v4  ;;  %4881 = vst [vmem:[%s7792_s29 + $0x8] sm:$0xff] %v6359_v63  ;;  %v4056_v33 = vmax.f32 %v3882_v1, 0.0 }
 0x43c   : > { %6372 = vtanh.f32 %v4285_v16  ;;  %v4277_v32 = vadd.f32 %v7767_v13, %v4276_v36  ;;  %v3884_v9 = vpop.f32.mrf.mxu1  ;;  %v6361_v10 = vpop.eup %6360  ;;  %6277 = vmatmul.mubr.bf16.gmra.mxu0 %v4127_v30 }
 0x43d   : > { %v3885_v49 = vadd.f32 %v7777_v2, %v3884_v9  ;;  %v6182_v35 = vpop.f32.mrf.mxu0  ;;  %4886 = vst [vmem:[%s7792_s29 + $0x30] sm:$0xff] %v6361_v10  ;;  %v4059_v27 = vmax.f32 %v3893_v6, 0.0 }
 0x43e   : > { %6374 = vtanh.f32 %v4277_v32  ;;  %v4298_v45 = vadd.f32 %v6182_v35, %v7767_v13  ;;  %v6142_v42 = vpop.f32.mrf.mxu1  ;;  %v6363_v58 = vpop.eup %6362 }
 0x43f   : > { %v4057_v60 = vmax.f32 %v3885_v49, 0.0  ;;  %v4289_v7 = vpop.f32.mrf.mxu0  ;;  %4884 = vst [vmem:[%s7792_s29 + $0x20] sm:$0xff] %v6363_v58  ;;  %v4129_v55 = vpack.c.bf16 %v4059_v27, %v4058_v29  ;;  %v3906_v19 = vadd.f32 %v7777_v2, %v6142_v42 }
 0x440   : > { %6376 = vtanh.f32 %v4298_v45  ;;  %v4290_v20 = vadd.f32 %v7767_v13, %v4289_v7  ;;  %v3897_v61 = vpop.f32.mrf.mxu1  ;;  %v6365_v23 = vpop.eup %6364 }
 0x441   : > { %v4128_v48 = vpack.c.bf16 %v4057_v60, %v4056_v33  ;;  %v6183_v28 = vpop.f32.mrf.mxu0  ;;  %4887 = vst [vmem:[%s7792_s29 + $0x38] sm:$0xff] %v6365_v23  ;;  %v3898_v51 = vadd.f32 %v7777_v2, %v3897_v61  ;;  %v4062_v8 = vmax.f32 %v3906_v19, 0.0 }
 0x442   : > { %6378 = vtanh.f32 %v4290_v20  ;;  %v4301_v44 = vadd.f32 %v6183_v28, %v7767_v13  ;;  %v6143_v59 = vpop.f32.mrf.mxu1  ;;  %v6367_v53 = vpop.eup %6366 }
 0x443   : > { %v3909_v62 = vadd.f32 %v7777_v2, %v6143_v59  ;;  %v4292_v24 = vpop.f32.mrf.mxu0  ;;  %6280 = vmatprep.mubr.bf16.mxu0 %v4128_v48  ;;  %4885 = vst [vmem:[%s7792_s29 + $0x28] sm:$0xff] %v6367_v53  ;;  %v4060_v57 = vmax.f32 %v3898_v51, 0.0 }
 0x444   : > { %6380 = vtanh.f32 %v4301_v44  ;;  %v4293_v34 = vadd.f32 %v7767_v13, %v4292_v24  ;;  %v3900_v3 = vpop.f32.mrf.mxu1  ;;  %6281 = vmatmul.mubr.bf16.gmra.mxu0 %v4129_v55 }
 0x445   : > { %v6369_v15 = vpop.eup %6368  ;;  %v3901_v25 = vadd.f32 %v7777_v2, %v3900_v3  ;;  %v6186_v18 = vpop.f32.mrf.mxu0  ;;  %v4063_v43 = vmax.f32 %v3909_v62, 0.0 }
 0x446   : > { %4890 = vst [vmem:[%s7792_s29 + $0x50] sm:$0xff] %v6369_v15  ;;  %6382 = vtanh.f32 %v4293_v34  ;;  %v4314_v52 = vadd.f32 %v6186_v18, %v7767_v13  ;;  %v6146_v0 = vpop.f32.mrf.mxu1 }
 0x447   : > { %v6371_v41 = vpop.eup %6370  ;;  %v4061_v21 = vmax.f32 %v3901_v25, 0.0  ;;  %v4305_v12 = vpop.f32.mrf.mxu0  ;;  %v4131_v17 = vpack.c.bf16 %v4063_v43, %v4062_v8  ;;  %v3922_v16 = vadd.f32 %v7777_v2, %v6146_v0 }
 0x448   : > { %4888 = vst [vmem:[%s7792_s29 + $0x40] sm:$0xff] %v6371_v41  ;;  %6384 = vtanh.f32 %v4314_v52  ;;  %v4306_v26 = vadd.f32 %v7767_v13, %v4305_v12  ;;  %v3913_v37 = vpop.f32.mrf.mxu1 }
 0x449   : > { %v6373_v39 = vpop.eup %6372  ;;  %v4130_v46 = vpack.c.bf16 %v4061_v21, %v4060_v57  ;;  %v6187_v14 = vpop.f32.mrf.mxu0  ;;  %v3914_v38 = vadd.f32 %v7777_v2, %v3913_v37  ;;  %v4066_v45 = vmax.f32 %v3922_v16, 0.0 }
 0x44a   : > { %4891 = vst [vmem:[%s7792_s29 + $0x58] sm:$0xff] %v6373_v39  ;;  %6386 = vtanh.f32 %v4306_v26  ;;  %v4317_v50 = vadd.f32 %v6187_v14, %v7767_v13  ;;  %v6147_v54 = vpop.f32.mrf.mxu1 }
 0x44b   : > { %v6375_v40 = vpop.eup %6374  ;;  %v3925_v56 = vadd.f32 %v7777_v2, %v6147_v54  ;;  %v4308_v47 = vpop.f32.mrf.mxu0  ;;  %6284 = vmatprep.mubr.bf16.mxu0 %v4130_v46  ;;  %v4064_v36 = vmax.f32 %v3914_v38, 0.0 }
 0x44c   : > { %4889 = vst [vmem:[%s7792_s29 + $0x48] sm:$0xff] %v6375_v40  ;;  %6388 = vtanh.f32 %v4317_v50  ;;  %v4309_v11 = vadd.f32 %v7767_v13, %v4308_v47  ;;  %v3916_v4 = vpop.f32.mrf.mxu1  ;;  %6285 = vmatmul.mubr.bf16.gmra.mxu0 %v4131_v17 }
 0x44d   : > { %v6377_v22 = vpop.eup %6376  ;;  %v3917_v5 = vadd.f32 %v7777_v2, %v3916_v4  ;;  %v6190_v63 = vpop.f32.mrf.mxu0  ;;  %v4067_v32 = vmax.f32 %v3925_v56, 0.0 }
 0x44e   : > { %4894 = vst [vmem:[%s7792_s29 + $0x70] sm:$0xff] %v6377_v22  ;;  %6390 = vtanh.f32 %v4309_v11  ;;  %v4330_v30 = vadd.f32 %v6190_v63, %v7767_v13  ;;  %v6150_v1 = vpop.f32.mrf.mxu1 }
 0x44f   : > { %v6379_v6 = vpop.eup %6378  ;;  %v4065_v9 = vmax.f32 %v3917_v5, 0.0  ;;  %v4321_v10 = vpop.f32.mrf.mxu0  ;;  %v4133_v7 = vpack.c.bf16 %v4067_v32, %v4066_v45  ;;  %v3938_v44 = vadd.f32 %v7777_v2, %v6150_v1 }
 0x450   : > { %4892 = vst [vmem:[%s7792_s29 + $0x60] sm:$0xff] %v6379_v6  ;;  %6392 = vtanh.f32 %v4330_v30  ;;  %v4322_v31 = vadd.f32 %v7767_v13, %v4321_v10  ;;  %v3929_v49 = vpop.f32.mrf.mxu1 }
 0x451   : > { %v6381_v35 = vpop.eup %6380  ;;  %v4132_v42 = vpack.c.bf16 %v4065_v9, %v4064_v36  ;;  %v6191_v58 = vpop.f32.mrf.mxu0  ;;  %v3930_v20 = vadd.f32 %v7777_v2, %v3929_v49  ;;  %v4070_v25 = vmax.f32 %v3938_v44, 0.0 }
 0x452   : > { %4895 = vst [vmem:[%s7792_s29 + $0x78] sm:$0xff] %v6381_v35  ;;  %6394 = vtanh.f32 %v4322_v31  ;;  %v4333_v33 = vadd.f32 %v6191_v58, %v7767_v13  ;;  %v6151_v27 = vpop.f32.mrf.mxu1 }
 0x453   : > { %v6383_v60 = vpop.eup %6382  ;;  %v3941_v61 = vadd.f32 %v7777_v2, %v6151_v27  ;;  %v4324_v23 = vpop.f32.mrf.mxu0  ;;  %6288 = vmatprep.mubr.bf16.mxu0 %v4132_v42  ;;  %v4068_v62 = vmax.f32 %v3930_v20, 0.0 }
 0x454   : > { %4893 = vst [vmem:[%s7792_s29 + $0x68] sm:$0xff] %v6383_v60  ;;  %6396 = vtanh.f32 %v4333_v33  ;;  %v4325_v29 = vadd.f32 %v7767_v13, %v4324_v23  ;;  %v3932_v48 = vpop.f32.mrf.mxu1  ;;  %6289 = vmatmul.mubr.bf16.gmra.mxu0 %v4133_v7 }
 0x455   : > { %v6385_v28 = vpop.eup %6384  ;;  %v3933_v59 = vadd.f32 %v7777_v2, %v3932_v48  ;;  %v6194_v53 = vpop.f32.mrf.mxu0  ;;  %v4071_v24 = vmax.f32 %v3941_v61, 0.0 }
 0x456   : > { %4898 = vst [vmem:[%s7792_s29 + $0x90] sm:$0xff] %v6385_v28  ;;  %6398 = vtanh.f32 %v4325_v29  ;;  %v4346_v55 = vadd.f32 %v6194_v53, %v7767_v13 }
 0x457   : > { %v6387_v51 = vpop.eup %6386  ;;  %v4069_v34 = vmax.f32 %v3933_v59, 0.0  ;;  %v4337_v3 = vpop.f32.mrf.mxu0  ;;  %v4135_v41 = vpack.c.bf16 %v4071_v24, %v4070_v25 }
 0x458   : > { %4896 = vst [vmem:[%s7792_s29 + $0x80] sm:$0xff] %v6387_v51  ;;  %6400 = vtanh.f32 %v4346_v55  ;;  %v4338_v15 = vadd.f32 %v7767_v13, %v4337_v3 }
 0x459   : > { %v6389_v19 = vpop.eup %6388  ;;  %v4134_v2 = vpack.c.bf16 %v4069_v34, %v4068_v62  ;;  %v6195_v18 = vpop.f32.mrf.mxu0 }
 0x45a   : > { %4899 = vst [vmem:[%s7792_s29 + $0x98] sm:$0xff] %v6389_v19  ;;  %6402 = vtanh.f32 %v4338_v15  ;;  %v4349_v52 = vadd.f32 %v6195_v18, %v7767_v13 }
 0x45b   : > { %v6391_v0 = vpop.eup %6390  ;;  %v4340_v57 = vpop.f32.mrf.mxu0  ;;  %6292 = vmatprep.mubr.bf16.mxu0 %v4134_v2 }
 0x45c   : > { %4897 = vst [vmem:[%s7792_s29 + $0x88] sm:$0xff] %v6391_v0  ;;  %6404 = vtanh.f32 %v4349_v52  ;;  %v4341_v43 = vadd.f32 %v7767_v13, %v4340_v57  ;;  %6293 = vmatmul.mubr.bf16.gmra.mxu0 %v4135_v41 }
 0x45d   : > { %v6393_v21 = vpop.eup %6392  ;;  %v6198_v12 = vpop.f32.mrf.mxu0 }
 0x45e   : > { %4902 = vst [vmem:[%s7792_s29 + $0xb0] sm:$0xff] %v6393_v21  ;;  %6406 = vtanh.f32 %v4341_v43  ;;  %v4362_v26 = vadd.f32 %v6198_v12, %v7767_v13 }
 0x45f   : > { %v6395_v37 = vpop.eup %6394  ;;  %v4353_v39 = vpop.f32.mrf.mxu0 }
 0x460   : > { %4900 = vst [vmem:[%s7792_s29 + $0xa0] sm:$0xff] %v6395_v37  ;;  %6408 = vtanh.f32 %v4362_v26  ;;  %v4354_v8 = vadd.f32 %v7767_v13, %v4353_v39 }
 0x461   : > { %v6397_v46 = vpop.eup %6396  ;;  %v6199_v14 = vpop.f32.mrf.mxu0 }
 0x462   : > { %4903 = vst [vmem:[%s7792_s29 + $0xb8] sm:$0xff] %v6397_v46  ;;  %6410 = vtanh.f32 %v4354_v8  ;;  %v4365_v50 = vadd.f32 %v6199_v14, %v7767_v13 }
 0x463   : > { %v6399_v54 = vpop.eup %6398  ;;  %v4356_v40 = vpop.f32.mrf.mxu0 }
 0x464   : > { %4901 = vst [vmem:[%s7792_s29 + $0xa8] sm:$0xff] %v6399_v54  ;;  %6412 = vtanh.f32 %v4365_v50  ;;  %v4357_v17 = vadd.f32 %v7767_v13, %v4356_v40 }
 0x465   : > { %v6401_v38 = vpop.eup %6400  ;;  %v6202_v56 = vpop.f32.mrf.mxu0 }
 0x466   : > { %4906 = vst [vmem:[%s7792_s29 + $0xd0] sm:$0xff] %v6401_v38  ;;  %6414 = vtanh.f32 %v4357_v17  ;;  %v4378_v47 = vadd.f32 %v6202_v56, %v7767_v13 }
 0x467   : > { %v6403_v11 = vpop.eup %6402  ;;  %v4369_v4 = vpop.f32.mrf.mxu0 }
 0x468   : > { %4904 = vst [vmem:[%s7792_s29 + $0xc0] sm:$0xff] %v6403_v11  ;;  %6416 = vtanh.f32 %v4378_v47  ;;  %v4370_v22 = vadd.f32 %v7767_v13, %v4369_v4 }
 0x469   : > { %v6405_v16 = vpop.eup %6404  ;;  %v6203_v5 = vpop.f32.mrf.mxu0 }
 0x46a   : > { %4907 = vst [vmem:[%s7792_s29 + $0xd8] sm:$0xff] %v6405_v16  ;;  %6418 = vtanh.f32 %v4370_v22  ;;  %v4381_v63 = vadd.f32 %v6203_v5, %v7767_v13 }
 0x46b   : > { %v6407_v30 = vpop.eup %6406  ;;  %v4372_v1 = vpop.f32.mrf.mxu0 }
 0x46c   : > { %4905 = vst [vmem:[%s7792_s29 + $0xc8] sm:$0xff] %v6407_v30  ;;  %6420 = vtanh.f32 %v4381_v63  ;;  %v4373_v6 = vadd.f32 %v7767_v13, %v4372_v1 }
 0x46d   : > { %v6409_v36 = vpop.eup %6408  ;;  %v6206_v32 = vpop.f32.mrf.mxu0 }
 0x46e   : > { %4910 = vst [vmem:[%s7792_s29 + $0xf0] sm:$0xff] %v6409_v36  ;;  %6422 = vtanh.f32 %v4373_v6  ;;  %v4394_v9 = vadd.f32 %v6206_v32, %v7767_v13 }
 0x46f   : > { %v6411_v10 = vpop.eup %6410  ;;  %v4385_v31 = vpop.f32.mrf.mxu0 }
 0x470   : > { %4908 = vst [vmem:[%s7792_s29 + $0xe0] sm:$0xff] %v6411_v10  ;;  %6424 = vtanh.f32 %v4394_v9  ;;  %v4386_v49 = vadd.f32 %v7767_v13, %v4385_v31 }
 0x471   : > { %v6413_v35 = vpop.eup %6412  ;;  %v6207_v45 = vpop.f32.mrf.mxu0 }
 0x472   : > { %4911 = vst [vmem:[%s7792_s29 + $0xf8] sm:$0xff] %v6413_v35  ;;  %6426 = vtanh.f32 %v4386_v49  ;;  %v4397_v42 = vadd.f32 %v6207_v45, %v7767_v13 }
 0x473   : > { %v6415_v58 = vpop.eup %6414  ;;  %v4388_v33 = vpop.f32.mrf.mxu0 }
 0x474   : > { %4909 = vst [vmem:[%s7792_s29 + $0xe8] sm:$0xff] %v6415_v58  ;;  %6428 = vtanh.f32 %v4397_v42  ;;  %v4389_v27 = vadd.f32 %v7767_v13, %v4388_v33 }
 0x475   : > { %v6417_v60 = vpop.eup %6416  ;;  %v6210_v7 = vpop.f32.mrf.mxu0 }
 0x476   : > { %4914 = vst [vmem:[%s7792_s29 + $0x110] sm:$0xff] %v6417_v60  ;;  %6430 = vtanh.f32 %v4389_v27  ;;  %v4410_v20 = vadd.f32 %v6210_v7, %v7767_v13 }
 0x477   : > { %v6419_v61 = vpop.eup %6418  ;;  %v4401_v23 = vpop.f32.mrf.mxu0 }
 0x478   : > { %4912 = vst [vmem:[%s7792_s29 + $0x100] sm:$0xff] %v6419_v61  ;;  %6432 = vtanh.f32 %v4410_v20  ;;  %v4402_v29 = vadd.f32 %v7767_v13, %v4401_v23 }
 0x479   : > { %v6421_v48 = vpop.eup %6420  ;;  %v6211_v28 = vpop.f32.mrf.mxu0 }
 0x47a   : > { %4915 = vst [vmem:[%s7792_s29 + $0x118] sm:$0xff] %v6421_v48  ;;  %6434 = vtanh.f32 %v4402_v29  ;;  %v4413_v44 = vadd.f32 %v6211_v28, %v7767_v13 }
 0x47b   : > { %v6423_v59 = vpop.eup %6422  ;;  %v4404_v53 = vpop.f32.mrf.mxu0 }
 0x47c   : > { %4913 = vst [vmem:[%s7792_s29 + $0x108] sm:$0xff] %v6423_v59  ;;  %6436 = vtanh.f32 %v4413_v44  ;;  %v4405_v55 = vadd.f32 %v7767_v13, %v4404_v53 }
 0x47d   : > { %v6425_v51 = vpop.eup %6424  ;;  %v6214_v62 = vpop.f32.mrf.mxu0 }
 0x47e   : > { %4918 = vst [vmem:[%s7792_s29 + $0x130] sm:$0xff] %v6425_v51  ;;  %6438 = vtanh.f32 %v4405_v55  ;;  %v4426_v24 = vadd.f32 %v6214_v62, %v7767_v13 }
 0x47f   : > { %v6427_v34 = vpop.eup %6426  ;;  %v4417_v3 = vpop.f32.mrf.mxu0 }
 0x480   : > { %4916 = vst [vmem:[%s7792_s29 + $0x120] sm:$0xff] %v6427_v34  ;;  %6440 = vtanh.f32 %v4426_v24  ;;  %v4418_v15 = vadd.f32 %v7767_v13, %v4417_v3 }
 0x481   : > { %v6429_v19 = vpop.eup %6428  ;;  %v6215_v25 = vpop.f32.mrf.mxu0 }
 0x482   : > { %4919 = vst [vmem:[%s7792_s29 + $0x138] sm:$0xff] %v6429_v19  ;;  %6442 = vtanh.f32 %v4418_v15  ;;  %v4429_v2 = vadd.f32 %v6215_v25, %v7767_v13 }
 0x483   : > { %v6431_v18 = vpop.eup %6430  ;;  %v4420_v52 = vpop.f32.mrf.mxu0 }
 0x484   : > { %4917 = vst [vmem:[%s7792_s29 + $0x128] sm:$0xff] %v6431_v18  ;;  %6444 = vtanh.f32 %v4429_v2  ;;  %v4421_v0 = vadd.f32 %v7767_v13, %v4420_v52 }
 0x485   : > { %v6433_v41 = vpop.eup %6432  ;;  %v6218_v57 = vpop.f32.mrf.mxu0 }
 0x486   : > { %4922 = vst [vmem:[%s7792_s29 + $0x150] sm:$0xff] %v6433_v41  ;;  %6446 = vtanh.f32 %v4421_v0  ;;  %v4442_v43 = vadd.f32 %v6218_v57, %v7767_v13 }
 0x487   : > { %v6435_v21 = vpop.eup %6434  ;;  %v4433_v12 = vpop.f32.mrf.mxu0 }
 0x488   : > { %4920 = vst [vmem:[%s7792_s29 + $0x140] sm:$0xff] %v6435_v21  ;;  %6448 = vtanh.f32 %v4442_v43  ;;  %v4434_v26 = vadd.f32 %v7767_v13, %v4433_v12 }
 0x489   : > { %v6437_v37 = vpop.eup %6436  ;;  %v6219_v39 = vpop.f32.mrf.mxu0 }
 0x48a   : > { %4923 = vst [vmem:[%s7792_s29 + $0x158] sm:$0xff] %v6437_v37  ;;  %6450 = vtanh.f32 %v4434_v26  ;;  %v4445_v8 = vadd.f32 %v6219_v39, %v7767_v13 }
 0x48b   : > { %v6439_v46 = vpop.eup %6438  ;;  %v4436_v14 = vpop.f32.mrf.mxu0 }
 0x48c   : > { %4921 = vst [vmem:[%s7792_s29 + $0x148] sm:$0xff] %v6439_v46  ;;  %6452 = vtanh.f32 %v4445_v8  ;;  %v4437_v50 = vadd.f32 %v7767_v13, %v4436_v14 }
 0x48d   : > { %v6441_v54 = vpop.eup %6440  ;;  %v6222_v40 = vpop.f32.mrf.mxu0 }
 0x48e   : > { %4926 = vst [vmem:[%s7792_s29 + $0x170] sm:$0xff] %v6441_v54  ;;  %6454 = vtanh.f32 %v4437_v50  ;;  %v4458_v17 = vadd.f32 %v6222_v40, %v7767_v13 }
 0x48f   : > { %v6443_v38 = vpop.eup %6442  ;;  %v4449_v56 = vpop.f32.mrf.mxu0 }
 0x490   : > { %4924 = vst [vmem:[%s7792_s29 + $0x160] sm:$0xff] %v6443_v38  ;;  %6456 = vtanh.f32 %v4458_v17  ;;  %v4450_v47 = vadd.f32 %v7767_v13, %v4449_v56 }
 0x491   : > { %v6445_v11 = vpop.eup %6444  ;;  %v6223_v4 = vpop.f32.mrf.mxu0 }
 0x492   : > { %4927 = vst [vmem:[%s7792_s29 + $0x178] sm:$0xff] %v6445_v11  ;;  %6458 = vtanh.f32 %v4450_v47  ;;  %v4461_v22 = vadd.f32 %v6223_v4, %v7767_v13 }
 0x493   : > { %v6447_v16 = vpop.eup %6446  ;;  %v4452_v5 = vpop.f32.mrf.mxu0 }
 0x494   : > { %4925 = vst [vmem:[%s7792_s29 + $0x168] sm:$0xff] %v6447_v16  ;;  %6460 = vtanh.f32 %v4461_v22  ;;  %v4453_v63 = vadd.f32 %v7767_v13, %v4452_v5 }
 0x495   : > { %v6449_v30 = vpop.eup %6448  ;;  %v6226_v1 = vpop.f32.mrf.mxu0 }
 0x496   : > { %4930 = vst [vmem:[%s7792_s29 + $0x190] sm:$0xff] %v6449_v30  ;;  %6462 = vtanh.f32 %v4453_v63  ;;  %v4474_v6 = vadd.f32 %v6226_v1, %v7767_v13 }
 0x497   : > { %v6451_v36 = vpop.eup %6450  ;;  %v4465_v32 = vpop.f32.mrf.mxu0 }
 0x498   : > { %4928 = vst [vmem:[%s7792_s29 + $0x180] sm:$0xff] %v6451_v36  ;;  %6464 = vtanh.f32 %v4474_v6  ;;  %v4466_v9 = vadd.f32 %v7767_v13, %v4465_v32 }
 0x499   : > { %v6453_v10 = vpop.eup %6452  ;;  %v6227_v31 = vpop.f32.mrf.mxu0 }
 0x49a   : > { %4931 = vst [vmem:[%s7792_s29 + $0x198] sm:$0xff] %v6453_v10  ;;  %6466 = vtanh.f32 %v4466_v9  ;;  %v4477_v49 = vadd.f32 %v6227_v31, %v7767_v13 }
 0x49b   : > { %v6455_v35 = vpop.eup %6454  ;;  %v4468_v45 = vpop.f32.mrf.mxu0 }
 0x49c   : > { %4929 = vst [vmem:[%s7792_s29 + $0x188] sm:$0xff] %v6455_v35  ;;  %6468 = vtanh.f32 %v4477_v49  ;;  %v4469_v42 = vadd.f32 %v7767_v13, %v4468_v45 }
 0x49d   : > { %v6457_v58 = vpop.eup %6456  ;;  %v6230_v33 = vpop.f32.mrf.mxu0 }
 0x49e   : > { %4934 = vst [vmem:[%s7792_s29 + $0x1b0] sm:$0xff] %v6457_v58  ;;  %6470 = vtanh.f32 %v4469_v42  ;;  %v4490_v27 = vadd.f32 %v6230_v33, %v7767_v13 }
 0x49f   : > { %v6459_v60 = vpop.eup %6458  ;;  %v4481_v7 = vpop.f32.mrf.mxu0 }
 0x4a0   : > { %4932 = vst [vmem:[%s7792_s29 + $0x1a0] sm:$0xff] %v6459_v60  ;;  %6472 = vtanh.f32 %v4490_v27  ;;  %v4482_v20 = vadd.f32 %v7767_v13, %v4481_v7 }
 0x4a1   : > { %v6461_v61 = vpop.eup %6460  ;;  %v6231_v23 = vpop.f32.mrf.mxu0 }
 0x4a2   : > { %4935 = vst [vmem:[%s7792_s29 + $0x1b8] sm:$0xff] %v6461_v61  ;;  %6474 = vtanh.f32 %v4482_v20  ;;  %v4493_v29 = vadd.f32 %v6231_v23, %v7767_v13 }
 0x4a3   : > { %v6463_v48 = vpop.eup %6462  ;;  %v4484_v28 = vpop.f32.mrf.mxu0 }
 0x4a4   : > { %4933 = vst [vmem:[%s7792_s29 + $0x1a8] sm:$0xff] %v6463_v48  ;;  %6476 = vtanh.f32 %v4493_v29  ;;  %v4485_v44 = vadd.f32 %v7767_v13, %v4484_v28  ;;  %v7969_v29 = vld [vmem:[%s8081_s10] ss:$0 sm:$0xff] }
 0x4a5   : > { %v6465_v59 = vpop.eup %6464  ;;  %v6234_v53 = vpop.f32.mrf.mxu0 }
 0x4a6   : > { %4938 = vst [vmem:[%s7792_s29 + $0x1d0] sm:$0xff] %v6465_v59  ;;  %6478 = vtanh.f32 %v4485_v44  ;;  %v4506_v55 = vadd.f32 %v6234_v53, %v7767_v13 }
 0x4a7   : > { %v6467_v51 = vpop.eup %6466  ;;  %v4497_v62 = vpop.f32.mrf.mxu0 }
 0x4a8   : > { %4936 = vst [vmem:[%s7792_s29 + $0x1c0] sm:$0xff] %v6467_v51  ;;  %6480 = vtanh.f32 %v4506_v55  ;;  %v4498_v24 = vadd.f32 %v7767_v13, %v4497_v62 }
 0x4a9   : > { %v6469_v34 = vpop.eup %6468  ;;  %v6235_v3 = vpop.f32.mrf.mxu0 }
 0x4aa   : > { %4939 = vst [vmem:[%s7792_s29 + $0x1d8] sm:$0xff] %v6469_v34  ;;  %6482 = vtanh.f32 %v4498_v24  ;;  %v4509_v15 = vadd.f32 %v6235_v3, %v7767_v13 }
 0x4ab   : > { %v6471_v19 = vpop.eup %6470  ;;  %v4500_v25 = vpop.f32.mrf.mxu0 }
 0x4ac   : > { %4937 = vst [vmem:[%s7792_s29 + $0x1c8] sm:$0xff] %v6471_v19  ;;  %6484 = vtanh.f32 %v4509_v15  ;;  %v4501_v2 = vadd.f32 %v7767_v13, %v4500_v25 }
 0x4ad   : > { %v6473_v18 = vpop.eup %6472  ;;  %v6238_v52 = vpop.f32.mrf.mxu0 }
 0x4ae   : > { %4942 = vst [vmem:[%s7792_s29 + $0x1f0] sm:$0xff] %v6473_v18  ;;  %6486 = vtanh.f32 %v4501_v2  ;;  %v4522_v0 = vadd.f32 %v6238_v52, %v7767_v13 }
 0x4af   : > { %v6475_v41 = vpop.eup %6474  ;;  %v4513_v57 = vpop.f32.mrf.mxu0 }
 0x4b0   : > { %4940 = vst [vmem:[%s7792_s29 + $0x1e0] sm:$0xff] %v6475_v41  ;;  %6488 = vtanh.f32 %v4522_v0  ;;  %v4514_v43 = vadd.f32 %v7767_v13, %v4513_v57 }
 0x4b1   : > { %v6477_v21 = vpop.eup %6476  ;;  %v6239_v12 = vpop.f32.mrf.mxu0 }
 0x4b2   : > { %4943 = vst [vmem:[%s7792_s29 + $0x1f8] sm:$0xff] %v6477_v21  ;;  %6490 = vtanh.f32 %v4514_v43  ;;  %v4525_v26 = vadd.f32 %v6239_v12, %v7767_v13 }
 0x4b3   : > { %v6479_v37 = vpop.eup %6478  ;;  %v4516_v39 = vpop.f32.mrf.mxu0 }
 0x4b4   : > { %4941 = vst [vmem:[%s7792_s29 + $0x1e8] sm:$0xff] %v6479_v37  ;;  %6492 = vtanh.f32 %v4525_v26  ;;  %v4517_v8 = vadd.f32 %v7767_v13, %v4516_v39 }
 0x4b5   : > { %v6481_v46 = vpop.eup %6480  ;;  %v6242_v14 = vpop.f32.mrf.mxu0 }
 0x4b6   : > { %4946 = vst [vmem:[%s7792_s29 + $0x210] sm:$0xff] %v6481_v46  ;;  %6494 = vtanh.f32 %v4517_v8  ;;  %v4538_v50 = vadd.f32 %v6242_v14, %v7767_v13 }
 0x4b7   : > { %v6483_v54 = vpop.eup %6482  ;;  %v4529_v40 = vpop.f32.mrf.mxu0 }
 0x4b8   : > { %4944 = vst [vmem:[%s7792_s29 + $0x200] sm:$0xff] %v6483_v54  ;;  %6496 = vtanh.f32 %v4538_v50  ;;  %v4530_v17 = vadd.f32 %v7767_v13, %v4529_v40 }
 0x4b9   : > { %v6485_v38 = vpop.eup %6484  ;;  %v6243_v56 = vpop.f32.mrf.mxu0 }
 0x4ba   : > { %4947 = vst [vmem:[%s7792_s29 + $0x218] sm:$0xff] %v6485_v38  ;;  %6498 = vtanh.f32 %v4530_v17  ;;  %v4541_v47 = vadd.f32 %v6243_v56, %v7767_v13 }
 0x4bb   : > { %v6487_v11 = vpop.eup %6486  ;;  %v4532_v4 = vpop.f32.mrf.mxu0 }
 0x4bc   : > { %4945 = vst [vmem:[%s7792_s29 + $0x208] sm:$0xff] %v6487_v11  ;;  %6500 = vtanh.f32 %v4541_v47  ;;  %v4533_v22 = vadd.f32 %v7767_v13, %v4532_v4 }
 0x4bd   : > { %v6489_v16 = vpop.eup %6488  ;;  %v6246_v5 = vpop.f32.mrf.mxu0 }
 0x4be   : > { %4950 = vst [vmem:[%s7792_s29 + $0x230] sm:$0xff] %v6489_v16  ;;  %6502 = vtanh.f32 %v4533_v22  ;;  %v4554_v63 = vadd.f32 %v6246_v5, %v7767_v13 }
 0x4bf   : > { %v6491_v30 = vpop.eup %6490  ;;  %v4545_v1 = vpop.f32.mrf.mxu0 }
 0x4c0   : > { %4948 = vst [vmem:[%s7792_s29 + $0x220] sm:$0xff] %v6491_v30  ;;  %6504 = vtanh.f32 %v4554_v63  ;;  %v4546_v6 = vadd.f32 %v7767_v13, %v4545_v1 }
 0x4c1   : > { %v6493_v36 = vpop.eup %6492  ;;  %v6247_v32 = vpop.f32.mrf.mxu0 }
 0x4c2   : > { %4951 = vst [vmem:[%s7792_s29 + $0x238] sm:$0xff] %v6493_v36  ;;  %6506 = vtanh.f32 %v4546_v6  ;;  %v4557_v9 = vadd.f32 %v6247_v32, %v7767_v13 }
 0x4c3   : > { %v6495_v10 = vpop.eup %6494  ;;  %v4548_v31 = vpop.f32.mrf.mxu0 }
 0x4c4   : > { %4949 = vst [vmem:[%s7792_s29 + $0x228] sm:$0xff] %v6495_v10  ;;  %6508 = vtanh.f32 %v4557_v9  ;;  %v4549_v49 = vadd.f32 %v7767_v13, %v4548_v31 }
 0x4c5   : > { %v6497_v35 = vpop.eup %6496  ;;  %v6250_v45 = vpop.f32.mrf.mxu0 }
 0x4c6   : > { %4954 = vst [vmem:[%s7792_s29 + $0x250] sm:$0xff] %v6497_v35  ;;  %6510 = vtanh.f32 %v4549_v49  ;;  %v4570_v42 = vadd.f32 %v6250_v45, %v7767_v13 }
 0x4c7   : > { %v6499_v58 = vpop.eup %6498  ;;  %v4561_v33 = vpop.f32.mrf.mxu0 }
 0x4c8   : > { %4952 = vst [vmem:[%s7792_s29 + $0x240] sm:$0xff] %v6499_v58  ;;  %6512 = vtanh.f32 %v4570_v42  ;;  %v4562_v27 = vadd.f32 %v7767_v13, %v4561_v33 }
 0x4c9   : > { %v6501_v60 = vpop.eup %6500  ;;  %v6251_v7 = vpop.f32.mrf.mxu0 }
 0x4ca   : > { %4955 = vst [vmem:[%s7792_s29 + $0x258] sm:$0xff] %v6501_v60  ;;  %6514 = vtanh.f32 %v4562_v27  ;;  %v4573_v20 = vadd.f32 %v6251_v7, %v7767_v13 }
 0x4cb   : > { %v6503_v61 = vpop.eup %6502  ;;  %v4564_v23 = vpop.f32.mrf.mxu0 }
 0x4cc   : > { %4953 = vst [vmem:[%s7792_s29 + $0x248] sm:$0xff] %v6503_v61  ;;  %6516 = vtanh.f32 %v4573_v20  ;;  %v4565_v48 = vadd.f32 %v7969_v29, %v4564_v23 }
 0x4cd   : > { %v6505_v28 = vpop.eup %6504  ;;  %v6254_v44 = vpop.f32.mrf.mxu0 }
 0x4ce   : > { %4958 = vst [vmem:[%s7792_s29 + $0x270] sm:$0xff] %v6505_v28  ;;  %6518 = vtanh.f32 %v4565_v48  ;;  %v4586_v59 = vadd.f32 %v7969_v29, %v6254_v44 }
 0x4cf   : > { %v6507_v13 = vpop.eup %6506  ;;  %v4577_v53 = vpop.f32.mrf.mxu0 }
 0x4d0   : > { %4956 = vst [vmem:[%s7792_s29 + $0x260] sm:$0xff] %v6507_v13  ;;  %6520 = vtanh.f32 %v4586_v59  ;;  %v4578_v55 = vadd.f32 %v7969_v29, %v4577_v53 }
 0x4d1   : > { %v6509_v51 = vpop.eup %6508  ;;  %v6255_v62 = vpop.f32.mrf.mxu0 }
 0x4d2   : > { %4959 = vst [vmem:[%s7792_s29 + $0x278] sm:$0xff] %v6509_v51  ;;  %6522 = vtanh.f32 %v4578_v55  ;;  %v4589_v24 = vadd.f32 %v7969_v29, %v6255_v62 }
 0x4d3   : > { %v6511_v34 = vpop.eup %6510  ;;  %v4580_v3 = vpop.f32.mrf.mxu0 }
 0x4d4   : > { %4957 = vst [vmem:[%s7792_s29 + $0x268] sm:$0xff] %v6511_v34  ;;  %6524 = vtanh.f32 %v4589_v24  ;;  %v4581_v15 = vadd.f32 %v7969_v29, %v4580_v3 }
 0x4d5   : > { %v6513_v19 = vpop.eup %6512  ;;  %v6258_v25 = vpop.f32.mrf.mxu0 }
 0x4d6   : > { %4962 = vst [vmem:[%s7792_s29 + $0x290] sm:$0xff] %v6513_v19  ;;  %6526 = vtanh.f32 %v4581_v15  ;;  %v4602_v2 = vadd.f32 %v7969_v29, %v6258_v25 }
 0x4d7   : > { %v6515_v18 = vpop.eup %6514  ;;  %v4593_v52 = vpop.f32.mrf.mxu0 }
 0x4d8   : > { %4960 = vst [vmem:[%s7792_s29 + $0x280] sm:$0xff] %v6515_v18  ;;  %6528 = vtanh.f32 %v4602_v2  ;;  %v4594_v0 = vadd.f32 %v7969_v29, %v4593_v52 }
 0x4d9   : > { %v6517_v41 = vpop.eup %6516  ;;  %v6259_v57 = vpop.f32.mrf.mxu0 }
 0x4da   : > { %4963 = vst [vmem:[%s7792_s29 + $0x298] sm:$0xff] %v6517_v41  ;;  %6530 = vtanh.f32 %v4594_v0  ;;  %v4605_v43 = vadd.f32 %v7969_v29, %v6259_v57 }
 0x4db   : > { %v6519_v21 = vpop.eup %6518  ;;  %v4596_v12 = vpop.f32.mrf.mxu0 }
 0x4dc   : > { %4961 = vst [vmem:[%s7792_s29 + $0x288] sm:$0xff] %v6519_v21  ;;  %6532 = vtanh.f32 %v4605_v43  ;;  %v4597_v26 = vadd.f32 %v7969_v29, %v4596_v12 }
 0x4dd   : > { %v6521_v37 = vpop.eup %6520  ;;  %v6262_v39 = vpop.f32.mrf.mxu0 }
 0x4de   : > { %4966 = vst [vmem:[%s7792_s29 + $0x2b0] sm:$0xff] %v6521_v37  ;;  %6534 = vtanh.f32 %v4597_v26  ;;  %v4618_v8 = vadd.f32 %v7969_v29, %v6262_v39 }
 0x4df   : > { %v6523_v46 = vpop.eup %6522  ;;  %v4609_v14 = vpop.f32.mrf.mxu0 }
 0x4e0   : > { %4964 = vst [vmem:[%s7792_s29 + $0x2a0] sm:$0xff] %v6523_v46  ;;  %6536 = vtanh.f32 %v4618_v8  ;;  %v4610_v50 = vadd.f32 %v7969_v29, %v4609_v14 }
 0x4e1   : > { %v6525_v54 = vpop.eup %6524  ;;  %v6263_v40 = vpop.f32.mrf.mxu0 }
 0x4e2   : > { %4967 = vst [vmem:[%s7792_s29 + $0x2b8] sm:$0xff] %v6525_v54  ;;  %6538 = vtanh.f32 %v4610_v50  ;;  %v4621_v17 = vadd.f32 %v7969_v29, %v6263_v40 }
 0x4e3   : > { %v6527_v38 = vpop.eup %6526  ;;  %v4612_v56 = vpop.f32.mrf.mxu0 }
 0x4e4   : > { %4965 = vst [vmem:[%s7792_s29 + $0x2a8] sm:$0xff] %v6527_v38  ;;  %6540 = vtanh.f32 %v4621_v17  ;;  %v4613_v47 = vadd.f32 %v7969_v29, %v4612_v56 }
 0x4e5   : > { %v6529_v11 = vpop.eup %6528  ;;  %v6266_v4 = vpop.f32.mrf.mxu0 }
 0x4e6   : > { %4970 = vst [vmem:[%s7792_s29 + $0x2d0] sm:$0xff] %v6529_v11  ;;  %6542 = vtanh.f32 %v4613_v47  ;;  %v4634_v22 = vadd.f32 %v7969_v29, %v6266_v4 }
 0x4e7   : > { %v6531_v16 = vpop.eup %6530  ;;  %v4625_v5 = vpop.f32.mrf.mxu0 }
 0x4e8   : > { %4968 = vst [vmem:[%s7792_s29 + $0x2c0] sm:$0xff] %v6531_v16  ;;  %6544 = vtanh.f32 %v4634_v22  ;;  %v4626_v63 = vadd.f32 %v7969_v29, %v4625_v5 }
 0x4e9   : > { %v6533_v30 = vpop.eup %6532  ;;  %v6267_v1 = vpop.f32.mrf.mxu0 }
 0x4ea   : > { %4971 = vst [vmem:[%s7792_s29 + $0x2d8] sm:$0xff] %v6533_v30  ;;  %6546 = vtanh.f32 %v4626_v63  ;;  %v4637_v6 = vadd.f32 %v7969_v29, %v6267_v1 }
 0x4eb   : > { %v6535_v36 = vpop.eup %6534  ;;  %v4628_v32 = vpop.f32.mrf.mxu0 }
 0x4ec   : > { %4969 = vst [vmem:[%s7792_s29 + $0x2c8] sm:$0xff] %v6535_v36  ;;  %6548 = vtanh.f32 %v4637_v6  ;;  %v4629_v9 = vadd.f32 %v7969_v29, %v4628_v32 }
 0x4ed   : > { %v6537_v10 = vpop.eup %6536  ;;  %v6270_v31 = vpop.f32.mrf.mxu0 }
 0x4ee   : > { %4974 = vst [vmem:[%s7792_s29 + $0x2f0] sm:$0xff] %v6537_v10  ;;  %6550 = vtanh.f32 %v4629_v9  ;;  %v4650_v49 = vadd.f32 %v7969_v29, %v6270_v31 }
 0x4ef   : > { %v6539_v35 = vpop.eup %6538  ;;  %v4641_v45 = vpop.f32.mrf.mxu0 }
 0x4f0   : > { %4972 = vst [vmem:[%s7792_s29 + $0x2e0] sm:$0xff] %v6539_v35  ;;  %6552 = vtanh.f32 %v4650_v49  ;;  %v4642_v42 = vadd.f32 %v7969_v29, %v4641_v45 }
 0x4f1   : > { %v6541_v58 = vpop.eup %6540  ;;  %v6271_v33 = vpop.f32.mrf.mxu0 }
 0x4f2   : > { %4975 = vst [vmem:[%s7792_s29 + $0x2f8] sm:$0xff] %v6541_v58  ;;  %6554 = vtanh.f32 %v4642_v42  ;;  %v4653_v27 = vadd.f32 %v7969_v29, %v6271_v33 }
 0x4f3   : > { %v6543_v60 = vpop.eup %6542  ;;  %v4644_v7 = vpop.f32.mrf.mxu0 }
 0x4f4   : > { %4973 = vst [vmem:[%s7792_s29 + $0x2e8] sm:$0xff] %v6543_v60  ;;  %6556 = vtanh.f32 %v4653_v27  ;;  %v4645_v20 = vadd.f32 %v7969_v29, %v4644_v7 }
 0x4f5   : > { %v6545_v61 = vpop.eup %6544  ;;  %v6274_v23 = vpop.f32.mrf.mxu0 }
 0x4f6   : > { %4978 = vst [vmem:[%s7792_s29 + $0x310] sm:$0xff] %v6545_v61  ;;  %6558 = vtanh.f32 %v4645_v20  ;;  %v4666_v48 = vadd.f32 %v7969_v29, %v6274_v23 }
 0x4f7   : > { %v6547_v28 = vpop.eup %6546  ;;  %v4657_v44 = vpop.f32.mrf.mxu0 }
 0x4f8   : > { %4976 = vst [vmem:[%s7792_s29 + $0x300] sm:$0xff] %v6547_v28  ;;  %6560 = vtanh.f32 %v4666_v48  ;;  %v4658_v59 = vadd.f32 %v7969_v29, %v4657_v44 }
 0x4f9   : > { %v6549_v13 = vpop.eup %6548  ;;  %v6275_v53 = vpop.f32.mrf.mxu0 }
 0x4fa   : > { %4979 = vst [vmem:[%s7792_s29 + $0x318] sm:$0xff] %v6549_v13  ;;  %6562 = vtanh.f32 %v4658_v59  ;;  %v4669_v55 = vadd.f32 %v7969_v29, %v6275_v53 }
 0x4fb   : > { %v6551_v51 = vpop.eup %6550  ;;  %v4660_v62 = vpop.f32.mrf.mxu0 }
 0x4fc   : > { %4977 = vst [vmem:[%s7792_s29 + $0x308] sm:$0xff] %v6551_v51  ;;  %6564 = vtanh.f32 %v4669_v55  ;;  %v4661_v24 = vadd.f32 %v7969_v29, %v4660_v62 }
 0x4fd   : > { %v6553_v34 = vpop.eup %6552  ;;  %v6278_v3 = vpop.f32.mrf.mxu0 }
 0x4fe   : > { %4982 = vst [vmem:[%s7792_s29 + $0x330] sm:$0xff] %v6553_v34  ;;  %6566 = vtanh.f32 %v4661_v24  ;;  %v4682_v15 = vadd.f32 %v7969_v29, %v6278_v3 }
 0x4ff   : > { %v6555_v19 = vpop.eup %6554  ;;  %v4673_v25 = vpop.f32.mrf.mxu0 }
 0x500   : > { %4980 = vst [vmem:[%s7792_s29 + $0x320] sm:$0xff] %v6555_v19  ;;  %6568 = vtanh.f32 %v4682_v15  ;;  %v4674_v2 = vadd.f32 %v7969_v29, %v4673_v25 }
 0x501   : > { %v6557_v18 = vpop.eup %6556  ;;  %v6279_v52 = vpop.f32.mrf.mxu0 }
 0x502   : > { %4983 = vst [vmem:[%s7792_s29 + $0x338] sm:$0xff] %v6557_v18  ;;  %6570 = vtanh.f32 %v4674_v2  ;;  %v4685_v0 = vadd.f32 %v7969_v29, %v6279_v52 }
 0x503   : > { %v6559_v41 = vpop.eup %6558  ;;  %v4676_v57 = vpop.f32.mrf.mxu0 }
 0x504   : > { %4981 = vst [vmem:[%s7792_s29 + $0x328] sm:$0xff] %v6559_v41  ;;  %6572 = vtanh.f32 %v4685_v0  ;;  %v4677_v43 = vadd.f32 %v7969_v29, %v4676_v57 }
 0x505   : > { %v6561_v21 = vpop.eup %6560  ;;  %v6282_v12 = vpop.f32.mrf.mxu0 }
 0x506   : > { %4986 = vst [vmem:[%s7792_s29 + $0x350] sm:$0xff] %v6561_v21  ;;  %6574 = vtanh.f32 %v4677_v43  ;;  %v4698_v26 = vadd.f32 %v7969_v29, %v6282_v12 }
 0x507   : > { %v6563_v37 = vpop.eup %6562  ;;  %v4689_v39 = vpop.f32.mrf.mxu0 }
 0x508   : > { %4984 = vst [vmem:[%s7792_s29 + $0x340] sm:$0xff] %v6563_v37  ;;  %6576 = vtanh.f32 %v4698_v26  ;;  %v4690_v8 = vadd.f32 %v7969_v29, %v4689_v39 }
 0x509   : > { %v6565_v46 = vpop.eup %6564  ;;  %v6283_v14 = vpop.f32.mrf.mxu0 }
 0x50a   : > { %4987 = vst [vmem:[%s7792_s29 + $0x358] sm:$0xff] %v6565_v46  ;;  %6578 = vtanh.f32 %v4690_v8  ;;  %v4701_v50 = vadd.f32 %v7969_v29, %v6283_v14 }
 0x50b   : > { %v6567_v54 = vpop.eup %6566  ;;  %v4692_v40 = vpop.f32.mrf.mxu0 }
 0x50c   : > { %4985 = vst [vmem:[%s7792_s29 + $0x348] sm:$0xff] %v6567_v54  ;;  %6580 = vtanh.f32 %v4701_v50  ;;  %v4693_v17 = vadd.f32 %v7969_v29, %v4692_v40 }
 0x50d   : > { %v6569_v38 = vpop.eup %6568  ;;  %v6286_v56 = vpop.f32.mrf.mxu0 }
 0x50e   : > { %4990 = vst [vmem:[%s7792_s29 + $0x370] sm:$0xff] %v6569_v38  ;;  %6582 = vtanh.f32 %v4693_v17  ;;  %v4714_v47 = vadd.f32 %v7969_v29, %v6286_v56 }
 0x50f   : > { %v6571_v11 = vpop.eup %6570  ;;  %v4705_v4 = vpop.f32.mrf.mxu0 }
 0x510   : > { %4988 = vst [vmem:[%s7792_s29 + $0x360] sm:$0xff] %v6571_v11  ;;  %6584 = vtanh.f32 %v4714_v47  ;;  %v4706_v22 = vadd.f32 %v7969_v29, %v4705_v4 }
 0x511   : > { %v6573_v16 = vpop.eup %6572  ;;  %v6287_v5 = vpop.f32.mrf.mxu0 }
 0x512   : > { %4991 = vst [vmem:[%s7792_s29 + $0x378] sm:$0xff] %v6573_v16  ;;  %6586 = vtanh.f32 %v4706_v22  ;;  %v4717_v63 = vadd.f32 %v7969_v29, %v6287_v5 }
 0x513   : > { %v6575_v30 = vpop.eup %6574  ;;  %v4708_v1 = vpop.f32.mrf.mxu0 }
 0x514   : > { %4989 = vst [vmem:[%s7792_s29 + $0x368] sm:$0xff] %v6575_v30  ;;  %6588 = vtanh.f32 %v4717_v63  ;;  %v4709_v6 = vadd.f32 %v7969_v29, %v4708_v1 }
 0x515   : > { %v6577_v36 = vpop.eup %6576  ;;  %v6290_v32 = vpop.f32.mrf.mxu0 }
 0x516   : > { %4994 = vst [vmem:[%s7792_s29 + $0x390] sm:$0xff] %v6577_v36  ;;  %6590 = vtanh.f32 %v4709_v6  ;;  %v4730_v9 = vadd.f32 %v7969_v29, %v6290_v32 }
 0x517   : > { %v6579_v10 = vpop.eup %6578  ;;  %v4721_v31 = vpop.f32.mrf.mxu0 }
 0x518   : > { %4992 = vst [vmem:[%s7792_s29 + $0x380] sm:$0xff] %v6579_v10  ;;  %6592 = vtanh.f32 %v4730_v9  ;;  %v4722_v49 = vadd.f32 %v7969_v29, %v4721_v31 }
 0x519   : > { %v6581_v35 = vpop.eup %6580  ;;  %v6291_v45 = vpop.f32.mrf.mxu0 }
 0x51a   : > { %4995 = vst [vmem:[%s7792_s29 + $0x398] sm:$0xff] %v6581_v35  ;;  %6594 = vtanh.f32 %v4722_v49  ;;  %v4733_v42 = vadd.f32 %v7969_v29, %v6291_v45 }
 0x51b   : > { %v6583_v58 = vpop.eup %6582  ;;  %v4724_v33 = vpop.f32.mrf.mxu0 }
 0x51c   : > { %4993 = vst [vmem:[%s7792_s29 + $0x388] sm:$0xff] %v6583_v58  ;;  %6596 = vtanh.f32 %v4733_v42  ;;  %v4725_v27 = vadd.f32 %v7969_v29, %v4724_v33 }
 0x51d   : > { %v6585_v60 = vpop.eup %6584  ;;  %v6294_v7 = vpop.f32.mrf.mxu0 }
 0x51e   : > { %4998 = vst [vmem:[%s7792_s29 + $0x3b0] sm:$0xff] %v6585_v60  ;;  %6598 = vtanh.f32 %v4725_v27  ;;  %v4746_v20 = vadd.f32 %v7969_v29, %v6294_v7 }
 0x51f   : > { %v6587_v61 = vpop.eup %6586  ;;  %v4737_v23 = vpop.f32.mrf.mxu0 }
 0x520   : > { %4996 = vst [vmem:[%s7792_s29 + $0x3a0] sm:$0xff] %v6587_v61  ;;  %6600 = vtanh.f32 %v4746_v20  ;;  %v4738_v48 = vadd.f32 %v7969_v29, %v4737_v23 }
 0x521   : > { %v6589_v28 = vpop.eup %6588  ;;  %v6295_v44 = vpop.f32.mrf.mxu0 }
 0x522   : > { %4999 = vst [vmem:[%s7792_s29 + $0x3b8] sm:$0xff] %v6589_v28  ;;  %6602 = vtanh.f32 %v4738_v48  ;;  %v4749_v59 = vadd.f32 %v7969_v29, %v6295_v44 }
 0x523   : > { %v6591_v13 = vpop.eup %6590  ;;  %v4740_v53 = vpop.f32.mrf.mxu0 }
 0x524   : > { %4997 = vst [vmem:[%s7792_s29 + $0x3a8] sm:$0xff] %v6591_v13  ;;  %6604 = vtanh.f32 %v4749_v59  ;;  %v4741_v55 = vadd.f32 %v7969_v29, %v4740_v53 }
 0x525   : > { %v6593_v51 = vpop.eup %6592 }
 0x526   : > { %5002 = vst [vmem:[%s7792_s29 + $0x3d0] sm:$0xff] %v6593_v51  ;;  %6606 = vtanh.f32 %v4741_v55 }
 0x527   : > { %v6595_v62 = vpop.eup %6594 }
 0x528   : > { %5000 = vst [vmem:[%s7792_s29 + $0x3c0] sm:$0xff] %v6595_v62 }
 0x529   : > { %v6597_v24 = vpop.eup %6596 }
 0x52a   : > { %5003 = vst [vmem:[%s7792_s29 + $0x3d8] sm:$0xff] %v6597_v24 }
 0x52b   : > { %v6599_v34 = vpop.eup %6598 }
 0x52c   : > { %5001 = vst [vmem:[%s7792_s29 + $0x3c8] sm:$0xff] %v6599_v34 }
 0x52d   : > { %v6601_v3 = vpop.eup %6600 }
 0x52e   : > { %5006 = vst [vmem:[%s7792_s29 + $0x3f0] sm:$0xff] %v6601_v3 }
 0x52f   : > { %v6603_v15 = vpop.eup %6602 }
 0x530   : > { %5004 = vst [vmem:[%s7792_s29 + $0x3e0] sm:$0xff] %v6603_v15 }
 0x531   : > { %v6605_v19 = vpop.eup %6604 }
 0x532   : > { %5007 = vst [vmem:[%s7792_s29 + $0x3f8] sm:$0xff] %v6605_v19 }
 0x533   : > { %v6607_v25 = vpop.eup %6606 }
 0x534   : > { %5005 = vst [vmem:[%s7792_s29 + $0x3e8] sm:$0xff] %v6607_v25 }
 0x535 PF: > { %s21_s17 = sadd.s32 1, %s6619_s17  }
 0x536   : > { %p18_p4 = scmp.ge.s32.totalorder %s21_s17, 4  }
 0x538   :  { %20 = sbr.rel (!%p18_p4) target bundleno = 1 (0x1), region = 94 }

</bundles_post_ra>
